<compile_context>
chip_gen: v5e
topology: v5e:2x2
jax: 0.10.0
libtpu: 0.0.40
codegen_flags: <defaults>
</compile_context>

<pallas_src>
import functools

import jax
import jax.numpy as jnp
from jax.experimental import pallas as pl
from jax.experimental.pallas import tpu as pltpu

EPS = 1e-5
LANES = 128                       # conv output channels padded to this
VMEM_LIMIT = 48 * 1024 * 1024     # explicit scoped-VMEM limit (< v7x 64 MiB physical)


def _round_up(n, m):
    return (n + m - 1) // m * m


# ----------------------------- kernel helpers -------------------------------

def _zero_border(xpad_ref, hp, wp):
    """Clear only the 1-pixel halo of the padded scratch.

    The interior is fully overwritten every grid step, so no full-scratch
    zeroing is needed. Done every step (not @pl.when(pid==0)) so it remains
    correct when the "parallel" batch axis is sharded across TensorCores.
    """
    wpad, c = xpad_ref.shape[1], xpad_ref.shape[2]
    zrow = jnp.zeros((1, wpad, c), xpad_ref.dtype)
    zcol = jnp.zeros((hp + 2, 1, c), xpad_ref.dtype)
    xpad_ref[0:1, :, :] = zrow
    xpad_ref[hp + 1:hp + 2, :, :] = zrow
    xpad_ref[:, 0:1, :] = zcol
    xpad_ref[:, wp + 1:wp + 2, :] = zcol


# ------------------------------- Pallas kernels -----------------------------

def _pool_conv_stats_kernel(x_ref, w_ref, y_ref, s_ref, q_ref, xpad_ref,
                            *, hp, wp, cin):
    """Fused MaxPool2d(2) + Conv2d(3x3, pad=1) + per-image BN partial stats.

    x_ref    : (Hp, 2, Wp, 2*Cin)  raw rows, parity-separable reshape of NHWC
    w_ref    : (9, Cin, Cpm)       bf16 conv1 weights (zero-padded Cout lanes)
    y_ref    : (Hp*Wp, Cpm)        bf16 conv output (pre-BN)
    s_ref/q_ref : (1, Cpm)         f32 per-image sum / sum-of-squares
    xpad_ref : (Hp+2, Wpad, Cin)   bf16 scratch (zero-halo pooled image)
    """
    cpm = y_ref.shape[-1]

    # --- 2x2 max pool entirely in VMEM -------------------------------------
    hm = jnp.maximum(x_ref[:, 0, :, :], x_ref[:, 1, :, :])   # max over H pairs
    pooled = jnp.maximum(hm[:, :, :cin], hm[:, :, cin:])     # max over W pairs

    # --- zero-halo pooled image, single bf16 cast ---------------------------
    _zero_border(xpad_ref, hp, wp)
    xpad_ref[1:hp + 1, 1:wp + 1, :] = pooled.astype(xpad_ref.dtype)

    # --- conv1: 9 shifted-slice matmuls (K = Cin) ---------------------------
    # TODO(synk): folding the 9 taps into one K=9*Cin GEMM needs an unaligned
    # lane concat when Cin=4; conv1's MXU cost is tiny vs conv2, kept simple.
    acc = jnp.zeros((hp * wp, cpm), jnp.float32)
    for dy in range(3):
        for dx in range(3):
            tap = xpad_ref[dy:dy + hp, dx:dx + wp, :].reshape(hp * wp, cin)
            acc += jnp.dot(tap, w_ref[dy * 3 + dx],
                           preferred_element_type=jnp.float32)

    y_ref[...] = acc.astype(y_ref.dtype)
    s_ref[...] = jnp.sum(acc, axis=0, keepdims=True)
    q_ref[...] = jnp.sum(acc * acc, axis=0, keepdims=True)


def _bnrelu_conv_stats_kernel(y_ref, sc_ref, sh_ref, w_ref, o_ref, s_ref,
                              q_ref, xpad_ref, *, hp, wp):
    """Fused BN-apply + ReLU + Conv2d(3x3, pad=1, dx folded into K) + stats.

    y_ref  : (Hp*Wp, Cpi)        bf16 previous conv output (pre-BN)
    sc_ref : (1, Cpi)            f32 fused BN scale (gamma * rsqrt(var+eps))
    sh_ref : (1, Cpi)            f32 fused BN shift (beta - mean*scale)
    w_ref  : (3, 3*Cpi, Cpo)     bf16 conv2 weights, dx folded into K
    o_ref  : (Hp*Wp, Cpo)        bf16 conv output (pre-BN)
    s_ref/q_ref : (1, Cpo)       f32 per-image sum / sum-of-squares
    xpad_ref    : (Hp+2, Wpad, Cpi) bf16 scratch
    """
    cpi = y_ref.shape[-1]
    cpo = o_ref.shape[-1]

    a = jnp.maximum(y_ref[...].astype(jnp.float32) * sc_ref[...] + sh_ref[...],
                    0.0)                                   # BN + ReLU (f32)

    _zero_border(xpad_ref, hp, wp)
    xpad_ref[1:hp + 1, 1:wp + 1, :] = a.reshape(hp, wp, cpi).astype(
        xpad_ref.dtype)                                    # single bf16 cast

    # --- conv2: dx folded into K -> 3 GEMMs with K = 3*Cpi (=384) -----------
    acc = jnp.zeros((hp * wp, cpo), jnp.float32)
    for dy in range(3):
        lhs = jnp.concatenate(
            [xpad_ref[dy:dy + hp, dx:dx + wp, :].reshape(hp * wp, cpi)
             for dx in range(3)],
            axis=-1)                                       # lane-aligned pieces
        acc += jnp.dot(lhs, w_ref[dy], preferred_element_type=jnp.float32)

    o_ref[...] = acc.astype(o_ref.dtype)
    s_ref[...] = jnp.sum(acc, axis=0, keepdims=True)
    q_ref[...] = jnp.sum(acc * acc, axis=0, keepdims=True)


def _bnrelu_out_kernel(y_ref, sc_ref, sh_ref, o_ref, *, cout):
    """Final BN-apply + ReLU, writing only the real Cout channels."""
    a = jnp.maximum(y_ref[...].astype(jnp.float32) * sc_ref[...] + sh_ref[...],
                    0.0)
    o_ref[...] = a[:, :cout]


# ------------------------------ pallas_call wrappers ------------------------

def _pool_conv_stats(xr, w1p, hp, wp, cin, cpm):
    B = xr.shape[0]
    wpad = _round_up(wp + 2, 8)
    kernel = functools.partial(_pool_conv_stats_kernel, hp=hp, wp=wp, cin=cin)
    return pl.pallas_call(
        kernel,
        grid=(B,),
        out_shape=(
            jax.ShapeDtypeStruct((B, hp * wp, cpm), jnp.bfloat16),
            jax.ShapeDtypeStruct((B, 1, cpm), jnp.float32),
            jax.ShapeDtypeStruct((B, 1, cpm), jnp.float32),
        ),
        in_specs=[
            pl.BlockSpec((None, hp, 2, wp, 2 * cin), lambda b: (b, 0, 0, 0, 0)),
            pl.BlockSpec((9, cin, cpm), lambda b: (0, 0, 0)),
        ],
        out_specs=(
            pl.BlockSpec((None, hp * wp, cpm), lambda b: (b, 0, 0)),
            pl.BlockSpec((None, 1, cpm), lambda b: (b, 0, 0)),
            pl.BlockSpec((None, 1, cpm), lambda b: (b, 0, 0)),
        ),
        scratch_shapes=[pltpu.VMEM((hp + 2, wpad, cin), jnp.bfloat16)],
        compiler_params=pltpu.CompilerParams(
            dimension_semantics=("parallel",), vmem_limit_bytes=VMEM_LIMIT),
    )(xr, w1p)


def _bnrelu_conv_stats(y1, scale, shift, w2f, hp, wp):
    B, _, cpi = y1.shape
    cpo = w2f.shape[-1]
    wpad = _round_up(wp + 2, 8)
    kernel = functools.partial(_bnrelu_conv_stats_kernel, hp=hp, wp=wp)
    return pl.pallas_call(
        kernel,
        grid=(B,),
        out_shape=(
            jax.ShapeDtypeStruct((B, hp * wp, cpo), jnp.bfloat16),
            jax.ShapeDtypeStruct((B, 1, cpo), jnp.float32),
            jax.ShapeDtypeStruct((B, 1, cpo), jnp.float32),
        ),
        in_specs=[
            pl.BlockSpec((None, hp * wp, cpi), lambda b: (b, 0, 0)),
            pl.BlockSpec((1, cpi), lambda b: (0, 0)),
            pl.BlockSpec((1, cpi), lambda b: (0, 0)),
            pl.BlockSpec((3, 3 * cpi, cpo), lambda b: (0, 0, 0)),
        ],
        out_specs=(
            pl.BlockSpec((None, hp * wp, cpo), lambda b: (b, 0, 0)),
            pl.BlockSpec((None, 1, cpo), lambda b: (b, 0, 0)),
            pl.BlockSpec((None, 1, cpo), lambda b: (b, 0, 0)),
        ),
        scratch_shapes=[pltpu.VMEM((hp + 2, wpad, cpi), jnp.bfloat16)],
        compiler_params=pltpu.CompilerParams(
            dimension_semantics=("parallel",), vmem_limit_bytes=VMEM_LIMIT),
    )(y1, scale, shift, w2f)


def _bnrelu_out(y2, scale, shift, hp, wp, cout):
    B, _, cpo = y2.shape
    kernel = functools.partial(_bnrelu_out_kernel, cout=cout)
    return pl.pallas_call(
        kernel,
        grid=(B,),
        out_shape=jax.ShapeDtypeStruct((B, hp * wp, cout), jnp.float32),
        in_specs=[
            pl.BlockSpec((None, hp * wp, cpo), lambda b: (b, 0, 0)),
            pl.BlockSpec((1, cpo), lambda b: (0, 0)),
            pl.BlockSpec((1, cpo), lambda b: (0, 0)),
        ],
        out_specs=pl.BlockSpec((None, hp * wp, cout), lambda b: (b, 0, 0)),
        compiler_params=pltpu.CompilerParams(
            dimension_semantics=("parallel",), vmem_limit_bytes=VMEM_LIMIT),
    )(y2, scale, shift)


def _bn_scale_shift(s_partial, q_partial, gamma_pad, beta_pad, count):
    """Exact training-mode BN affine from per-image partial sums (tiny op)."""
    total = jnp.sum(s_partial, axis=0)       # (1, Cpad)
    total_sq = jnp.sum(q_partial, axis=0)    # (1, Cpad)
    mean = total / count
    var = total_sq / count - mean * mean     # biased variance (torch training)
    scale = gamma_pad * jax.lax.rsqrt(var + EPS)
    shift = beta_pad - mean * scale
    return scale, shift


# ------------------------------ Module forward ------------------------------

def init_down_params(key, in_channels, out_channels):
    """Deterministic synthetic parameters (DoubleConv: mid = out_channels)."""
    mid = out_channels
    k1, k2 = jax.random.split(key)
    w1 = jax.random.normal(k1, (3, 3, in_channels, mid), jnp.float32) \
        * (1.0 / (3 * 3 * in_channels) ** 0.5)
    w2 = jax.random.normal(k2, (3, 3, mid, out_channels), jnp.float32) \
        * (1.0 / (3 * 3 * mid) ** 0.5)
    return dict(
        w1=w1, g1=jnp.ones((mid,), jnp.float32), b1=jnp.zeros((mid,), jnp.float32),
        w2=w2, g2=jnp.ones((out_channels,), jnp.float32),
        b2=jnp.zeros((out_channels,), jnp.float32),
    )


def down_forward(params, x_nchw):
    """Down.forward: maxpool(2) -> (conv3x3 + BN + ReLU) x 2.  x is NCHW."""
    x = jnp.transpose(x_nchw, (0, 2, 3, 1)).astype(jnp.float32)  # NCHW -> NHWC
    B, H, W, Cin = x.shape
    # TODO(synk): torch MaxPool2d(2) floors odd H/W; this path assumes even H, W.
    Hp, Wp = H // 2, W // 2

    Cmid = params["w1"].shape[-1]
    Cout = params["w2"].shape[-1]
    cpm = _round_up(Cmid, LANES)   # lane-padded conv1 output channels
    cpo = _round_up(Cout, LANES)   # lane-padded conv2 output channels

    # Lane-padded bf16 weights (tiny, constant-folded under jit).
    # NOTE: the padded lanes MUST remain exactly zero -- padded y1/y2 channels
    # are then exactly 0 and BN on those lanes (scale ~ rsqrt(eps)) is harmless.
    w1p = jnp.zeros((9, Cin, cpm), jnp.bfloat16)
    w1p = w1p.at[:, :, :Cmid].set(
        params["w1"].reshape(9, Cin, Cmid).astype(jnp.bfloat16))
    w2f = jnp.zeros((3, 3, cpm, cpo), jnp.bfloat16)
    w2f = w2f.at[:, :, :Cmid, :Cout].set(params["w2"].astype(jnp.bfloat16))
    w2f = w2f.reshape(3, 3 * cpm, cpo)   # dx folded into K: row = dx*cpm + ci

    g1p = jnp.zeros((1, cpm), jnp.float32).at[0, :Cmid].set(params["g1"])
    b1p = jnp.zeros((1, cpm), jnp.float32).at[0, :Cmid].set(params["b1"])
    g2p = jnp.zeros((1, cpo), jnp.float32).at[0, :Cout].set(params["g2"])
    b2p = jnp.zeros((1, cpo), jnp.float32).at[0, :Cout].set(params["b2"])

    # Free (contiguous) reshape: (B, Hp, 2, Wp, 2*Cin) -- row/col parities
    # become in-kernel slices, pooled image never touches HBM.
    xr = x.reshape(B, Hp, 2, Wp, 2 * Cin)

    n = B * Hp * Wp  # elements per channel for BN statistics

    # Stage 1: maxpool + conv1 + BN1 partial stats (fused).
    y1, s1, q1 = _pool_conv_stats(xr, w1p, Hp, Wp, Cin, cpm)
    sc1, sh1 = _bn_scale_shift(s1, q1, g1p, b1p, n)

    # Stage 2: BN1-apply + ReLU + conv2 (K-folded) + BN2 partial stats (fused).
    y2, s2, q2 = _bnrelu_conv_stats(y1, sc1, sh1, w2f, Hp, Wp)
    sc2, sh2 = _bn_scale_shift(s2, q2, g2p, b2p, n)

    # Stage 3: BN2-apply + ReLU, writing only the real Cout channels.
    out = _bnrelu_out(y2, sc2, sh2, Hp, Wp, Cout)       # (B, Hp*Wp, Cout) f32

    out = out.reshape(B, Hp, Wp, Cout)
    return jnp.transpose(out, (0, 3, 1, 2))  # NHWC -> NCHW (small final array)


# --------------------------- Pure-JAX reference -----------------------------

def down_reference(params, x_nchw):
    x = jnp.transpose(x_nchw, (0, 2, 3, 1)).astype(jnp.float32)
    B, H, W, C = x.shape
    x = jnp.max(x.reshape(B, H // 2, 2, W // 2, 2, C), axis=(2, 4))

    def conv_bn_relu(x, w, g, b):
        y = jax.lax.conv_general_dilated(
            x, w, (1, 1), "SAME",
            dimension_numbers=("NHWC", "HWIO", "NHWC"),
            precision=jax.lax.Precision.HIGHEST,
            preferred_element_type=jnp.float32)
        mean = jnp.mean(y, axis=(0, 1, 2), keepdims=True)
        var = jnp.mean(jnp.square(y - mean), axis=(0, 1, 2), keepdims=True)
        y_hat = (y - mean) * jax.lax.rsqrt(var + EPS)
        return jnp.maximum(y_hat * g + b, 0.0)

    x = conv_bn_relu(x, params["w1"], params["g1"], params["b1"])
    x = conv_bn_relu(x, params["w2"], params["g2"], params["b2"])
    return jnp.transpose(x, (0, 3, 1, 2))


# --------------------------------- Main --------------------------------------

if __name__ == "__main__":
    key = jax.random.PRNGKey(0)
    kx, kp = jax.random.split(key)

    in_channels, out_channels = 4, 8
    x = jax.random.normal(kx, (2, in_channels, 16, 16), jnp.float32)  # NCHW
    params = init_down_params(kp, in_channels, out_channels)

    out = jax.jit(down_forward)(params, x)
    out = jax.block_until_ready(out)

    assert out.shape == (2, out_channels, 8, 8), out.shape
    ref = down_reference(params, x)
    # Tolerance accounts for bf16 MXU operands AND bf16-stored inter-stage
    # intermediates (BN statistics / BN math remain f32).
    err = float(jnp.max(jnp.abs(out - ref)))
    assert jnp.allclose(out, ref, rtol=3e-2, atol=3e-2), err

    print("KERNEL_OK")
</pallas_src>

<mosaic_0001>
module attributes {stable_mosaic.version = 11 : i64} {
  func.func @_pool_conv_stats_kernel(%arg0: i32, %arg1: memref<1x8x2x8x8xf32, #tpu.memory_space<vmem>>, %arg2: memref<9x4x128xbf16, #tpu.memory_space<vmem>>, %arg3: memref<1x64x128xbf16, #tpu.memory_space<vmem>>, %arg4: memref<1x1x128xf32, #tpu.memory_space<vmem>>, %arg5: memref<1x1x128xf32, #tpu.memory_space<vmem>>, %arg6: memref<10x16x4xbf16, #tpu.memory_space<vmem>>) attributes {dimension_semantics = [#tpu.dimension_semantics<parallel>], iteration_bounds = array<i64: 2>, scalar_prefetch = 0 : i64, scratch_operands = 1 : i64, tpu.core_type = #tpu.core_type<tc>, window_params = [{transform_indices = @transform_0, window_bounds = array<i64: 1, 8, 2, 8, 8>}, {pipeline_mode = #tpu.pipeline_mode<synchronous>, transform_indices = @transform_1, window_bounds = array<i64: 9, 4, 128>}, {transform_indices = @transform_2, window_bounds = array<i64: 1, 64, 128>}, {transform_indices = @transform_3, window_bounds = array<i64: 1, 1, 128>}, {transform_indices = @transform_4, window_bounds = array<i64: 1, 1, 128>}]} {
    %c0 = arith.constant 0 : index
    %c0_0 = arith.constant 0 : index
    %c0_1 = arith.constant 0 : index
    %c0_2 = arith.constant 0 : index
    %c0_3 = arith.constant 0 : index
    %0 = vector.load %arg1[%c0, %c0_0, %c0_1, %c0_2, %c0_3] : memref<1x8x2x8x8xf32, #tpu.memory_space<vmem>>, vector<1x8x1x8x8xf32>
    %1 = vector.shape_cast %0 : vector<1x8x1x8x8xf32> to vector<8x8x8xf32>
    %c0_4 = arith.constant 0 : index
    %c0_5 = arith.constant 0 : index
    %c1 = arith.constant 1 : index
    %c0_6 = arith.constant 0 : index
    %c0_7 = arith.constant 0 : index
    %2 = vector.load %arg1[%c0_4, %c0_5, %c1, %c0_6, %c0_7] : memref<1x8x2x8x8xf32, #tpu.memory_space<vmem>>, vector<1x8x1x8x8xf32>
    %3 = vector.shape_cast %2 : vector<1x8x1x8x8xf32> to vector<8x8x8xf32>
    %4 = arith.maximumf %1, %3 : vector<8x8x8xf32>
    %5 = vector.extract_strided_slice %4 {offsets = [0, 0, 0], sizes = [8, 8, 4], strides = [1, 1, 1]} : vector<8x8x8xf32> to vector<8x8x4xf32>
    %6 = vector.extract_strided_slice %4 {offsets = [0, 0, 4], sizes = [8, 8, 4], strides = [1, 1, 1]} : vector<8x8x8xf32> to vector<8x8x4xf32>
    %7 = arith.maximumf %5, %6 : vector<8x8x4xf32>
    %cst = arith.constant 0.000000e+00 : bf16
    %8 = vector.broadcast %cst : bf16 to vector<1x16x4xbf16>
    %cst_8 = arith.constant 0.000000e+00 : bf16
    %9 = vector.broadcast %cst_8 : bf16 to vector<10x1x4xbf16>
    %c0_9 = arith.constant 0 : index
    %c0_10 = arith.constant 0 : index
    %c0_11 = arith.constant 0 : index
    %10 = vector.load %arg6[%c0_9, %c0_10, %c0_11] : memref<10x16x4xbf16, #tpu.memory_space<vmem>>, vector<1x16x4xbf16>
    tpu.vector_store %arg6[%c0_9, %c0_10, %c0_11], %8 {strides = array<i32>} : memref<10x16x4xbf16, #tpu.memory_space<vmem>>, vector<1x16x4xbf16>,
    %c9 = arith.constant 9 : index
    %c0_12 = arith.constant 0 : index
    %c0_13 = arith.constant 0 : index
    %11 = vector.load %arg6[%c9, %c0_12, %c0_13] : memref<10x16x4xbf16, #tpu.memory_space<vmem>>, vector<1x16x4xbf16>
    tpu.vector_store %arg6[%c9, %c0_12, %c0_13], %8 {strides = array<i32>} : memref<10x16x4xbf16, #tpu.memory_space<vmem>>, vector<1x16x4xbf16>,
    %c0_14 = arith.constant 0 : index
    %c0_15 = arith.constant 0 : index
    %c0_16 = arith.constant 0 : index
    %12 = vector.load %arg6[%c0_14, %c0_15, %c0_16] : memref<10x16x4xbf16, #tpu.memory_space<vmem>>, vector<10x1x4xbf16>
    tpu.vector_store %arg6[%c0_14, %c0_15, %c0_16], %9 {strides = array<i32>} : memref<10x16x4xbf16, #tpu.memory_space<vmem>>, vector<10x1x4xbf16>,
    %c0_17 = arith.constant 0 : index
    %c9_18 = arith.constant 9 : index
    %c0_19 = arith.constant 0 : index
    %13 = vector.load %arg6[%c0_17, %c9_18, %c0_19] : memref<10x16x4xbf16, #tpu.memory_space<vmem>>, vector<10x1x4xbf16>
    tpu.vector_store %arg6[%c0_17, %c9_18, %c0_19], %9 {strides = array<i32>} : memref<10x16x4xbf16, #tpu.memory_space<vmem>>, vector<10x1x4xbf16>,
    %14 = arith.truncf %7 : vector<8x8x4xf32> to vector<8x8x4xbf16>
    %c1_20 = arith.constant 1 : index
    %c1_21 = arith.constant 1 : index
    %c0_22 = arith.constant 0 : index
    %15 = vector.load %arg6[%c1_20, %c1_21, %c0_22] : memref<10x16x4xbf16, #tpu.memory_space<vmem>>, vector<8x8x4xbf16>
    tpu.vector_store %arg6[%c1_20, %c1_21, %c0_22], %14 {strides = array<i32>} : memref<10x16x4xbf16, #tpu.memory_space<vmem>>, vector<8x8x4xbf16>,
    %cst_23 = arith.constant 0.000000e+00 : f32
    %16 = vector.broadcast %cst_23 : f32 to vector<64x128xf32>
    %c0_24 = arith.constant 0 : index
    %c0_25 = arith.constant 0 : index
    %c0_26 = arith.constant 0 : index
    %17 = vector.load %arg6[%c0_24, %c0_25, %c0_26] : memref<10x16x4xbf16, #tpu.memory_space<vmem>>, vector<8x8x4xbf16>
    %18 = vector.shape_cast %17 : vector<8x8x4xbf16> to vector<64x4xbf16>
    %c0_27 = arith.constant 0 : index
    %c0_28 = arith.constant 0 : index
    %c0_29 = arith.constant 0 : index
    %19 = vector.load %arg2[%c0_27, %c0_28, %c0_29] : memref<9x4x128xbf16, #tpu.memory_space<vmem>>, vector<1x4x128xbf16>
    %20 = vector.shape_cast %19 : vector<1x4x128xbf16> to vector<4x128xbf16>
    %cst_30 = arith.constant dense<0.000000e+00> : vector<64x128xf32>
    %21 = tpu.matmul %18, %20, %cst_30 {dimension_numbers = #tpu.dot_dimension_numbers<[1], [0], [0], [1], [0, 0, 1, 1], [], []>} : vector<64x4xbf16>, vector<4x128xbf16>, vector<64x128xf32> -> vector<64x128xf32>
    %22 = arith.addf %16, %21 : vector<64x128xf32>
    %c0_31 = arith.constant 0 : index
    %c1_32 = arith.constant 1 : index
    %c0_33 = arith.constant 0 : index
    %23 = vector.load %arg6[%c0_31, %c1_32, %c0_33] : memref<10x16x4xbf16, #tpu.memory_space<vmem>>, vector<8x8x4xbf16>
    %24 = vector.shape_cast %23 : vector<8x8x4xbf16> to vector<64x4xbf16>
    %c1_34 = arith.constant 1 : index
    %c0_35 = arith.constant 0 : index
    %c0_36 = arith.constant 0 : index
    %25 = vector.load %arg2[%c1_34, %c0_35, %c0_36] : memref<9x4x128xbf16, #tpu.memory_space<vmem>>, vector<1x4x128xbf16>
    %26 = vector.shape_cast %25 : vector<1x4x128xbf16> to vector<4x128xbf16>
    %cst_37 = arith.constant dense<0.000000e+00> : vector<64x128xf32>
    %27 = tpu.matmul %24, %26, %cst_37 {dimension_numbers = #tpu.dot_dimension_numbers<[1], [0], [0], [1], [0, 0, 1, 1], [], []>} : vector<64x4xbf16>, vector<4x128xbf16>, vector<64x128xf32> -> vector<64x128xf32>
    %28 = arith.addf %22, %27 : vector<64x128xf32>
    %c0_38 = arith.constant 0 : index
    %c2 = arith.constant 2 : index
    %c0_39 = arith.constant 0 : index
    %29 = vector.load %arg6[%c0_38, %c2, %c0_39] : memref<10x16x4xbf16, #tpu.memory_space<vmem>>, vector<8x8x4xbf16>
    %30 = vector.shape_cast %29 : vector<8x8x4xbf16> to vector<64x4xbf16>
    %c2_40 = arith.constant 2 : index
    %c0_41 = arith.constant 0 : index
    %c0_42 = arith.constant 0 : index
    %31 = vector.load %arg2[%c2_40, %c0_41, %c0_42] : memref<9x4x128xbf16, #tpu.memory_space<vmem>>, vector<1x4x128xbf16>
    %32 = vector.shape_cast %31 : vector<1x4x128xbf16> to vector<4x128xbf16>
    %cst_43 = arith.constant dense<0.000000e+00> : vector<64x128xf32>
    %33 = tpu.matmul %30, %32, %cst_43 {dimension_numbers = #tpu.dot_dimension_numbers<[1], [0], [0], [1], [0, 0, 1, 1], [], []>} : vector<64x4xbf16>, vector<4x128xbf16>, vector<64x128xf32> -> vector<64x128xf32>
    %34 = arith.addf %28, %33 : vector<64x128xf32>
    %c1_44 = arith.constant 1 : index
    %c0_45 = arith.constant 0 : index
    %c0_46 = arith.constant 0 : index
    %35 = vector.load %arg6[%c1_44, %c0_45, %c0_46] : memref<10x16x4xbf16, #tpu.memory_space<vmem>>, vector<8x8x4xbf16>
    %36 = vector.shape_cast %35 : vector<8x8x4xbf16> to vector<64x4xbf16>
    %c3 = arith.constant 3 : index
    %c0_47 = arith.constant 0 : index
    %c0_48 = arith.constant 0 : index
    %37 = vector.load %arg2[%c3, %c0_47, %c0_48] : memref<9x4x128xbf16, #tpu.memory_space<vmem>>, vector<1x4x128xbf16>
    %38 = vector.shape_cast %37 : vector<1x4x128xbf16> to vector<4x128xbf16>
    %cst_49 = arith.constant dense<0.000000e+00> : vector<64x128xf32>
    %39 = tpu.matmul %36, %38, %cst_49 {dimension_numbers = #tpu.dot_dimension_numbers<[1], [0], [0], [1], [0, 0, 1, 1], [], []>} : vector<64x4xbf16>, vector<4x128xbf16>, vector<64x128xf32> -> vector<64x128xf32>
    %40 = arith.addf %34, %39 : vector<64x128xf32>
    %c1_50 = arith.constant 1 : index
    %c1_51 = arith.constant 1 : index
    %c0_52 = arith.constant 0 : index
    %41 = vector.load %arg6[%c1_50, %c1_51, %c0_52] : memref<10x16x4xbf16, #tpu.memory_space<vmem>>, vector<8x8x4xbf16>
    %42 = vector.shape_cast %41 : vector<8x8x4xbf16> to vector<64x4xbf16>
    %c4 = arith.constant 4 : index
    %c0_53 = arith.constant 0 : index
    %c0_54 = arith.constant 0 : index
    %43 = vector.load %arg2[%c4, %c0_53, %c0_54] : memref<9x4x128xbf16, #tpu.memory_space<vmem>>, vector<1x4x128xbf16>
    %44 = vector.shape_cast %43 : vector<1x4x128xbf16> to vector<4x128xbf16>
    %cst_55 = arith.constant dense<0.000000e+00> : vector<64x128xf32>
    %45 = tpu.matmul %42, %44, %cst_55 {dimension_numbers = #tpu.dot_dimension_numbers<[1], [0], [0], [1], [0, 0, 1, 1], [], []>} : vector<64x4xbf16>, vector<4x128xbf16>, vector<64x128xf32> -> vector<64x128xf32>
    %46 = arith.addf %40, %45 : vector<64x128xf32>
    %c1_56 = arith.constant 1 : index
    %c2_57 = arith.constant 2 : index
    %c0_58 = arith.constant 0 : index
    %47 = vector.load %arg6[%c1_56, %c2_57, %c0_58] : memref<10x16x4xbf16, #tpu.memory_space<vmem>>, vector<8x8x4xbf16>
    %48 = vector.shape_cast %47 : vector<8x8x4xbf16> to vector<64x4xbf16>
    %c5 = arith.constant 5 : index
    %c0_59 = arith.constant 0 : index
    %c0_60 = arith.constant 0 : index
    %49 = vector.load %arg2[%c5, %c0_59, %c0_60] : memref<9x4x128xbf16, #tpu.memory_space<vmem>>, vector<1x4x128xbf16>
    %50 = vector.shape_cast %49 : vector<1x4x128xbf16> to vector<4x128xbf16>
    %cst_61 = arith.constant dense<0.000000e+00> : vector<64x128xf32>
    %51 = tpu.matmul %48, %50, %cst_61 {dimension_numbers = #tpu.dot_dimension_numbers<[1], [0], [0], [1], [0, 0, 1, 1], [], []>} : vector<64x4xbf16>, vector<4x128xbf16>, vector<64x128xf32> -> vector<64x128xf32>
    %52 = arith.addf %46, %51 : vector<64x128xf32>
    %c2_62 = arith.constant 2 : index
    %c0_63 = arith.constant 0 : index
    %c0_64 = arith.constant 0 : index
    %53 = vector.load %arg6[%c2_62, %c0_63, %c0_64] : memref<10x16x4xbf16, #tpu.memory_space<vmem>>, vector<8x8x4xbf16>
    %54 = vector.shape_cast %53 : vector<8x8x4xbf16> to vector<64x4xbf16>
    %c6 = arith.constant 6 : index
    %c0_65 = arith.constant 0 : index
    %c0_66 = arith.constant 0 : index
    %55 = vector.load %arg2[%c6, %c0_65, %c0_66] : memref<9x4x128xbf16, #tpu.memory_space<vmem>>, vector<1x4x128xbf16>
    %56 = vector.shape_cast %55 : vector<1x4x128xbf16> to vector<4x128xbf16>
    %cst_67 = arith.constant dense<0.000000e+00> : vector<64x128xf32>
    %57 = tpu.matmul %54, %56, %cst_67 {dimension_numbers = #tpu.dot_dimension_numbers<[1], [0], [0], [1], [0, 0, 1, 1], [], []>} : vector<64x4xbf16>, vector<4x128xbf16>, vector<64x128xf32> -> vector<64x128xf32>
    %58 = arith.addf %52, %57 : vector<64x128xf32>
    %c2_68 = arith.constant 2 : index
    %c1_69 = arith.constant 1 : index
    %c0_70 = arith.constant 0 : index
    %59 = vector.load %arg6[%c2_68, %c1_69, %c0_70] : memref<10x16x4xbf16, #tpu.memory_space<vmem>>, vector<8x8x4xbf16>
    %60 = vector.shape_cast %59 : vector<8x8x4xbf16> to vector<64x4xbf16>
    %c7 = arith.constant 7 : index
    %c0_71 = arith.constant 0 : index
    %c0_72 = arith.constant 0 : index
    %61 = vector.load %arg2[%c7, %c0_71, %c0_72] : memref<9x4x128xbf16, #tpu.memory_space<vmem>>, vector<1x4x128xbf16>
    %62 = vector.shape_cast %61 : vector<1x4x128xbf16> to vector<4x128xbf16>
    %cst_73 = arith.constant dense<0.000000e+00> : vector<64x128xf32>
    %63 = tpu.matmul %60, %62, %cst_73 {dimension_numbers = #tpu.dot_dimension_numbers<[1], [0], [0], [1], [0, 0, 1, 1], [], []>} : vector<64x4xbf16>, vector<4x128xbf16>, vector<64x128xf32> -> vector<64x128xf32>
    %64 = arith.addf %58, %63 : vector<64x128xf32>
    %c2_74 = arith.constant 2 : index
    %c2_75 = arith.constant 2 : index
    %c0_76 = arith.constant 0 : index
    %65 = vector.load %arg6[%c2_74, %c2_75, %c0_76] : memref<10x16x4xbf16, #tpu.memory_space<vmem>>, vector<8x8x4xbf16>
    %66 = vector.shape_cast %65 : vector<8x8x4xbf16> to vector<64x4xbf16>
    %c8 = arith.constant 8 : index
    %c0_77 = arith.constant 0 : index
    %c0_78 = arith.constant 0 : index
    %67 = vector.load %arg2[%c8, %c0_77, %c0_78] : memref<9x4x128xbf16, #tpu.memory_space<vmem>>, vector<1x4x128xbf16>
    %68 = vector.shape_cast %67 : vector<1x4x128xbf16> to vector<4x128xbf16>
    %cst_79 = arith.constant dense<0.000000e+00> : vector<64x128xf32>
    %69 = tpu.matmul %66, %68, %cst_79 {dimension_numbers = #tpu.dot_dimension_numbers<[1], [0], [0], [1], [0, 0, 1, 1], [], []>} : vector<64x4xbf16>, vector<4x128xbf16>, vector<64x128xf32> -> vector<64x128xf32>
    %70 = arith.addf %64, %69 : vector<64x128xf32>
    %71 = arith.truncf %70 : vector<64x128xf32> to vector<64x128xbf16>
    %c0_80 = arith.constant 0 : index
    %c0_81 = arith.constant 0 : index
    %c0_82 = arith.constant 0 : index
    %72 = vector.load %arg3[%c0_80, %c0_81, %c0_82] : memref<1x64x128xbf16, #tpu.memory_space<vmem>>, vector<1x64x128xbf16>
    %73 = vector.shape_cast %72 : vector<1x64x128xbf16> to vector<64x128xbf16>
    %74 = vector.shape_cast %71 : vector<64x128xbf16> to vector<1x64x128xbf16>
    tpu.vector_store %arg3[%c0_80, %c0_81, %c0_82], %74 {strides = array<i32>} : memref<1x64x128xbf16, #tpu.memory_space<vmem>>, vector<1x64x128xbf16>,
    %cst_83 = arith.constant dense<0.000000e+00> : vector<128xf32>
    %75 = vector.multi_reduction <add>, %70, %cst_83 [0] : vector<64x128xf32> to vector<128xf32>
    %76 = vector.shape_cast %75 : vector<128xf32> to vector<1x128xf32>
    %c0_84 = arith.constant 0 : index
    %c0_85 = arith.constant 0 : index
    %c0_86 = arith.constant 0 : index
    %77 = vector.load %arg4[%c0_84, %c0_85, %c0_86] : memref<1x1x128xf32, #tpu.memory_space<vmem>>, vector<1x1x128xf32>
    %78 = vector.shape_cast %77 : vector<1x1x128xf32> to vector<1x128xf32>
    %79 = vector.shape_cast %76 : vector<1x128xf32> to vector<1x1x128xf32>
    tpu.vector_store %arg4[%c0_84, %c0_85, %c0_86], %79 {strides = array<i32>} : memref<1x1x128xf32, #tpu.memory_space<vmem>>, vector<1x1x128xf32>,
    %80 = arith.mulf %70, %70 : vector<64x128xf32>
    %cst_87 = arith.constant dense<0.000000e+00> : vector<128xf32>
    %81 = vector.multi_reduction <add>, %80, %cst_87 [0] : vector<64x128xf32> to vector<128xf32>
    %82 = vector.shape_cast %81 : vector<128xf32> to vector<1x128xf32>
    %c0_88 = arith.constant 0 : index
    %c0_89 = arith.constant 0 : index
    %c0_90 = arith.constant 0 : index
    %83 = vector.load %arg5[%c0_88, %c0_89, %c0_90] : memref<1x1x128xf32, #tpu.memory_space<vmem>>, vector<1x1x128xf32>
    %84 = vector.shape_cast %83 : vector<1x1x128xf32> to vector<1x128xf32>
    %85 = vector.shape_cast %82 : vector<1x128xf32> to vector<1x1x128xf32>
    tpu.vector_store %arg5[%c0_88, %c0_89, %c0_90], %85 {strides = array<i32>} : memref<1x1x128xf32, #tpu.memory_space<vmem>>, vector<1x1x128xf32>,
    return
  }
  func.func @transform_0(%arg0: i32) -> (i32, i32, i32, i32, i32) {
    %c0_i32 = arith.constant 0 : i32
    %c0_i32_0 = arith.constant 0 : i32
    %c0_i32_1 = arith.constant 0 : i32
    %c0_i32_2 = arith.constant 0 : i32
    %c0_i32_3 = arith.constant 0 : i32
    return %arg0, %c0_i32, %c0_i32_0, %c0_i32_1, %c0_i32_2 : i32, i32, i32, i32, i32
  }
  func.func @transform_1(%arg0: i32) -> (i32, i32, i32) {
    %c0_i32 = arith.constant 0 : i32
    %c0_i32_0 = arith.constant 0 : i32
    %c0_i32_1 = arith.constant 0 : i32
    %c0_i32_2 = arith.constant 0 : i32
    return %c0_i32, %c0_i32_0, %c0_i32_1 : i32, i32, i32
  }
  func.func @transform_2(%arg0: i32) -> (i32, i32, i32) {
    %c0_i32 = arith.constant 0 : i32
    %c0_i32_0 = arith.constant 0 : i32
    %c0_i32_1 = arith.constant 0 : i32
    return %arg0, %c0_i32, %c0_i32_0 : i32, i32, i32
  }
  func.func @transform_3(%arg0: i32) -> (i32, i32, i32) {
    %c0_i32 = arith.constant 0 : i32
    %c0_i32_0 = arith.constant 0 : i32
    %c0_i32_1 = arith.constant 0 : i32
    return %arg0, %c0_i32, %c0_i32_0 : i32, i32, i32
  }
  func.func @transform_4(%arg0: i32) -> (i32, i32, i32) {
    %c0_i32 = arith.constant 0 : i32
    %c0_i32_0 = arith.constant 0 : i32
    %c0_i32_1 = arith.constant 0 : i32
    return %arg0, %c0_i32, %c0_i32_0 : i32, i32, i32
  }
}

module attributes {stable_mosaic.version = 11 : i64} {
  func.func @_bnrelu_conv_stats_kernel(%arg0: i32, %arg1: memref<1x64x128xbf16, #tpu.memory_space<vmem>>, %arg2: memref<1x128xf32, #tpu.memory_space<vmem>>, %arg3: memref<1x128xf32, #tpu.memory_space<vmem>>, %arg4: memref<3x384x128xbf16, #tpu.memory_space<vmem>>, %arg5: memref<1x64x128xbf16, #tpu.memory_space<vmem>>, %arg6: memref<1x1x128xf32, #tpu.memory_space<vmem>>, %arg7: memref<1x1x128xf32, #tpu.memory_space<vmem>>, %arg8: memref<10x16x128xbf16, #tpu.memory_space<vmem>>) attributes {dimension_semantics = [#tpu.dimension_semantics<parallel>], iteration_bounds = array<i64: 2>, scalar_prefetch = 0 : i64, scratch_operands = 1 : i64, tpu.core_type = #tpu.core_type<tc>, window_params = [{transform_indices = @transform_0, window_bounds = array<i64: 1, 64, 128>}, {pipeline_mode = #tpu.pipeline_mode<synchronous>, transform_indices = @transform_1, window_bounds = array<i64: 1, 128>}, {pipeline_mode = #tpu.pipeline_mode<synchronous>, transform_indices = @transform_2, window_bounds = array<i64: 1, 128>}, {pipeline_mode = #tpu.pipeline_mode<synchronous>, transform_indices = @transform_3, window_bounds = array<i64: 3, 384, 128>}, {transform_indices = @transform_4, window_bounds = array<i64: 1, 64, 128>}, {transform_indices = @transform_5, window_bounds = array<i64: 1, 1, 128>}, {transform_indices = @transform_6, window_bounds = array<i64: 1, 1, 128>}]} {
    %c0 = arith.constant 0 : index
    %c0_0 = arith.constant 0 : index
    %c0_1 = arith.constant 0 : index
    %0 = vector.load %arg1[%c0, %c0_0, %c0_1] : memref<1x64x128xbf16, #tpu.memory_space<vmem>>, vector<1x64x128xbf16>
    %1 = vector.shape_cast %0 : vector<1x64x128xbf16> to vector<64x128xbf16>
    %2 = arith.extf %1 : vector<64x128xbf16> to vector<64x128xf32>
    %c0_2 = arith.constant 0 : index
    %c0_3 = arith.constant 0 : index
    %3 = vector.load %arg2[%c0_2, %c0_3] : memref<1x128xf32, #tpu.memory_space<vmem>>, vector<1x128xf32>
    %4 = vector.broadcast %3 : vector<1x128xf32> to vector<64x128xf32>
    %5 = arith.mulf %2, %4 : vector<64x128xf32>
    %c0_4 = arith.constant 0 : index
    %c0_5 = arith.constant 0 : index
    %6 = vector.load %arg3[%c0_4, %c0_5] : memref<1x128xf32, #tpu.memory_space<vmem>>, vector<1x128xf32>
    %7 = vector.broadcast %6 : vector<1x128xf32> to vector<64x128xf32>
    %8 = arith.addf %5, %7 : vector<64x128xf32>
    %cst = arith.constant 0.000000e+00 : f32
    %9 = vector.broadcast %cst : f32 to vector<64x128xf32>
    %10 = arith.maximumf %8, %9 : vector<64x128xf32>
    %cst_6 = arith.constant 0.000000e+00 : bf16
    %11 = vector.broadcast %cst_6 : bf16 to vector<1x16x128xbf16>
    %cst_7 = arith.constant 0.000000e+00 : bf16
    %12 = vector.broadcast %cst_7 : bf16 to vector<10x1x128xbf16>
    %c0_8 = arith.constant 0 : index
    %c0_9 = arith.constant 0 : index
    %c0_10 = arith.constant 0 : index
    %13 = vector.load %arg8[%c0_8, %c0_9, %c0_10] : memref<10x16x128xbf16, #tpu.memory_space<vmem>>, vector<1x16x128xbf16>
    tpu.vector_store %arg8[%c0_8, %c0_9, %c0_10], %11 {strides = array<i32>} : memref<10x16x128xbf16, #tpu.memory_space<vmem>>, vector<1x16x128xbf16>,
    %c9 = arith.constant 9 : index
    %c0_11 = arith.constant 0 : index
    %c0_12 = arith.constant 0 : index
    %14 = vector.load %arg8[%c9, %c0_11, %c0_12] : memref<10x16x128xbf16, #tpu.memory_space<vmem>>, vector<1x16x128xbf16>
    tpu.vector_store %arg8[%c9, %c0_11, %c0_12], %11 {strides = array<i32>} : memref<10x16x128xbf16, #tpu.memory_space<vmem>>, vector<1x16x128xbf16>,
    %c0_13 = arith.constant 0 : index
    %c0_14 = arith.constant 0 : index
    %c0_15 = arith.constant 0 : index
    %15 = vector.load %arg8[%c0_13, %c0_14, %c0_15] : memref<10x16x128xbf16, #tpu.memory_space<vmem>>, vector<10x1x128xbf16>
    tpu.vector_store %arg8[%c0_13, %c0_14, %c0_15], %12 {strides = array<i32>} : memref<10x16x128xbf16, #tpu.memory_space<vmem>>, vector<10x1x128xbf16>,
    %c0_16 = arith.constant 0 : index
    %c9_17 = arith.constant 9 : index
    %c0_18 = arith.constant 0 : index
    %16 = vector.load %arg8[%c0_16, %c9_17, %c0_18] : memref<10x16x128xbf16, #tpu.memory_space<vmem>>, vector<10x1x128xbf16>
    tpu.vector_store %arg8[%c0_16, %c9_17, %c0_18], %12 {strides = array<i32>} : memref<10x16x128xbf16, #tpu.memory_space<vmem>>, vector<10x1x128xbf16>,
    %17 = vector.shape_cast %10 : vector<64x128xf32> to vector<8x8x128xf32>
    %18 = arith.truncf %17 : vector<8x8x128xf32> to vector<8x8x128xbf16>
    %c1 = arith.constant 1 : index
    %c1_19 = arith.constant 1 : index
    %c0_20 = arith.constant 0 : index
    %19 = vector.load %arg8[%c1, %c1_19, %c0_20] : memref<10x16x128xbf16, #tpu.memory_space<vmem>>, vector<8x8x128xbf16>
    tpu.vector_store %arg8[%c1, %c1_19, %c0_20], %18 {strides = array<i32>} : memref<10x16x128xbf16, #tpu.memory_space<vmem>>, vector<8x8x128xbf16>,
    %cst_21 = arith.constant 0.000000e+00 : f32
    %20 = vector.broadcast %cst_21 : f32 to vector<64x128xf32>
    %c0_22 = arith.constant 0 : index
    %c0_23 = arith.constant 0 : index
    %c0_24 = arith.constant 0 : index
    %21 = vector.load %arg8[%c0_22, %c0_23, %c0_24] : memref<10x16x128xbf16, #tpu.memory_space<vmem>>, vector<8x8x128xbf16>
    %22 = vector.shape_cast %21 : vector<8x8x128xbf16> to vector<64x128xbf16>
    %c0_25 = arith.constant 0 : index
    %c1_26 = arith.constant 1 : index
    %c0_27 = arith.constant 0 : index
    %23 = vector.load %arg8[%c0_25, %c1_26, %c0_27] : memref<10x16x128xbf16, #tpu.memory_space<vmem>>, vector<8x8x128xbf16>
    %24 = vector.shape_cast %23 : vector<8x8x128xbf16> to vector<64x128xbf16>
    %c0_28 = arith.constant 0 : index
    %c2 = arith.constant 2 : index
    %c0_29 = arith.constant 0 : index
    %25 = vector.load %arg8[%c0_28, %c2, %c0_29] : memref<10x16x128xbf16, #tpu.memory_space<vmem>>, vector<8x8x128xbf16>
    %26 = vector.shape_cast %25 : vector<8x8x128xbf16> to vector<64x128xbf16>
    %27 = tpu.concatenate %22, %24, %26 in 1 : vector<64x128xbf16>, vector<64x128xbf16>, vector<64x128xbf16> -> vector<64x384xbf16>
    %c0_30 = arith.constant 0 : index
    %c0_31 = arith.constant 0 : index
    %c0_32 = arith.constant 0 : index
    %28 = vector.load %arg4[%c0_30, %c0_31, %c0_32] : memref<3x384x128xbf16, #tpu.memory_space<vmem>>, vector<1x384x128xbf16>
    %29 = vector.shape_cast %28 : vector<1x384x128xbf16> to vector<384x128xbf16>
    %cst_33 = arith.constant dense<0.000000e+00> : vector<64x128xf32>
    %30 = tpu.matmul %27, %29, %cst_33 {dimension_numbers = #tpu.dot_dimension_numbers<[1], [0], [0], [1], [0, 0, 1, 1], [], []>} : vector<64x384xbf16>, vector<384x128xbf16>, vector<64x128xf32> -> vector<64x128xf32>
    %31 = arith.addf %20, %30 : vector<64x128xf32>
    %c1_34 = arith.constant 1 : index
    %c0_35 = arith.constant 0 : index
    %c0_36 = arith.constant 0 : index
    %32 = vector.load %arg8[%c1_34, %c0_35, %c0_36] : memref<10x16x128xbf16, #tpu.memory_space<vmem>>, vector<8x8x128xbf16>
    %33 = vector.shape_cast %32 : vector<8x8x128xbf16> to vector<64x128xbf16>
    %c1_37 = arith.constant 1 : index
    %c1_38 = arith.constant 1 : index
    %c0_39 = arith.constant 0 : index
    %34 = vector.load %arg8[%c1_37, %c1_38, %c0_39] : memref<10x16x128xbf16, #tpu.memory_space<vmem>>, vector<8x8x128xbf16>
    %35 = vector.shape_cast %34 : vector<8x8x128xbf16> to vector<64x128xbf16>
    %c1_40 = arith.constant 1 : index
    %c2_41 = arith.constant 2 : index
    %c0_42 = arith.constant 0 : index
    %36 = vector.load %arg8[%c1_40, %c2_41, %c0_42] : memref<10x16x128xbf16, #tpu.memory_space<vmem>>, vector<8x8x128xbf16>
    %37 = vector.shape_cast %36 : vector<8x8x128xbf16> to vector<64x128xbf16>
    %38 = tpu.concatenate %33, %35, %37 in 1 : vector<64x128xbf16>, vector<64x128xbf16>, vector<64x128xbf16> -> vector<64x384xbf16>
    %c1_43 = arith.constant 1 : index
    %c0_44 = arith.constant 0 : index
    %c0_45 = arith.constant 0 : index
    %39 = vector.load %arg4[%c1_43, %c0_44, %c0_45] : memref<3x384x128xbf16, #tpu.memory_space<vmem>>, vector<1x384x128xbf16>
    %40 = vector.shape_cast %39 : vector<1x384x128xbf16> to vector<384x128xbf16>
    %cst_46 = arith.constant dense<0.000000e+00> : vector<64x128xf32>
    %41 = tpu.matmul %38, %40, %cst_46 {dimension_numbers = #tpu.dot_dimension_numbers<[1], [0], [0], [1], [0, 0, 1, 1], [], []>} : vector<64x384xbf16>, vector<384x128xbf16>, vector<64x128xf32> -> vector<64x128xf32>
    %42 = arith.addf %31, %41 : vector<64x128xf32>
    %c2_47 = arith.constant 2 : index
    %c0_48 = arith.constant 0 : index
    %c0_49 = arith.constant 0 : index
    %43 = vector.load %arg8[%c2_47, %c0_48, %c0_49] : memref<10x16x128xbf16, #tpu.memory_space<vmem>>, vector<8x8x128xbf16>
    %44 = vector.shape_cast %43 : vector<8x8x128xbf16> to vector<64x128xbf16>
    %c2_50 = arith.constant 2 : index
    %c1_51 = arith.constant 1 : index
    %c0_52 = arith.constant 0 : index
    %45 = vector.load %arg8[%c2_50, %c1_51, %c0_52] : memref<10x16x128xbf16, #tpu.memory_space<vmem>>, vector<8x8x128xbf16>
    %46 = vector.shape_cast %45 : vector<8x8x128xbf16> to vector<64x128xbf16>
    %c2_53 = arith.constant 2 : index
    %c2_54 = arith.constant 2 : index
    %c0_55 = arith.constant 0 : index
    %47 = vector.load %arg8[%c2_53, %c2_54, %c0_55] : memref<10x16x128xbf16, #tpu.memory_space<vmem>>, vector<8x8x128xbf16>
    %48 = vector.shape_cast %47 : vector<8x8x128xbf16> to vector<64x128xbf16>
    %49 = tpu.concatenate %44, %46, %48 in 1 : vector<64x128xbf16>, vector<64x128xbf16>, vector<64x128xbf16> -> vector<64x384xbf16>
    %c2_56 = arith.constant 2 : index
    %c0_57 = arith.constant 0 : index
    %c0_58 = arith.constant 0 : index
    %50 = vector.load %arg4[%c2_56, %c0_57, %c0_58] : memref<3x384x128xbf16, #tpu.memory_space<vmem>>, vector<1x384x128xbf16>
    %51 = vector.shape_cast %50 : vector<1x384x128xbf16> to vector<384x128xbf16>
    %cst_59 = arith.constant dense<0.000000e+00> : vector<64x128xf32>
    %52 = tpu.matmul %49, %51, %cst_59 {dimension_numbers = #tpu.dot_dimension_numbers<[1], [0], [0], [1], [0, 0, 1, 1], [], []>} : vector<64x384xbf16>, vector<384x128xbf16>, vector<64x128xf32> -> vector<64x128xf32>
    %53 = arith.addf %42, %52 : vector<64x128xf32>
    %54 = arith.truncf %53 : vector<64x128xf32> to vector<64x128xbf16>
    %c0_60 = arith.constant 0 : index
    %c0_61 = arith.constant 0 : index
    %c0_62 = arith.constant 0 : index
    %55 = vector.load %arg5[%c0_60, %c0_61, %c0_62] : memref<1x64x128xbf16, #tpu.memory_space<vmem>>, vector<1x64x128xbf16>
    %56 = vector.shape_cast %55 : vector<1x64x128xbf16> to vector<64x128xbf16>
    %57 = vector.shape_cast %54 : vector<64x128xbf16> to vector<1x64x128xbf16>
    tpu.vector_store %arg5[%c0_60, %c0_61, %c0_62], %57 {strides = array<i32>} : memref<1x64x128xbf16, #tpu.memory_space<vmem>>, vector<1x64x128xbf16>,
    %cst_63 = arith.constant dense<0.000000e+00> : vector<128xf32>
    %58 = vector.multi_reduction <add>, %53, %cst_63 [0] : vector<64x128xf32> to vector<128xf32>
    %59 = vector.shape_cast %58 : vector<128xf32> to vector<1x128xf32>
    %c0_64 = arith.constant 0 : index
    %c0_65 = arith.constant 0 : index
    %c0_66 = arith.constant 0 : index
    %60 = vector.load %arg6[%c0_64, %c0_65, %c0_66] : memref<1x1x128xf32, #tpu.memory_space<vmem>>, vector<1x1x128xf32>
    %61 = vector.shape_cast %60 : vector<1x1x128xf32> to vector<1x128xf32>
    %62 = vector.shape_cast %59 : vector<1x128xf32> to vector<1x1x128xf32>
    tpu.vector_store %arg6[%c0_64, %c0_65, %c0_66], %62 {strides = array<i32>} : memref<1x1x128xf32, #tpu.memory_space<vmem>>, vector<1x1x128xf32>,
    %63 = arith.mulf %53, %53 : vector<64x128xf32>
    %cst_67 = arith.constant dense<0.000000e+00> : vector<128xf32>
    %64 = vector.multi_reduction <add>, %63, %cst_67 [0] : vector<64x128xf32> to vector<128xf32>
    %65 = vector.shape_cast %64 : vector<128xf32> to vector<1x128xf32>
    %c0_68 = arith.constant 0 : index
    %c0_69 = arith.constant 0 : index
    %c0_70 = arith.constant 0 : index
    %66 = vector.load %arg7[%c0_68, %c0_69, %c0_70] : memref<1x1x128xf32, #tpu.memory_space<vmem>>, vector<1x1x128xf32>
    %67 = vector.shape_cast %66 : vector<1x1x128xf32> to vector<1x128xf32>
    %68 = vector.shape_cast %65 : vector<1x128xf32> to vector<1x1x128xf32>
    tpu.vector_store %arg7[%c0_68, %c0_69, %c0_70], %68 {strides = array<i32>} : memref<1x1x128xf32, #tpu.memory_space<vmem>>, vector<1x1x128xf32>,
    return
  }
  func.func @transform_0(%arg0: i32) -> (i32, i32, i32) {
    %c0_i32 = arith.constant 0 : i32
    %c0_i32_0 = arith.constant 0 : i32
    %c0_i32_1 = arith.constant 0 : i32
    return %arg0, %c0_i32, %c0_i32_0 : i32, i32, i32
  }
  func.func @transform_1(%arg0: i32) -> (i32, i32) {
    %c0_i32 = arith.constant 0 : i32
    %c0_i32_0 = arith.constant 0 : i32
    %c0_i32_1 = arith.constant 0 : i32
    return %c0_i32, %c0_i32_0 : i32, i32
  }
  func.func @transform_2(%arg0: i32) -> (i32, i32) {
    %c0_i32 = arith.constant 0 : i32
    %c0_i32_0 = arith.constant 0 : i32
    %c0_i32_1 = arith.constant 0 : i32
    return %c0_i32, %c0_i32_0 : i32, i32
  }
  func.func @transform_3(%arg0: i32) -> (i32, i32, i32) {
    %c0_i32 = arith.constant 0 : i32
    %c0_i32_0 = arith.constant 0 : i32
    %c0_i32_1 = arith.constant 0 : i32
    %c0_i32_2 = arith.constant 0 : i32
    return %c0_i32, %c0_i32_0, %c0_i32_1 : i32, i32, i32
  }
  func.func @transform_4(%arg0: i32) -> (i32, i32, i32) {
    %c0_i32 = arith.constant 0 : i32
    %c0_i32_0 = arith.constant 0 : i32
    %c0_i32_1 = arith.constant 0 : i32
    return %arg0, %c0_i32, %c0_i32_0 : i32, i32, i32
  }
  func.func @transform_5(%arg0: i32) -> (i32, i32, i32) {
    %c0_i32 = arith.constant 0 : i32
    %c0_i32_0 = arith.constant 0 : i32
    %c0_i32_1 = arith.constant 0 : i32
    return %arg0, %c0_i32, %c0_i32_0 : i32, i32, i32
  }
  func.func @transform_6(%arg0: i32) -> (i32, i32, i32) {
    %c0_i32 = arith.constant 0 : i32
    %c0_i32_0 = arith.constant 0 : i32
    %c0_i32_1 = arith.constant 0 : i32
    return %arg0, %c0_i32, %c0_i32_0 : i32, i32, i32
  }
}

module attributes {stable_mosaic.version = 11 : i64} {
  func.func @_bnrelu_out_kernel(%arg0: i32, %arg1: memref<1x64x128xbf16, #tpu.memory_space<vmem>>, %arg2: memref<1x128xf32, #tpu.memory_space<vmem>>, %arg3: memref<1x128xf32, #tpu.memory_space<vmem>>, %arg4: memref<1x64x8xf32, #tpu.memory_space<vmem>>) attributes {dimension_semantics = [#tpu.dimension_semantics<parallel>], iteration_bounds = array<i64: 2>, scalar_prefetch = 0 : i64, scratch_operands = 0 : i64, tpu.core_type = #tpu.core_type<tc>, window_params = [{transform_indices = @transform_0, window_bounds = array<i64: 1, 64, 128>}, {pipeline_mode = #tpu.pipeline_mode<synchronous>, transform_indices = @transform_1, window_bounds = array<i64: 1, 128>}, {pipeline_mode = #tpu.pipeline_mode<synchronous>, transform_indices = @transform_2, window_bounds = array<i64: 1, 128>}, {transform_indices = @transform_3, window_bounds = array<i64: 1, 64, 8>}]} {
    %c0 = arith.constant 0 : index
    %c0_0 = arith.constant 0 : index
    %c0_1 = arith.constant 0 : index
    %0 = vector.load %arg1[%c0, %c0_0, %c0_1] : memref<1x64x128xbf16, #tpu.memory_space<vmem>>, vector<1x64x128xbf16>
    %1 = vector.shape_cast %0 : vector<1x64x128xbf16> to vector<64x128xbf16>
    %2 = arith.extf %1 : vector<64x128xbf16> to vector<64x128xf32>
    %c0_2 = arith.constant 0 : index
    %c0_3 = arith.constant 0 : index
    %3 = vector.load %arg2[%c0_2, %c0_3] : memref<1x128xf32, #tpu.memory_space<vmem>>, vector<1x128xf32>
    %4 = vector.broadcast %3 : vector<1x128xf32> to vector<64x128xf32>
    %5 = arith.mulf %2, %4 : vector<64x128xf32>
    %c0_4 = arith.constant 0 : index
    %c0_5 = arith.constant 0 : index
    %6 = vector.load %arg3[%c0_4, %c0_5] : memref<1x128xf32, #tpu.memory_space<vmem>>, vector<1x128xf32>
    %7 = vector.broadcast %6 : vector<1x128xf32> to vector<64x128xf32>
    %8 = arith.addf %5, %7 : vector<64x128xf32>
    %cst = arith.constant 0.000000e+00 : f32
    %9 = vector.broadcast %cst : f32 to vector<64x128xf32>
    %10 = arith.maximumf %8, %9 : vector<64x128xf32>
    %11 = vector.extract_strided_slice %10 {offsets = [0, 0], sizes = [64, 8], strides = [1, 1]} : vector<64x128xf32> to vector<64x8xf32>
    %c0_6 = arith.constant 0 : index
    %c0_7 = arith.constant 0 : index
    %c0_8 = arith.constant 0 : index
    %12 = vector.load %arg4[%c0_6, %c0_7, %c0_8] : memref<1x64x8xf32, #tpu.memory_space<vmem>>, vector<1x64x8xf32>
    %13 = vector.shape_cast %12 : vector<1x64x8xf32> to vector<64x8xf32>
    %14 = vector.shape_cast %11 : vector<64x8xf32> to vector<1x64x8xf32>
    tpu.vector_store %arg4[%c0_6, %c0_7, %c0_8], %14 {strides = array<i32>} : memref<1x64x8xf32, #tpu.memory_space<vmem>>, vector<1x64x8xf32>,
    return
  }
  func.func @transform_0(%arg0: i32) -> (i32, i32, i32) {
    %c0_i32 = arith.constant 0 : i32
    %c0_i32_0 = arith.constant 0 : i32
    %c0_i32_1 = arith.constant 0 : i32
    return %arg0, %c0_i32, %c0_i32_0 : i32, i32, i32
  }
  func.func @transform_1(%arg0: i32) -> (i32, i32) {
    %c0_i32 = arith.constant 0 : i32
    %c0_i32_0 = arith.constant 0 : i32
    %c0_i32_1 = arith.constant 0 : i32
    return %c0_i32, %c0_i32_0 : i32, i32
  }
  func.func @transform_2(%arg0: i32) -> (i32, i32) {
    %c0_i32 = arith.constant 0 : i32
    %c0_i32_0 = arith.constant 0 : i32
    %c0_i32_1 = arith.constant 0 : i32
    return %c0_i32, %c0_i32_0 : i32, i32
  }
  func.func @transform_3(%arg0: i32) -> (i32, i32, i32) {
    %c0_i32 = arith.constant 0 : i32
    %c0_i32_0 = arith.constant 0 : i32
    %c0_i32_1 = arith.constant 0 : i32
    return %arg0, %c0_i32, %c0_i32_0 : i32, i32, i32
  }
}

</mosaic_0001>

<bundles_post_ra>
// kernel: down_forward.5
= control target key start
LH: loop header
LB: loop body
LE: loop exit
PB: predicated region body
PF: predicated region fallthrough
CT: control target
= control target key end

     0   :  { %s353_s12 = smov 0   ;;  %s388_s0 = inlined_call_operand.vmem [shape: bf16[2,64,128], index: 0, kind: input, shape index: {}]   ;;  %s389_s1 = inlined_call_operand.vmem [shape: f32[1,128], index: 1, kind: input, shape index: {}]   ;;  %s390_s2 = inlined_call_operand.vmem [shape: f32[1,128], index: 2, kind: input, shape index: {}]   ;;  %s391_s3 = inlined_call_operand.vmem [shape: f32[2,64,8], index: 3, kind: output, shape index: {}]  }
   0x1 LB: > { %s283_s13 = sadd.s32 4294967295, %s331_s12   ;;  %p287_p0 = scmp.ge.s32.totalorder %s331_s12, 1  ;;  %s331_s12 = sphi %s353_s12, %s13_s12  }
   0x2   : > { %p137_p1 = scmp.lt.s32.totalorder %s331_s12, 3 }
   0x4   : > { %p138_p2 = pnand %p287_p0, %p137_p1 }
   0x5   : > { %p161_p3 = scmp.lt.s32.totalorder (!%p138_p2), %s283_s13, 1 }
   0x6   : > { %141 = sbr.rel (%p138_p2) target bundleno = 31 (0x1f), region = 32 }
   0xb   : > { %s393_s13 = smov (!%p161_p3, %s283_s13), 1  ;;  %v323_v0 = vld [vmem:[%s389_s1] ss:$0 sm:$0xff]  ;;  %vm219_vm0 = vcmask 64512  }
   0xc   : > { %s294_s14 = sshll.u32 %s393_s13, 5  ;;  %v324_v5 = vld [vmem:[%s390_s2] ss:$0 sm:$0xff]  ;;  %s295_s22 = sshll.u32 %s393_s13, 6 }
   0xd   : > { %s165_s17 = scalar_lea.vmem %s388_s0, %s294_s14  ;;  %s170_s25 = scalar_lea.vmem %s391_s3, %s295_s22 }
   0xe   : > { %v297_v1 = vld [vmem:[%s165_s17] sm:$0xff]   ;;  %v312_v2 = vld [vmem:[%s165_s17 + $0x8] sm:$0xff]   ;;  %v313_v3 = vld [vmem:[%s165_s17 + $0x10] sm:$0xff]  }
   0xf   : > { %v298_v4 = vunpack.c.l.bf16 %v297_v1  ;;  %v299_v6 = vunpack.c.h.bf16 %v297_v1  ;;  %v302_v7 = vunpack.c.l.bf16 %v312_v2  ;;  %v303_v8 = vunpack.c.h.bf16 %v312_v2  ;;  %v314_v9 = vld [vmem:[%s165_s17 + $0x18] sm:$0xff]  }
  0x10   : > { %v306_v10 = vunpack.c.l.bf16 %v313_v3  ;;  %v307_v11 = vunpack.c.h.bf16 %v313_v3  ;;  %v310_v12 = vunpack.c.l.bf16 %v314_v9  ;;  %v311_v13 = vunpack.c.h.bf16 %v314_v9 }
  0x11   : > { %v191_v14 = vmul.f32 %v323_v0, %v298_v4  ;;  %v192_v15 = vmul.f32 %v323_v0, %v299_v6  ;;  %v193_v16 = vmul.f32 %v323_v0, %v302_v7  ;;  %v194_v17 = vmul.f32 %v323_v0, %v303_v8 }
  0x12   : > { %v195_v18 = vmul.f32 %v323_v0, %v306_v10  ;;  %v196_v19 = vmul.f32 %v323_v0, %v307_v11  ;;  %v197_v20 = vmul.f32 %v323_v0, %v310_v12  ;;  %v198_v21 = vmul.f32 %v323_v0, %v311_v13 }
  0x13   : > { %v203_v22 = vadd.f32 %v324_v5, %v191_v14  ;;  %v204_v23 = vadd.f32 %v324_v5, %v192_v15  ;;  %v205_v24 = vadd.f32 %v324_v5, %v193_v16  ;;  %v206_v25 = vadd.f32 %v324_v5, %v194_v17 }
  0x14   : > { %v207_v26 = vadd.f32 %v324_v5, %v195_v18  ;;  %v208_v27 = vadd.f32 %v324_v5, %v196_v19  ;;  %v209_v31 = vadd.f32 %v324_v5, %v197_v20  ;;  %v210_v33 = vadd.f32 %v324_v5, %v198_v21 }
  0x15   : > { %v211_v28 = vmax.f32 %v203_v22, 0.0  ;;  %v212_v29 = vmax.f32 %v204_v23, 0.0  ;;  %v213_v30 = vmax.f32 %v205_v24, 0.0  ;;  %v214_v32 = vmax.f32 %v206_v25, 0.0 }
  0x16   : > { %v215_v34 = vmax.f32 %v207_v26, 0.0  ;;  %v216_v35 = vmax.f32 %v208_v27, 0.0  ;;  %v217_v36 = vmax.f32 %v209_v31, 0.0  ;;  %v218_v37 = vmax.f32 %v210_v33, 0.0 }
  0x17   : > { %220 = vst.msk [vmem:[%s170_s25] sm:$0xff] %vm219_vm0, %v211_v28 }
  0x18   : > { %221 = vst.msk [vmem:[%s170_s25 + $0x8] sm:$0xff] %vm219_vm0, %v212_v29 }
  0x19   : > { %222 = vst.msk [vmem:[%s170_s25 + $0x10] sm:$0xff] %vm219_vm0, %v213_v30 }
  0x1a   : > { %223 = vst.msk [vmem:[%s170_s25 + $0x18] sm:$0xff] %vm219_vm0, %v214_v32 }
  0x1b   : > { %224 = vst.msk [vmem:[%s170_s25 + $0x20] sm:$0xff] %vm219_vm0, %v215_v34 }
  0x1c   : > { %225 = vst.msk [vmem:[%s170_s25 + $0x28] sm:$0xff] %vm219_vm0, %v216_v35 }
  0x1d   : > { %226 = vst.msk [vmem:[%s170_s25 + $0x30] sm:$0xff] %vm219_vm0, %v217_v36 }
  0x1e   : > { %227 = vst.msk [vmem:[%s170_s25 + $0x38] sm:$0xff] %vm219_vm0, %v218_v37 }
  0x1f PF: > { %s13_s12 = sadd.s32 1, %s331_s12  }
  0x20   : > { %p10_p4 = scmp.ge.s32.totalorder %s13_s12, 4  }
  0x22   :  { %12 = sbr.rel (!%p10_p4) target bundleno = 1 (0x1), region = 62 }

// kernel: down_forward.3
= control target key start
LH: loop header
LB: loop body
LE: loop exit
PB: predicated region body
PF: predicated region fallthrough
CT: control target
= control target key end

     0   :  { %s2061_s15 = smov 0   ;;  %s2534_s0 = inlined_call_operand.vmem [shape: f32[2,8,2,8,8], index: 0, kind: input, shape index: {}]   ;;  %s2535_s1 = inlined_call_operand.vmem [shape: bf16[9,4,128], index: 1, kind: input, shape index: {}]   ;;  %s2536_s2 = inlined_call_operand.vmem [shape: bf16[2,64,128], index: 2, kind: output, shape index: {0}]   ;;  %s2537_s3 = inlined_call_operand.vmem [shape: f32[2,1,128], index: 3, kind: output, shape index: {1}]   ;;  %s2538_s4 = inlined_call_operand.vmem [shape: f32[2,1,128], index: 4, kind: output, shape index: {2}]  }
   0x1 LB: > { %s1826_s16 = sadd.s32 4294967295, %s2032_s15   ;;  %p1830_p0 = scmp.ge.s32.totalorder %s2032_s15, 1  ;;  %s2032_s15 = sphi %s2061_s15, %s15_s15  }
   0x2   : > { %p167_p1 = scmp.lt.s32.totalorder %s2032_s15, 3 }
   0x4   : > { %p168_p2 = pnand %p1830_p0, %p167_p1 }
   0x5   : > { %p199_p3 = scmp.lt.s32.totalorder (!%p168_p2), %s1826_s16, 1  ;;  %s2035_s21 = smov (!%p168_p2), 124  }
   0x6   : > { %171 = sbr.rel (%p168_p2) target bundleno = 478 (0x1de), region = 28 }
   0xb   : > { %vm281_vm0 = vcmask 27648   ;;  %vm287_vm1 = vcmask 24576   ;;  %v2034_v0 = vmov 0   ;;  %vm288_vm2 = vsmask.f32 256  ;;  %s2550_s16 = smov (!%p199_p3, %s1826_s16), 1 }
   0xc   : > { %282 = vst.msk [vmem:[#allocation2] sm:$0xf] %vm281_vm0, %v2034_v0  ;;  %v302_v1 = vld [vmem:[#allocation2 + $0x20] sm:$0x1]  ;;  %vm2074_vm3 = vmand %vm287_vm1, %vm288_vm2  ;;  %v305_v3 = vld [vmem:[#allocation2 + $0x28] sm:$0x1]  ;;  %s211_s22 = scalar_lea.vmem %s2537_s3, %s2550_s16  ;;  %s214_s25 = scalar_lea.vmem %s2538_s4, %s2550_s16 }
   0xd   : > { %283 = vst.msk [vmem:[#allocation2 + $0x4] sm:$0xf] %vm281_vm0, %v2034_v0  ;;  %v303_v4 = vsel %vm2074_vm3, 0, %v302_v1  ;;  %v306_v5 = vsel %vm2074_vm3, 0, %v305_v3  ;;  %vm320_vm4 = vsmask.f32 7938 }
   0xe   : > { %286 = vst.msk [vmem:[#allocation2 + $0x4c] sm:$0xf] %vm281_vm0, %v2034_v0  ;;  %s1961_s17 = sshll.u32 %s2550_s16, 7  ;;  %vm2085_vm5 = vmand %vm287_vm1, %vm320_vm4  ;;  %v334_v7 = vld [vmem:[#allocation2 + $0x24] sm:$0x1]  ;;  %vm650_vm7 = vcmask 1041408  }
   0xf   : > { %304 = vst [vmem:[#allocation2 + $0x20] sm:$0x1] %v303_v4  ;;  %s2092_s20 = scalar_lea.vmem %s2534_s0, %s1961_s17  ;;  %v335_v8 = vsel %vm2085_vm5, 0, %v334_v7  ;;  %v337_v9 = vld [vmem:[#allocation2 + $0x2c] sm:$0x1]  ;;  %vm2097_vm6 = vmand %vm281_vm0, %vm320_vm4  ;;  %vm637_vm10 = vcmask 31744  }
  0x10   : > { %307 = vst [vmem:[#allocation2 + $0x28] sm:$0x1] %v306_v5  ;;  %v219_v11 = vld [vmem:[%s2092_s20 + $0x30] sm:$0xff]  ;;  %v220_v12 = vld [vmem:[%s2092_s20 + $0x40] sm:$0xff]  ;;  %v1838_v13 = vld [vmem:[%s2092_s20 + $0x38] sm:$0xff]  ;;  %v338_v14 = vsel %vm2085_vm5, 0, %v337_v9 }
  0x11   : > { %336 = vst [vmem:[#allocation2 + $0x24] sm:$0x1] %v335_v8  ;;  %v1839_v15 = vld [vmem:[%s2092_s20 + $0x48] sm:$0xff]  ;;  %v2107_v16 = vmax.f32 %v219_v11, %v1838_v13  ;;  %v217_v17 = vld [vmem:[%s2092_s20 + $0x10] sm:$0xff]  ;;  %v218_v18 = vld [vmem:[%s2092_s20 + $0x20] sm:$0xff]  ;;  %vm771_vm12 = vcmask 1042432  }
  0x12   : > { %339 = vst [vmem:[#allocation2 + $0x2c] sm:$0x1] %v338_v14  ;;  %v2111_v19 = vmax.f32 %v220_v12, %v1839_v15  ;;  %v1836_v20 = vld [vmem:[%s2092_s20 + $0x18] sm:$0xff]  ;;  %v1837_v21 = vld [vmem:[%s2092_s20 + $0x28] sm:$0xff]  ;;  %v221_v22 = vld [vmem:[%s2092_s20 + $0x50] sm:$0xff]  ;;  %vm772_vm13 = vcmask 1046532  }
  0x13   : > { %285 = vst.msk [vmem:[#allocation2 + $0x48] sm:$0xf] %vm281_vm0, %v2034_v0  ;;  %v2117_v23 = vmax.f32 %v217_v17, %v1836_v20  ;;  %v2119_v24 = vmax.f32 %v218_v18, %v1837_v21  ;;  %v222_v25 = vld [vmem:[%s2092_s20 + $0x60] sm:$0xff]  ;;  %v1840_v26 = vld [vmem:[%s2092_s20 + $0x58] sm:$0xff]  ;;  %v1841_v27 = vld [vmem:[%s2092_s20 + $0x68] sm:$0xff]  ;;  %s1962_s14 = sshll.u32 %s2550_s16, 5 }
  0x14   : > { %v2011_v28 = vpack.i.bf16 %v2111_v19, %v2107_v16  ;;  %v223_v29 = vld [vmem:[%s2092_s20 + $0x70] sm:$0xff]  ;;  %v2129_v31 = vmax.f32 %v221_v22, %v1840_v26  ;;  %v1842_v32 = vld [vmem:[%s2092_s20 + $0x78] sm:$0xff]  ;;  %v322_v33 = vld [vmem:[#allocation2 + $0x4] sm:$0x1]  ;;  %v2132_v35 = vmax.f32 %v222_v25, %v1841_v27  ;;  %vm508_vm8 = vsmask.f32 3328  ;;  %s2501_s19 = scalar_lea.vmem %s2536_s2, %s1962_s14 }
  0x15   : > { %v2021_v30 = vpack.i.bf16 %v2119_v24, %v2117_v23  ;;  %v349_v34 = vld [vmem:[#allocation2 + $0x4c] sm:$0x1]  ;;  %v240_v36 = vmax.f32 %v223_v29, %v1842_v32  ;;  %v323_v37 = vsel %vm2085_vm5, 0, %v322_v33  ;;  %v216_v39 = vld [vmem:[%s2092_s20] sm:$0xff]  ;;  %v296_v43 = vld [vmem:[#allocation2 + $0x10] sm:$0x1] }
  0x16   : > { %2012 = vrot.lane.b32.xlu0 %v2011_v28, %s2035_s21  ;;  %v350_v38 = vsel %vm2085_vm5, 0, %v349_v34  ;;  %324 = vst [vmem:[#allocation2 + $0x4] sm:$0x1] %v323_v37  ;;  %v1835_v40 = vld [vmem:[%s2092_s20 + $0x8] sm:$0xff]  ;;  %v2016_v41 = vpack.i.bf16 %v2132_v35, %v2129_v31  ;;  %v299_v44 = vld [vmem:[#allocation2 + $0x18] sm:$0x1]  ;;  %vm2284_vm14 = vmor %vm771_vm12, %vm772_vm13 }
  0x17   : > { %2022 = vrot.lane.b32.xlu1 %v2021_v30, %s2035_s21  ;;  %263 = vrot.lane.b32.xlu2 %v240_v36, %s2035_s21  ;;  %351 = vst [vmem:[#allocation2 + $0x4c] sm:$0x1] %v350_v38  ;;  %v2142_v42 = vmax.f32 %v216_v39, %v1835_v40  ;;  %v331_v45 = vld [vmem:[#allocation2 + $0x1c] sm:$0x1]  ;;  %v297_v46 = vsel %vm2074_vm3, 0, %v296_v43  ;;  %v300_v47 = vsel %vm2074_vm3, 0, %v299_v44 }
  0x18   : > { %v332_v48 = vsel %vm2085_vm5, 0, %v331_v45  ;;  %298 = vst [vmem:[#allocation2 + $0x10] sm:$0x1] %v297_v46  ;;  %v328_v49 = vld [vmem:[#allocation2 + $0x14] sm:$0x1] }
  0x19   : > { %301 = vst [vmem:[#allocation2 + $0x18] sm:$0x1] %v300_v47  ;;  %v329_v50 = vsel %vm2085_vm5, 0, %v328_v49  ;;  %v308_v51 = vld [vmem:[#allocation2 + $0x30] sm:$0x1] }
  0x1a   : > { %333 = vst [vmem:[#allocation2 + $0x1c] sm:$0x1] %v332_v48  ;;  %v311_v52 = vld [vmem:[#allocation2 + $0x38] sm:$0x1]  ;;  %v293_v53 = vld [vmem:[#allocation2 + $0x8] sm:$0x1] }
  0x1b   : > { %330 = vst [vmem:[#allocation2 + $0x14] sm:$0x1] %v329_v50  ;;  %v309_v54 = vsel %vm2074_vm3, 0, %v308_v51  ;;  %v312_v55 = vsel %vm2074_vm3, 0, %v311_v52  ;;  %v340_v56 = vld [vmem:[#allocation2 + $0x34] sm:$0x1] }
  0x1c   : > { %v343_v57 = vld [vmem:[#allocation2 + $0x3c] sm:$0x1]  ;;  %310 = vst [vmem:[#allocation2 + $0x30] sm:$0x1] %v309_v54  ;;  %v341_v59 = vsel %vm2085_vm5, 0, %v340_v56  ;;  %v294_v62 = vsel %vm2074_vm3, 0, %v293_v53 }
  0x1d   : > { %v344_v60 = vsel %vm2085_vm5, 0, %v343_v57  ;;  %313 = vst [vmem:[#allocation2 + $0x38] sm:$0x1] %v312_v55  ;;  %v325_v63 = vld [vmem:[#allocation2 + $0xc] sm:$0x1] }
  0x1e   : > { %2017 = vrot.lane.b32.xlu0 %v2016_v41, %s2035_s21  ;;  %342 = vst [vmem:[#allocation2 + $0x34] sm:$0x1] %v341_v59  ;;  %v326_v0 = vsel %vm2085_vm5, 0, %v325_v63  ;;  %v314_v1 = vld [vmem:[#allocation2 + $0x40] sm:$0x1] }
  0x1f   : > { %249 = vrot.lane.b32.xlu1 %v2142_v42, %s2035_s21  ;;  %345 = vst [vmem:[#allocation2 + $0x3c] sm:$0x1] %v344_v60  ;;  %v315_v4 = vsel %vm2074_vm3, 0, %v314_v1  ;;  %v346_v5 = vld [vmem:[#allocation2 + $0x44] sm:$0x1] }
  0x20   : > { %295 = vst [vmem:[#allocation2 + $0x8] sm:$0x1] %v294_v62  ;;  %v347_v7 = vsel %vm2085_vm5, 0, %v346_v5  ;;  %v290_v12 = vld [vmem:[#allocation2] sm:$0x1] }
  0x21   : > { %327 = vst [vmem:[#allocation2 + $0xc] sm:$0x1] %v326_v0  ;;  %v291_v14 = vsel %vm2074_vm3, 0, %v290_v12  ;;  %v1843_v17 = vld [vmem:[%s2535_s1 + $0x2] sm:$0x3] }
  0x22   : > { %316 = vst [vmem:[#allocation2 + $0x40] sm:$0x1] %v315_v4  ;;  %v652_v6 = vsel %vm650_vm7, %v1843_v17, 0  ;;  %v467_v53 = vld [vmem:[#allocation2 + $0x28] sm:$0xf] }
  0x23   : > { %348 = vst [vmem:[#allocation2 + $0x44] sm:$0x1] %v347_v7  ;;  %1998 = vmatpush.bf16.msra.mxu1 %v652_v6  ;;  %1999 = vmatpush.bf16.msra.mxu2 %v652_v6  ;;  %v455_v63 = vld [vmem:[#allocation2 + $0x18] sm:$0xf]  ;;  %v449_v7 = vld [vmem:[#allocation2 + $0x10] sm:$0xf] }
  0x24   : > { %292 = vst [vmem:[#allocation2] sm:$0x1] %v291_v14  ;;  %661 = vmatpush.bf16.msra.mxu0 %v652_v6  ;;  %2000 = vmatpush.bf16.msra.mxu3 %v652_v6  ;;  %v452_v12 = vld [vmem:[#allocation2 + $0x14] sm:$0x1]  ;;  %vm509_vm9 = vsmask.f32 7440 }
  0x25   : > { %vm2239_vm11 = vmor %vm508_vm8, %vm509_vm9 }
  0x29   : > { %v485_v20 = vld [vmem:[#allocation2 + $0x40] sm:$0xf] }
  0x2a   : > { %v488_v26 = vld [vmem:[#allocation2 + $0x44] sm:$0x1] }
  0x71   : > { %v264_v58 = vpop.permute.xlu2 %263 }
  0x72   : > { %v280_v61 = vmax.f32 %v240_v36, %v264_v58  ;;  %v464_v58 = vld [vmem:[#allocation2 + $0x24] sm:$0x1] }
  0x74   : > { %v359_v3 = vpack.c.bf16 %v280_v61, %v280_v61 }
  0x76   : > { %v417_v8 = vshrl.u32 %v359_v3, 16  ;;  %v420_v11 = vshll.u32 %v359_v3, 16 }
  0x78   : > { %v419_v9 = vrot.slane %v417_v8, 7  ;;  %v458_v8 = vld [vmem:[#allocation2 + $0x1c] sm:$0x1] }
  0x7a   : > { %v422_v13 = vor.u32 %v420_v11, %v419_v9  ;;  %v423_v15 = vrot.slane %v419_v9, 4  ;;  %v491_v9 = vld [vmem:[#allocation2] sm:$0xf] }
  0x7c   : > { %v486_v27 = vsel %vm2097_vm6, %v422_v13, %v485_v20  ;;  %v489_v30 = vsel %vm2074_vm3, %v423_v15, %v488_v26  ;;  %v1876_v20 = vld [vmem:[%s2535_s1 + $0x4] sm:$0x3] }
  0x7d   : > { %487 = vst [vmem:[#allocation2 + $0x40] sm:$0xf] %v486_v27 }
  0x7e   : > { %490 = vst [vmem:[#allocation2 + $0x44] sm:$0x1] %v489_v30  ;;  %v515_v30 = vshll.u32 %v491_v9, 16 }
  0x88   : > { %v2013_v18 = vpop.permute.xlu0 %2012 }
  0x89   : > { %v2015_v21 = vunpack.i.h.bf16 %v2013_v18  ;;  %v2014_v22 = vunpack.i.l.bf16 %v2013_v18  ;;  %v2023_v25 = vpop.permute.xlu1 %2022  ;;  %v2196_v18 = vld [vmem:[#allocation2 + $0x4] sm:$0x1] }
  0x8a   : > { %v2025_v28 = vunpack.i.h.bf16 %v2023_v25  ;;  %v2024_v29 = vunpack.i.l.bf16 %v2023_v25  ;;  %v833_v25 = vsel %vm650_vm7, %v1876_v20, 0 }
  0x8b   : > { %v277_v32 = vmax.f32 %v2111_v19, %v2015_v21  ;;  %v276_v33 = vmax.f32 %v2107_v16, %v2014_v22  ;;  %v461_v19 = vld [vmem:[#allocation2 + $0x20] sm:$0xf]  ;;  %v512_v22 = vshrl.u32 %v491_v9, 16  ;;  %842 = vmatpush.bf16.msrb.mxu2 %v833_v25 }
  0x8c   : > { %v275_v34 = vmax.f32 %v2119_v24, %v2025_v28  ;;  %v274_v36 = vmax.f32 %v2117_v23, %v2024_v29  ;;  %v470_v23 = vld [vmem:[#allocation2 + $0x2c] sm:$0x1] }
  0x8d   : > { %v356_v37 = vpack.c.bf16 %v277_v32, %v277_v32  ;;  %v355_v38 = vpack.c.bf16 %v276_v33, %v276_v33  ;;  %v521_v32 = vshll.u32 %v2196_v18, 16 }
  0x8e   : > { %v354_v39 = vpack.c.bf16 %v275_v34, %v275_v34  ;;  %v353_v40 = vpack.c.bf16 %v274_v36, %v274_v36  ;;  %v443_v36 = vld [vmem:[#allocation2 + $0x8] sm:$0xf] }
  0x8f   : > { %v393_v41 = vshrl.u32 %v356_v37, 16  ;;  %v396_v43 = vshll.u32 %v356_v37, 16  ;;  %v385_v44 = vshrl.u32 %v355_v38, 16  ;;  %v388_v45 = vshll.u32 %v355_v38, 16  ;;  %v473_v37 = vld [vmem:[#allocation2 + $0x30] sm:$0xf] }
  0x90   : > { %v377_v46 = vshrl.u32 %v354_v39, 16  ;;  %v380_v47 = vshll.u32 %v354_v39, 16  ;;  %v369_v48 = vshrl.u32 %v353_v40, 16  ;;  %v2018_v49 = vpop.permute.xlu0 %2017  ;;  %v372_v51 = vshll.u32 %v353_v40, 16  ;;  %v479_v38 = vld [vmem:[#allocation2 + $0x38] sm:$0xf] }
  0x91   : > { %v395_v50 = vrot.slane %v393_v41, 7  ;;  %v387_v16 = vrot.slane %v385_v44, 7  ;;  %v2020_v52 = vunpack.i.h.bf16 %v2018_v49  ;;  %v250_v24 = vpop.permute.xlu1 %249  ;;  %v2019_v56 = vunpack.i.l.bf16 %v2018_v49 }
  0x92   : > { %v379_v54 = vrot.slane %v377_v46, 7  ;;  %v371_v55 = vrot.slane %v369_v48, 7  ;;  %v273_v57 = vmax.f32 %v2142_v42, %v250_v24 }
  0x93   : > { %v398_v59 = vor.u32 %v396_v43, %v395_v50  ;;  %v399_v60 = vrot.slane %v395_v50, 4  ;;  %v390_v61 = vor.u32 %v388_v45, %v387_v16  ;;  %v391_v62 = vrot.slane %v387_v16, 4  ;;  %v476_v16 = vld [vmem:[#allocation2 + $0x34] sm:$0x1] }
  0x94   : > { %v382_v0 = vor.u32 %v380_v47, %v379_v54  ;;  %v383_v1 = vrot.slane %v379_v54, 4  ;;  %v374_v42 = vor.u32 %v372_v51, %v371_v55  ;;  %v375_v13 = vrot.slane %v371_v55, 4  ;;  %v482_v47 = vld [vmem:[#allocation2 + $0x3c] sm:$0x1]  ;;  %v446_v54 = vld [vmem:[#allocation2 + $0xc] sm:$0x1] }
  0x95   : > { %v468_v3 = vsel %vm2097_vm6, %v398_v59, %v467_v53  ;;  %v471_v4 = vsel %vm2074_vm3, %v399_v60, %v470_v23  ;;  %v462_v5 = vsel %vm2097_vm6, %v390_v61, %v461_v19  ;;  %v465_v11 = vsel %vm2074_vm3, %v391_v62, %v464_v58 }
  0x96   : > { %469 = vst [vmem:[#allocation2 + $0x28] sm:$0xf] %v468_v3  ;;  %v456_v14 = vsel %vm2097_vm6, %v382_v0, %v455_v63  ;;  %v279_v15 = vmax.f32 %v2132_v35, %v2020_v52  ;;  %v278_v17 = vmax.f32 %v2129_v31, %v2019_v56  ;;  %v352_v6 = vpack.c.bf16 %v273_v57, %v273_v57 }
  0x97   : > { %472 = vst [vmem:[#allocation2 + $0x2c] sm:$0x1] %v471_v4  ;;  %v459_v21 = vsel %vm2074_vm3, %v383_v1, %v458_v8  ;;  %v450_v35 = vsel %vm2097_vm6, %v374_v42, %v449_v7  ;;  %v453_v28 = vsel %vm2074_vm3, %v375_v13, %v452_v12  ;;  %v2209_v43 = vrot.slane %v512_v22, 4 }
  0x98   : > { %463 = vst [vmem:[#allocation2 + $0x20] sm:$0xf] %v462_v5  ;;  %v358_v26 = vpack.c.bf16 %v279_v15, %v279_v15  ;;  %v357_v31 = vpack.c.bf16 %v278_v17, %v278_v17  ;;  %v361_v27 = vshrl.u32 %v352_v6, 16  ;;  %v364_v29 = vshll.u32 %v352_v6, 16 }
  0x99   : > { %466 = vst [vmem:[#allocation2 + $0x24] sm:$0x1] %v465_v11  ;;  %v517_v19 = vrot.slane %v515_v30, 5  ;;  %v2211_v50 = vrot.slane %v521_v32, 5 }
  0x9a   : > { %457 = vst [vmem:[#allocation2 + $0x18] sm:$0xf] %v456_v14  ;;  %v409_v33 = vshrl.u32 %v358_v26, 16  ;;  %v401_v34 = vshrl.u32 %v357_v31, 16  ;;  %v412_v39 = vshll.u32 %v358_v26, 16  ;;  %v404_v40 = vshll.u32 %v357_v31, 16 }
  0x9b   : > { %460 = vst [vmem:[#allocation2 + $0x1c] sm:$0x1] %v459_v21  ;;  %v363_v41 = vrot.slane %v361_v27, 7  ;;  %v518_v6 = vor.u32 %v517_v19, %v2209_v43 }
  0x9c   : > { %451 = vst [vmem:[#allocation2 + $0x10] sm:$0xf] %v450_v35  ;;  %v411_v44 = vrot.slane %v409_v33, 7  ;;  %v403_v45 = vrot.slane %v401_v34, 7 }
  0x9d   : > { %454 = vst [vmem:[#allocation2 + $0x14] sm:$0x1] %v453_v28  ;;  %v496_v46 = vld [vmem:[#allocation2 + $0x28] sm:$0xf]  ;;  %v366_v48 = vor.u32 %v364_v29, %v363_v41  ;;  %v367_v49 = vrot.slane %v363_v41, 4  ;;  %v519_v43 = vrot.slane %v518_v6, 4 }
  0x9e   : > { %v414_v51 = vor.u32 %v412_v39, %v411_v44  ;;  %v415_v52 = vrot.slane %v411_v44, 4  ;;  %v406_v24 = vor.u32 %v404_v40, %v403_v45  ;;  %v407_v53 = vrot.slane %v403_v45, 4  ;;  %v2230_v42 = vld [vmem:[#allocation2 + $0x2c] sm:$0x1] }
  0x9f   : > { %v495_v23 = vld [vmem:[#allocation2 + $0x20] sm:$0xf]  ;;  %v444_v55 = vsel %vm2097_vm6, %v366_v48, %v443_v36  ;;  %v582_v57 = vshrl.u32 %v496_v46, 16  ;;  %v585_v58 = vshll.u32 %v496_v46, 16  ;;  %v447_v7 = vsel %vm2074_vm3, %v367_v49, %v446_v54 }
  0xa0   : > { %v568_v56 = vshrl.u32 %v495_v23, 16  ;;  %v480_v59 = vsel %vm2097_vm6, %v414_v51, %v479_v38  ;;  %v483_v60 = vsel %vm2074_vm3, %v415_v52, %v482_v47  ;;  %v474_v61 = vsel %vm2097_vm6, %v406_v24, %v473_v37  ;;  %445 = vst [vmem:[#allocation2 + $0x8] sm:$0xf] %v444_v55  ;;  %v2221_v63 = vld [vmem:[#allocation2 + $0x24] sm:$0x1] }
  0xa1   : > { %v494_v62 = vld [vmem:[#allocation2 + $0x18] sm:$0xf]  ;;  %v571_v0 = vshll.u32 %v495_v23, 16  ;;  %481 = vst [vmem:[#allocation2 + $0x38] sm:$0xf] %v480_v59  ;;  %v477_v1 = vsel %vm2074_vm3, %v407_v53, %v476_v16  ;;  %v577_v25 = vshll.u32 %v2221_v63, 16  ;;  %v524_v59 = vsel %vm2239_vm11, %v519_v43, %v2211_v50 }
  0xa2   : > { %v2225_v3 = vld [vmem:[#allocation2 + $0x1c] sm:$0x1]  ;;  %v554_v4 = vshrl.u32 %v494_v62, 16  ;;  %v557_v5 = vshll.u32 %v494_v62, 16  ;;  %484 = vst [vmem:[#allocation2 + $0x3c] sm:$0x1] %v483_v60 }
  0xa3   : > { %v493_v8 = vld [vmem:[#allocation2 + $0x10] sm:$0xf]  ;;  %v563_v10 = vshll.u32 %v2225_v3, 16  ;;  %v570_v9 = vrot.slane %v568_v56, 4  ;;  %475 = vst [vmem:[#allocation2 + $0x30] sm:$0xf] %v474_v61 }
  0xa4   : > { %v2232_v11 = vld [vmem:[#allocation2 + $0x14] sm:$0x1]  ;;  %v540_v12 = vshrl.u32 %v493_v8, 16  ;;  %v543_v13 = vshll.u32 %v493_v8, 16  ;;  %478 = vst [vmem:[#allocation2 + $0x34] sm:$0x1] %v477_v1 }
  0xa5   : > { %v549_v14 = vshll.u32 %v2232_v11, 16  ;;  %v556_v15 = vrot.slane %v554_v4, 4  ;;  %v559_v17 = vrot.slane %v557_v5, 5  ;;  %448 = vst [vmem:[#allocation2 + $0xc] sm:$0x1] %v447_v7  ;;  %v573_v22 = vrot.slane %v571_v0, 5 }
  0xa6   : > { %v542_v20 = vrot.slane %v540_v12, 4  ;;  %v545_v21 = vrot.slane %v543_v13, 5  ;;  %v565_v26 = vrot.slane %v563_v10, 5  ;;  %v584_v31 = vrot.slane %v582_v57, 4  ;;  %v1881_v62 = vld [vmem:[%s2535_s1 + $0x6] sm:$0x3] }
  0xa7   : > { %v560_v35 = vor.u32 %v559_v17, %v556_v15  ;;  %v587_v27 = vrot.slane %v585_v58, 5  ;;  %v551_v30 = vrot.slane %v549_v14, 5  ;;  %v574_v32 = vor.u32 %v573_v22, %v570_v9  ;;  %v492_v34 = vld [vmem:[#allocation2 + $0x8] sm:$0xf]  ;;  %v747_v7 = vld [vmem:[#allocation2] sm:$0xe] }
  0xa8   : > { %v546_v29 = vor.u32 %v545_v21, %v542_v20  ;;  %v591_v33 = vshll.u32 %v2230_v42, 16  ;;  %v579_v37 = vrot.slane %v577_v25, 5  ;;  %v526_v39 = vshrl.u32 %v492_v34, 16  ;;  %v498_v57 = vld [vmem:[#allocation2 + $0x38] sm:$0xf] }
  0xa9   : > { %v561_v36 = vrot.slane %v560_v35, 4  ;;  %v588_v38 = vor.u32 %v587_v27, %v584_v31  ;;  %v575_v41 = vrot.slane %v574_v32, 4  ;;  %v529_v44 = vshll.u32 %v492_v34, 16  ;;  %v2264_v1 = vld [vmem:[#allocation2 + $0x3c] sm:$0x1] }
  0xaa   : > { %v547_v40 = vrot.slane %v546_v29, 4  ;;  %v593_v47 = vrot.slane %v591_v33, 5  ;;  %v528_v48 = vrot.slane %v526_v39, 4  ;;  %v497_v52 = vld [vmem:[#allocation2 + $0x30] sm:$0xf]  ;;  %v776_v56 = vrot.slane %v2196_v18, 5 }
  0xab   : > { %v566_v45 = vsel %vm2239_vm11, %v561_v36, %v565_v26  ;;  %v589_v46 = vrot.slane %v588_v38, 4  ;;  %v580_v16 = vsel %vm2239_vm11, %v575_v41, %v579_v37  ;;  %v531_v51 = vrot.slane %v529_v44, 5  ;;  %v2250_v24 = vld [vmem:[#allocation2 + $0x34] sm:$0x1]  ;;  %v499_v50 = vld [vmem:[%s2535_s1] sm:$0x3] }
  0xac   : > { %v552_v49 = vsel %vm2239_vm11, %v547_v40, %v551_v30  ;;  %v628_v19 = vunpack.c.l.b16 %v566_v45  ;;  %v629_v54 = vunpack.c.l.b16 %v580_v16  ;;  %v2254_v55 = vld [vmem:[#allocation2 + $0xc] sm:$0x1]  ;;  %v596_v4 = vshrl.u32 %v497_v52, 16  ;;  %v748_v6 = vld [vmem:[#allocation2 + $0x8] sm:$0xe] }
  0xad   : > { %v627_v53 = vunpack.c.l.b16 %v552_v49  ;;  %v594_v23 = vsel %vm2239_vm11, %v589_v46, %v593_v47  ;;  %v532_v60 = vor.u32 %v531_v51, %v528_v48  ;;  %v535_v61 = vshll.u32 %v2254_v55, 16  ;;  %v1902_v35 = vld [vmem:[%s2535_s1 + $0x8] sm:$0x3]  ;;  %v956_v43 = vld [vmem:[#allocation2 + $0x10] sm:$0xf] }
  0xae   : > { %v630_v58 = vunpack.c.l.b16 %v594_v23  ;;  %v599_v5 = vshll.u32 %v497_v52, 16  ;;  %v605_v18 = vshll.u32 %v2250_v24, 16  ;;  %v610_v12 = vshrl.u32 %v498_v57, 16  ;;  %v954_v30 = vld [vmem:[#allocation2 + $0x8] sm:$0xf] }
  0xaf   : > { %v634_v0 = vpack.c.b16 %v628_v19, %v627_v53  ;;  %v533_v10 = vrot.slane %v532_v60, 4  ;;  %v537_v9 = vrot.slane %v535_v61, 5  ;;  %v625_v13 = vunpack.c.l.b16 %v524_v59  ;;  %v2293_v19 = vld [vmem:[#allocation2 + $0xc] sm:$0x1] }
  0xb0   : > { %v635_v8 = vpack.c.b16 %v630_v58, %v629_v54  ;;  %v598_v14 = vrot.slane %v596_v4, 4  ;;  %v601_v15 = vrot.slane %v599_v5, 5  ;;  %v613_v17 = vshll.u32 %v498_v57, 16  ;;  %v1915_v4 = vld [vmem:[%s2535_s1 + $0xa] sm:$0x3] }
  0xb1   : > { %1845 = vmatmul.msk.bf16.vlgmr.msra.gmra.mxu1 %vm637_vm10, %v634_v0  ;;  %v538_v20 = vsel %vm2239_vm11, %v533_v10, %v537_v9  ;;  %v612_v21 = vrot.slane %v610_v12, 4  ;;  %v619_v22 = vshll.u32 %v2264_v1, 16  ;;  %v915_v25 = vsel %vm650_vm7, %v1881_v62, 0  ;;  %v1941_v0 = vld [vmem:[%s2535_s1 + $0xe] sm:$0x3] }
  0xb2   : > { %1846 = vmatmul.msk.bf16.vlgmr.msra.gmra.mxu2 %vm637_vm10, %v635_v8  ;;  %v626_v26 = vunpack.c.l.b16 %v538_v20  ;;  %v602_v31 = vor.u32 %v601_v15, %v598_v14  ;;  %v615_v27 = vrot.slane %v613_v17, 5  ;;  %924 = vmatpush.bf16.msrb.mxu3 %v915_v25  ;;  %v716_v29 = vsel %vm650_vm7, %v499_v50, 0  ;;  %v1850_v5 = vld [vmem:[#allocation2] sm:$0xf]  ;;  %v1963_v9 = vld [vmem:[#allocation2 + $0x4] sm:$0xf0] }
  0xb3   : > { %v780_v32 = vrot.slane %v2254_v55, 5  ;;  %v607_v33 = vrot.slane %v605_v18, 5  ;;  %725 = vmatpush.bf16.msrb.mxu1 %v716_v29  ;;  %v1868_v34 = vrot.slane %v747_v7, 9  ;;  %v1869_v36 = vrot.slane %v748_v6, 9  ;;  %v2300_v55 = vld [vmem:[#allocation2 + $0x14] sm:$0x1] }
  0xb4   : > { %v633_v37 = vpack.c.b16 %v626_v26, %v625_v13  ;;  %v603_v38 = vrot.slane %v602_v31, 4  ;;  %v616_v39 = vor.u32 %v615_v27, %v612_v21  ;;  %v1109_v40 = vsel %vm650_vm7, %v1902_v35, 0  ;;  %v1954_v14 = vld [vmem:[%s2535_s1 + $0x10] sm:$0x3]  ;;  %v958_v21 = vld [vmem:[#allocation2 + $0x18] sm:$0xf] }
  0xb5   : > { %1118 = vmatpush.bf16.msrb.mxu0 %v1109_v40  ;;  %v971_v44 = vshrl.u32 %v954_v30, 16  ;;  %v974_v45 = vshll.u32 %v954_v30, 16  ;;  %v621_v48 = vrot.slane %v619_v22, 5  ;;  %v777_v49 = vsel %vm2284_vm14, %v1868_v34, %v776_v56  ;;  %v1920_v56 = vld [vmem:[%s2535_s1 + $0xc] sm:$0x3] }
  0xb6   : > { %1844 = vmatmul.msk.bf16.vlgmr.msra.gmra.mxu0 %vm637_vm10, %v633_v37  ;;  %v608_v46 = vsel %vm2239_vm11, %v603_v38, %v607_v33  ;;  %v617_v47 = vrot.slane %v616_v39, 4  ;;  %v980_v53 = vshll.u32 %v2293_v19, 16  ;;  %v781_v54 = vsel %vm2284_vm14, %v1869_v36, %v780_v32  ;;  %v960_v27 = vld [vmem:[#allocation2 + $0x20] sm:$0xf]  ;;  %v749_v34 = vld [vmem:[#allocation2 + $0x10] sm:$0xe] }
  0xb7   : > { %v631_v16 = vunpack.c.l.b16 %v608_v46  ;;  %v973_v51 = vrot.slane %v971_v44, 4  ;;  %v976_v52 = vrot.slane %v974_v45, 5  ;;  %v985_v57 = vshrl.u32 %v956_v43, 16  ;;  %v750_v36 = vld [vmem:[#allocation2 + $0x18] sm:$0xe] }
  0xb8   : > { %v622_v23 = vsel %vm2239_vm11, %v617_v47, %v621_v48  ;;  %v988_v58 = vshll.u32 %v956_v43, 16  ;;  %v982_v61 = vrot.slane %v980_v53, 5  ;;  %v994_v62 = vshll.u32 %v2300_v55, 16  ;;  %v2327_v47 = vld [vmem:[#allocation2 + $0x1c] sm:$0x1] }
  0xb9   : > { %v632_v59 = vunpack.c.l.b16 %v622_v23  ;;  %v977_v60 = vor.u32 %v976_v52, %v973_v51  ;;  %v808_v18 = vunpack.c.l.b16 %v777_v49  ;;  %v987_v7 = vrot.slane %v985_v57, 4 }
  0xba   : > { %v990_v8 = vrot.slane %v988_v58, 5  ;;  %v809_v12 = vunpack.c.l.b16 %v781_v54  ;;  %v1314_v13 = vsel %vm650_vm7, %v1920_v56, 0  ;;  %v996_v17 = vrot.slane %v994_v62, 5  ;;  %v1884_v58 = vld [vmem:[#allocation2 + $0x8] sm:$0xf] }
  0xbb   : > { %v636_v10 = vpack.c.b16 %v632_v59, %v631_v16  ;;  %v978_v50 = vrot.slane %v977_v60, 4  ;;  %1323 = vmatpush.bf16.msra.mxu2 %v1314_v13  ;;  %v1508_v6 = vsel %vm650_vm7, %v1941_v0, 0  ;;  %v1231_v20 = vsel %vm650_vm7, %v1915_v4, 0  ;;  %v2330_v16 = vld [vmem:[#allocation2 + $0x24] sm:$0x1] }
  0xbc   : > { %v991_v15 = vor.u32 %v990_v8, %v987_v7  ;;  %1240 = vmatpush.bf16.msra.mxu1 %v1231_v20  ;;  %v1851_v25 = vor.u32 %v1963_v9, %v1850_v5  ;;  %v816_v26 = vpack.c.b16 %v809_v12, %v808_v18  ;;  %v1630_v31 = vsel %vm650_vm7, %v1954_v14, 0  ;;  %v964_v62 = vld [vmem:[#allocation2 + $0x30] sm:$0xf]  ;;  %v1964_v5 = vld [vmem:[#allocation2 + $0x14] sm:$0xf0] }
  0xbd   : > { %1847 = vmatmul.msk.bf16.vlgmr.msra.gmra.mxu3 %vm637_vm10, %v636_v10  ;;  %v983_v22 = vsel %vm2239_vm11, %v978_v50, %v982_v61  ;;  %v999_v29 = vshrl.u32 %v958_v21, 16  ;;  %v1002_v30 = vshll.u32 %v958_v21, 16  ;;  %1639 = vmatpush.bf16.msra.mxu0 %v1630_v31  ;;  %v1013_v40 = vshrl.u32 %v960_v27, 16  ;;  %v1854_v4 = vld [vmem:[#allocation2 + $0x10] sm:$0xf] }
  0xbe   : > { %v992_v35 = vrot.slane %v991_v15, 4  ;;  %1517 = vmatpush.bf16.msra.mxu3 %v1508_v6  ;;  %v1084_v33 = vunpack.c.l.b16 %v983_v22  ;;  %v1016_v43 = vshll.u32 %v960_v27, 16  ;;  %v1870_v44 = vrot.slane %v749_v34, 9  ;;  %v962_v10 = vld [vmem:[#allocation2 + $0x28] sm:$0xf] }
  0xbf   : > { %v1001_v38 = vrot.slane %v999_v29, 4  ;;  %v1004_v39 = vrot.slane %v1002_v30, 5  ;;  %v784_v45 = vrot.slane %v2232_v11, 5  ;;  %v1871_v46 = vrot.slane %v750_v36, 9  ;;  %v1967_v11 = vld [vmem:[#allocation2 + $0xc] sm:$0xf0] }
  0xc0   : > { %v997_v32 = vsel %vm2239_vm11, %v992_v35, %v996_v17  ;;  %v788_v49 = vrot.slane %v2225_v3, 5  ;;  %v1015_v51 = vrot.slane %v1013_v40, 4  ;;  %v1018_v52 = vrot.slane %v1016_v43, 5  ;;  %v751_v22 = vld [vmem:[#allocation2 + $0x20] sm:$0xe] }
  0xc1   : > { %1864 = vmatmul.msk.bf16.vlgmr.msrb.gmra.mxu1 %vm637_vm10, %v1851_v25  ;;  %v1085_v37 = vunpack.c.l.b16 %v997_v32  ;;  %v1005_v53 = vor.u32 %v1004_v39, %v1001_v38  ;;  %v1008_v23 = vshll.u32 %v2327_v47, 16  ;;  %v1022_v57 = vshll.u32 %v2330_v16, 16  ;;  %v752_v25 = vld [vmem:[#allocation2 + $0x28] sm:$0xe]  ;;  %v2348_v36 = vld [vmem:[#allocation2 + $0x34] sm:$0x1] }
  0xc2   : > { %1877 = vmatmul.msk.bf16.vlgmr.msrb.gmra.mxu2 %vm637_vm10, %v816_v26  ;;  %v1019_v54 = vor.u32 %v1018_v52, %v1015_v51  ;;  %v785_v56 = vsel %vm2284_vm14, %v1870_v44, %v784_v45  ;;  %v789_v3 = vsel %vm2284_vm14, %v1871_v46, %v788_v49  ;;  %v1885_v0 = vor.u32 %v1967_v11, %v1884_v58  ;;  %v1888_v39 = vld [vmem:[#allocation2 + $0x18] sm:$0xf]  ;;  %v1968_v40 = vld [vmem:[#allocation2 + $0x1c] sm:$0xf0] }
  0xc3   : > { %v1092_v48 = vpack.c.b16 %v1085_v37, %v1084_v33  ;;  %v1006_v59 = vrot.slane %v1005_v53, 4  ;;  %v1010_v60 = vrot.slane %v1008_v23, 5  ;;  %v810_v18 = vunpack.c.l.b16 %v785_v56  ;;  %v2350_v37 = vld [vmem:[#allocation2 + $0x2c] sm:$0x1]  ;;  %v968_v51 = vld [vmem:[#allocation2 + $0x40] sm:$0xf] }
  0xc4   : > { %v1020_v61 = vrot.slane %v1019_v54, 4  ;;  %v811_v7 = vunpack.c.l.b16 %v789_v3  ;;  %v1024_v8 = vrot.slane %v1022_v57, 5  ;;  %v1041_v50 = vshrl.u32 %v964_v62, 16  ;;  %v1858_v52 = vld [vmem:[#allocation2 + $0x20] sm:$0xf] }
  0xc5   : > { %v1011_v9 = vsel %vm2239_vm11, %v1006_v59, %v1010_v60  ;;  %v1044_v13 = vshll.u32 %v964_v62, 16  ;;  %v1855_v14 = vor.u32 %v1964_v5, %v1854_v4  ;;  %v1027_v17 = vshrl.u32 %v962_v10, 16  ;;  %v1965_v53 = vld [vmem:[#allocation2 + $0x24] sm:$0xf0] }
  0xc6   : > { %1903 = vmatmul.msk.bf16.vlgmr.msrb.gmra.mxu0 %vm637_vm10, %v1092_v48  ;;  %v1025_v12 = vsel %vm2239_vm11, %v1020_v61, %v1024_v8  ;;  %v817_v15 = vpack.c.b16 %v811_v7, %v810_v18  ;;  %v1030_v6 = vshll.u32 %v962_v10, 16  ;;  %v1086_v20 = vunpack.c.l.b16 %v1011_v9  ;;  %v966_v48 = vld [vmem:[#allocation2 + $0x38] sm:$0xf]  ;;  %v753_v18 = vld [vmem:[#allocation2 + $0x30] sm:$0xe] }
  0xc7   : > { %v1087_v21 = vunpack.c.l.b16 %v1025_v12  ;;  %v1043_v35 = vrot.slane %v1041_v50, 4  ;;  %v1046_v26 = vrot.slane %v1044_v13, 5  ;;  %v1872_v31 = vrot.slane %v751_v22, 9  ;;  %v754_v7 = vld [vmem:[#allocation2 + $0x38] sm:$0xe] }
  0xc8   : > { %v1029_v27 = vrot.slane %v1027_v17, 4  ;;  %v1032_v29 = vrot.slane %v1030_v6, 5  ;;  %v792_v32 = vrot.slane %v2221_v63, 5  ;;  %v1873_v33 = vrot.slane %v752_v25, 9 }
  0xc9   : > { %v1093_v30 = vpack.c.b16 %v1087_v21, %v1086_v20  ;;  %v796_v34 = vrot.slane %v2230_v42, 5  ;;  %v1047_v38 = vor.u32 %v1046_v26, %v1043_v35  ;;  %v1050_v44 = vshll.u32 %v2348_v36, 16  ;;  %v2370_v21 = vld [vmem:[#allocation2 + $0x44] sm:$0x1] }
  0xca   : > { %v1033_v43 = vor.u32 %v1032_v29, %v1029_v27  ;;  %v793_v45 = vsel %vm2284_vm14, %v1872_v31, %v792_v32  ;;  %v1036_v42 = vshll.u32 %v2350_v37, 16  ;;  %v1889_v49 = vor.u32 %v1968_v40, %v1888_v39  ;;  %v1969_v31 = vld [vmem:[#allocation2 + $0x2c] sm:$0xf0]  ;;  %v1892_v32 = vld [vmem:[#allocation2 + $0x28] sm:$0xf] }
  0xcb   : > { %v797_v63 = vsel %vm2284_vm14, %v1873_v33, %v796_v34  ;;  %v1048_v46 = vrot.slane %v1047_v38, 4  ;;  %v812_v23 = vunpack.c.l.b16 %v793_v45  ;;  %v1052_v58 = vrot.slane %v1050_v44, 5  ;;  %v1862_v34 = vld [vmem:[#allocation2 + $0x30] sm:$0xf]  ;;  %v1966_v38 = vld [vmem:[#allocation2 + $0x34] sm:$0xf0] }
  0xcc   : > { %v813_v54 = vunpack.c.l.b16 %v797_v63  ;;  %v1034_v57 = vrot.slane %v1033_v43, 4  ;;  %v1038_v11 = vrot.slane %v1036_v42, 5  ;;  %v1055_v56 = vshrl.u32 %v966_v48, 16 }
  0xcd   : > { %1898 = vmatmul.msk.bf16.vlgmr.msrb.gmra.mxu3 %vm637_vm10, %v1885_v0  ;;  %v1053_v3 = vsel %vm2239_vm11, %v1048_v46, %v1052_v58  ;;  %v1058_v59 = vshll.u32 %v966_v48, 16  ;;  %v1069_v60 = vshrl.u32 %v968_v51, 16  ;;  %v1072_v61 = vshll.u32 %v968_v51, 16  ;;  %v1148_v46 = vld [vmem:[#allocation2 + $0x8] sm:$0xe] }
  0xce   : > { %v1859_v62 = vor.u32 %v1965_v53, %v1858_v52  ;;  %v818_v0 = vpack.c.b16 %v813_v54, %v812_v23  ;;  %v1039_v4 = vsel %vm2239_vm11, %v1034_v57, %v1038_v11  ;;  %v1089_v5 = vunpack.c.l.b16 %v1053_v3  ;;  %v1149_v51 = vld [vmem:[#allocation2 + $0x10] sm:$0xe]  ;;  %v1355_v53 = vld [vmem:[#allocation2 + $0x18] sm:$0xf]  ;;  %v1354_v58 = vld [vmem:[#allocation2 + $0x14] sm:$0x1] }
  0xcf   : > { %v1057_v8 = vrot.slane %v1055_v56, 4  ;;  %v1060_v10 = vrot.slane %v1058_v59, 5  ;;  %v1071_v9 = vrot.slane %v1069_v60, 4  ;;  %v1074_v12 = vrot.slane %v1072_v61, 5  ;;  %v1353_v52 = vld [vmem:[#allocation2 + $0x10] sm:$0xf] }
  0xd0   : > { %v1088_v50 = vunpack.c.l.b16 %v1039_v4  ;;  %v1874_v13 = vrot.slane %v753_v18, 9  ;;  %v800_v17 = vrot.slane %v2250_v24, 5  ;;  %v1875_v6 = vrot.slane %v754_v7, 9  ;;  %v1356_v56 = vld [vmem:[#allocation2 + $0x1c] sm:$0x1] }
  0xd1   : > { %1865 = vmatmul.msk.bf16.gmra.mxu1 %vm637_vm10, %v1855_v14  ;;  %v2366_v14 = vld [vmem:[#allocation2 + $0x3c] sm:$0x1]  ;;  %v804_v20 = vrot.slane %v2264_v1, 5  ;;  %v1061_v22 = vor.u32 %v1060_v10, %v1057_v8  ;;  %v1075_v25 = vor.u32 %v1074_v12, %v1071_v9  ;;  %v1078_v35 = vshll.u32 %v2370_v21, 16  ;;  %v1547_v3 = vld [vmem:[#allocation2 + $0x10] sm:$0xe] }
  0xd2   : > { %1878 = vmatmul.msk.bf16.gmra.mxu2 %vm637_vm10, %v817_v15  ;;  %v1094_v15 = vpack.c.b16 %v1089_v5, %v1088_v50  ;;  %v1064_v26 = vshll.u32 %v2366_v14, 16  ;;  %v801_v27 = vsel %vm2284_vm14, %v1874_v13, %v800_v17  ;;  %v1893_v33 = vor.u32 %v1969_v31, %v1892_v32  ;;  %v1548_v61 = vld [vmem:[#allocation2 + $0x18] sm:$0xe]  ;;  %v1970_v9 = vld [vmem:[#allocation2 + $0x3c] sm:$0xf0] }
  0xd3   : > { %v805_v24 = vsel %vm2284_vm14, %v1875_v6, %v804_v20  ;;  %v1062_v29 = vrot.slane %v1061_v22, 4  ;;  %v1080_v1 = vrot.slane %v1078_v35, 5  ;;  %v814_v39 = vunpack.c.l.b16 %v801_v27  ;;  %v1923_v35 = vld [vmem:[#allocation2 + $0x10] sm:$0xf] }
  0xd4   : > { %v815_v40 = vunpack.c.l.b16 %v805_v24  ;;  %v1066_v43 = vrot.slane %v1064_v26, 5  ;;  %v1863_v63 = vor.u32 %v1966_v38, %v1862_v34  ;;  %v1174_v23 = vrot.slane %v2293_v19, 5  ;;  %v1896_v19 = vld [vmem:[#allocation2 + $0x38] sm:$0xf]  ;;  %v1151_v38 = vld [vmem:[#allocation2 + $0x20] sm:$0xe] }
  0xd5   : > { %v1178_v54 = vrot.slane %v2300_v55, 5  ;;  %v1907_v57 = vrot.slane %v1148_v46, 9  ;;  %v1908_v11 = vrot.slane %v1149_v51, 9  ;;  %v1370_v59 = vshrl.u32 %v1353_v52, 16  ;;  %v1971_v26 = vld [vmem:[#allocation2 + $0x14] sm:$0xf0] }
  0xd6   : > { %1904 = vmatmul.msk.bf16.gmra.mxu0 %vm637_vm10, %v1093_v30  ;;  %v1076_v30 = vrot.slane %v1075_v25, 4  ;;  %v1067_v44 = vsel %vm2239_vm11, %v1062_v29, %v1066_v43  ;;  %v819_v42 = vpack.c.b16 %v815_v40, %v814_v39  ;;  %v1387_v4 = vshll.u32 %v1355_v53, 16  ;;  %v1357_v39 = vld [vmem:[#allocation2 + $0x20] sm:$0xf] }
  0xd7   : > { %v1090_v48 = vunpack.c.l.b16 %v1067_v44  ;;  %v1175_v5 = vsel %vm2284_vm14, %v1907_v57, %v1174_v23  ;;  %v1946_v18 = vrot.slane %v1547_v3, 9  ;;  %v1179_v55 = vsel %vm2284_vm14, %v1908_v11, %v1178_v54  ;;  %v1358_v11 = vld [vmem:[#allocation2 + $0x24] sm:$0x1]  ;;  %v1549_v3 = vld [vmem:[#allocation2 + $0x20] sm:$0xe] }
  0xd8   : > { %v1081_v45 = vsel %vm2239_vm11, %v1076_v30, %v1080_v1  ;;  %v1573_v7 = vrot.slane %v1354_v58, 5  ;;  %v1947_v8 = vrot.slane %v1548_v61, 9  ;;  %v1577_v10 = vrot.slane %v1356_v56, 5  ;;  %v1150_v1 = vld [vmem:[#allocation2 + $0x18] sm:$0xe] }
  0xd9   : > { %v1372_v12 = vrot.slane %v1370_v59, 4  ;;  %v1206_v17 = vunpack.c.l.b16 %v1175_v5  ;;  %v1207_v6 = vunpack.c.l.b16 %v1179_v55  ;;  %v1897_v20 = vor.u32 %v1970_v9, %v1896_v19  ;;  %v1550_v59 = vld [vmem:[#allocation2 + $0x28] sm:$0xe] }
  0xda   : > { %v1574_v22 = vsel %vm2284_vm14, %v1946_v18, %v1573_v7  ;;  %v1578_v25 = vsel %vm2284_vm14, %v1947_v8, %v1577_v10  ;;  %v1379_v27 = vshll.u32 %v1354_v58, 16  ;;  %v1393_v29 = vshll.u32 %v1356_v56, 16  ;;  %v1360_v56 = vld [vmem:[#allocation2 + $0x2c] sm:$0x1] }
  0xdb   : > { %v1214_v30 = vpack.c.b16 %v1207_v6, %v1206_v17  ;;  %v1924_v32 = vor.u32 %v1971_v26, %v1923_v35  ;;  %v1606_v34 = vunpack.c.l.b16 %v1578_v25  ;;  %v1182_v46 = vrot.slane %v2327_v47, 5  ;;  %v317_v25 = vld [vmem:[#allocation2 + $0x48] sm:$0x1] }
  0xdc   : > { %v1381_v43 = vrot.slane %v1379_v27, 5  ;;  %v1398_v51 = vshrl.u32 %v1357_v39, 16  ;;  %v1948_v18 = vrot.slane %v1549_v3, 9  ;;  %v1581_v19 = vrot.slane %v1358_v11, 5 }
  0xdd   : > { %1899 = vmatmul.msk.bf16.gmra.mxu3 %vm637_vm10, %v1889_v49  ;;  %v1091_v49 = vunpack.c.l.b16 %v1081_v45  ;;  %v1395_v45 = vrot.slane %v1393_v29, 5  ;;  %v1949_v55 = vrot.slane %v1550_v59, 9  ;;  %v1585_v7 = vrot.slane %v1360_v56, 5 }
  0xde   : > { %v1407_v17 = vshll.u32 %v1358_v11, 16  ;;  %v1582_v6 = vsel %vm2284_vm14, %v1948_v18, %v1581_v19  ;;  %v318_v27 = vsel %vm2074_vm3, 0, %v317_v25  ;;  %v1194_v2 = vrot.slane %v2348_v36, 5 }
  0xdf   : > { %v1095_v60 = vpack.c.b16 %v1091_v49, %v1090_v48  ;;  %v1910_v48 = vrot.slane %v1151_v38, 9  ;;  %v1186_v49 = vrot.slane %v2330_v16, 5  ;;  %319 = vst [vmem:[#allocation2 + $0x48] sm:$0x1] %v318_v27 }
  0xe1   : > { %1866 = vmatmul.msk.bf16.gmra.mxu1 %vm637_vm10, %v1859_v62  ;;  %v1373_v62 = vshll.u32 %v1353_v52, 16  ;;  %v1401_v52 = vshll.u32 %v1357_v39, 16  ;;  %v1187_v16 = vsel %vm2284_vm14, %v1910_v48, %v1186_v49  ;;  %v1362_v49 = vld [vmem:[#allocation2 + $0x34] sm:$0x1] }
  0xe2   : > { %1879 = vmatmul.msk.bf16.gmra.mxu2 %vm637_vm10, %v818_v0  ;;  %v1384_v0 = vshrl.u32 %v1355_v53, 16  ;;  %v1209_v10 = vunpack.c.l.b16 %v1187_v16  ;;  %v1589_v59 = vrot.slane %v1362_v49, 5 }
  0xe3   : > { %v1375_v50 = vrot.slane %v1373_v62, 5  ;;  %v1403_v61 = vrot.slane %v1401_v52, 5 }
  0xe4   : > { %v1386_v13 = vrot.slane %v1384_v0, 4 }
  0xe5   : > { %v1376_v31 = vor.u32 %v1375_v50, %v1372_v12 }
  0xe6   : > { %1905 = vmatmul.msk.bf16.gmra.mxu0 %vm637_vm10, %v1094_v15  ;;  %v1389_v15 = vrot.slane %v1387_v4, 5 }
  0xe7   : > { %v1377_v40 = vrot.slane %v1376_v31, 4  ;;  %v1153_v31 = vld [vmem:[#allocation2 + $0x30] sm:$0xe] }
  0xe8   : > { %v1390_v24 = vor.u32 %v1389_v15, %v1386_v13  ;;  %v1927_v13 = vld [vmem:[#allocation2 + $0x20] sm:$0xf]  ;;  %v1972_v15 = vld [vmem:[#allocation2 + $0x24] sm:$0xf0] }
  0xe9   : > { %v1382_v57 = vsel %vm2239_vm11, %v1377_v40, %v1381_v43  ;;  %v1152_v40 = vld [vmem:[#allocation2 + $0x28] sm:$0xe]  ;;  %v1912_v43 = vrot.slane %v1153_v31, 9 }
  0xea   : > { %v1391_v44 = vrot.slane %v1390_v24, 4  ;;  %v1483_v62 = vunpack.c.l.b16 %v1382_v57  ;;  %v1928_v24 = vor.u32 %v1972_v15, %v1927_v13  ;;  %v1911_v52 = vrot.slane %v1152_v40, 9  ;;  %v1367_v31 = vld [vmem:[#allocation2 + $0x48] sm:$0xf] }
  0xeb   : > { %v1195_v36 = vsel %vm2284_vm14, %v1912_v43, %v1194_v2  ;;  %v1554_v40 = vld [vmem:[#allocation2 + $0x48] sm:$0xe] }
  0xec   : > { %v1396_v58 = vsel %vm2239_vm11, %v1391_v44, %v1395_v45 }
  0xed   : > { %1900 = vmatmul.msk.bf16.gmra.mxu3 %vm637_vm10, %v1893_v33  ;;  %v1605_v33 = vunpack.c.l.b16 %v1574_v22  ;;  %v1484_v0 = vunpack.c.l.b16 %v1396_v58  ;;  %v1421_v22 = vshll.u32 %v1360_v56, 16 }
  0xef   : > { %v1613_v54 = vpack.c.b16 %v1606_v34, %v1605_v33  ;;  %v1491_v12 = vpack.c.b16 %v1484_v0, %v1483_v62  ;;  %v1409_v33 = vrot.slane %v1407_v17, 5  ;;  %v1363_v34 = vld [vmem:[#allocation2 + $0x38] sm:$0xf]  ;;  %v1423_v38 = vrot.slane %v1421_v22, 5  ;;  %v1155_v22 = vld [vmem:[#allocation2 + $0x40] sm:$0xe] }
  0xf0   : > { %v1211_v62 = vunpack.c.l.b16 %v1195_v36 }
  0xf1   : > { %1867 = vmatmul.msk.bf16.gmra.mxu1 %vm637_vm10, %v1863_v63  ;;  %v1359_v63 = vld [vmem:[#allocation2 + $0x28] sm:$0xf] }
  0xf2   : > { %1880 = vmatmul.msk.bf16.gmra.mxu2 %vm637_vm10, %v819_v42  ;;  %v1909_v42 = vrot.slane %v1150_v1, 9  ;;  %v1412_v53 = vshrl.u32 %v1359_v63, 16  ;;  %v1415_v23 = vshll.u32 %v1359_v63, 16  ;;  %v1607_v1 = vunpack.c.l.b16 %v1582_v6 }
  0xf4   : > { %v1183_v47 = vsel %vm2284_vm14, %v1909_v42, %v1182_v46  ;;  %v1414_v4 = vrot.slane %v1412_v53, 4  ;;  %v1417_v5 = vrot.slane %v1415_v23, 5  ;;  %v1440_v42 = vshrl.u32 %v1363_v34, 16  ;;  %v1551_v23 = vld [vmem:[#allocation2 + $0x30] sm:$0xe] }
  0xf5   : > { %v1208_v8 = vunpack.c.l.b16 %v1183_v47  ;;  %v1443_v46 = vshll.u32 %v1363_v34, 16  ;;  %v1190_v53 = vrot.slane %v2350_v37, 5  ;;  %v1950_v3 = vrot.slane %v1551_v23, 9  ;;  %v1366_v34 = vld [vmem:[#allocation2 + $0x44] sm:$0x1] }
  0xf6   : > { %1906 = vmatmul.msk.bf16.gmra.mxu0 %vm637_vm10, %v1095_v60  ;;  %v1400_v60 = vrot.slane %v1398_v51, 4  ;;  %v1418_v50 = vor.u32 %v1417_v5, %v1414_v4  ;;  %v1364_v51 = vld [vmem:[#allocation2 + $0x3c] sm:$0x1]  ;;  %v1442_v47 = vrot.slane %v1440_v42, 4  ;;  %v1931_v4 = vld [vmem:[#allocation2 + $0x30] sm:$0xf] }
  0xf7   : > { %v1215_v35 = vpack.c.b16 %v1209_v10, %v1208_v8  ;;  %v1445_v16 = vrot.slane %v1443_v46, 5  ;;  %v1191_v37 = vsel %vm2284_vm14, %v1911_v52, %v1190_v53  ;;  %v1973_v5 = vld [vmem:[#allocation2 + $0x34] sm:$0xf0]  ;;  %v1435_v10 = vshll.u32 %v1362_v49, 16 }
  0xf8   : > { %v1404_v9 = vor.u32 %v1403_v61, %v1400_v60  ;;  %v1419_v29 = vrot.slane %v1418_v50, 4  ;;  %v1593_v61 = vrot.slane %v1364_v51, 5  ;;  %v1932_v50 = vor.u32 %v1973_v5, %v1931_v4 }
  0xf9   : > { %v1446_v19 = vor.u32 %v1445_v16, %v1442_v47  ;;  %v1437_v25 = vrot.slane %v1435_v10, 5  ;;  %v1953_v49 = vrot.slane %v1554_v40, 9  ;;  %v1935_v47 = vld [vmem:[#allocation2 + $0x40] sm:$0xf]  ;;  %v1974_v16 = vld [vmem:[#allocation2 + $0x44] sm:$0xf0] }
  0xfa   : > { %v1405_v26 = vrot.slane %v1404_v9, 4  ;;  %v1424_v45 = vsel %vm2239_vm11, %v1419_v29, %v1423_v38  ;;  %v1449_v9 = vshll.u32 %v1364_v51, 16  ;;  %v1914_v29 = vrot.slane %v1155_v22, 9  ;;  %v1368_v38 = vld [vmem:[#allocation2 + $0x4c] sm:$0x1] }
  0xfb   : > { %v1486_v58 = vunpack.c.l.b16 %v1424_v45  ;;  %v1447_v6 = vrot.slane %v1446_v19, 4  ;;  %v1471_v45 = vshll.u32 %v1367_v31, 16  ;;  %v1601_v51 = vrot.slane %v1368_v38, 5 }
  0xfc   : > { %v1410_v39 = vsel %vm2239_vm11, %v1405_v26, %v1409_v33  ;;  %v1365_v26 = vld [vmem:[#allocation2 + $0x40] sm:$0xf] }
  0xfd   : > { %1901 = vmatmul.msk.bf16.gmra.mxu3 %vm637_vm10, %v1897_v20  ;;  %v1586_v20 = vsel %vm2284_vm14, %v1949_v55, %v1585_v7  ;;  %v1485_v57 = vunpack.c.l.b16 %v1410_v39  ;;  %v1210_v55 = vunpack.c.l.b16 %v1191_v37  ;;  %v1590_v7 = vsel %vm2284_vm14, %v1950_v3, %v1589_v59  ;;  %v1553_v39 = vld [vmem:[#allocation2 + $0x40] sm:$0xe] }
  0xfe   : > { %v1609_v13 = vunpack.c.l.b16 %v1590_v7  ;;  %v1454_v43 = vshrl.u32 %v1365_v26, 16  ;;  %v1457_v2 = vshll.u32 %v1365_v26, 16  ;;  %v1952_v46 = vrot.slane %v1553_v39, 9 }
  0xff   : > { %v1492_v0 = vpack.c.b16 %v1486_v58, %v1485_v57  ;;  %v1602_v3 = vsel %vm2284_vm14, %v1953_v49, %v1601_v51 }
 0x100   : > { %v1456_v52 = vrot.slane %v1454_v43, 4  ;;  %v1459_v53 = vrot.slane %v1457_v2, 5  ;;  %v1612_v5 = vunpack.c.l.b16 %v1602_v3 }
 0x101   : > { %1916 = vmatmul.msk.bf16.vlgmr.msra.gmra.mxu1 %vm637_vm10, %v1214_v30  ;;  %v1361_v30 = vld [vmem:[#allocation2 + $0x30] sm:$0xf] }
 0x102   : > { %1937 = vmatmul.msk.bf16.vlgmr.msra.gmra.mxu2 %vm637_vm10, %v1924_v32  ;;  %v1608_v32 = vunpack.c.l.b16 %v1586_v20  ;;  %v1426_v44 = vshrl.u32 %v1361_v30, 16  ;;  %v1429_v63 = vshll.u32 %v1361_v30, 16  ;;  %v1154_v20 = vld [vmem:[#allocation2 + $0x38] sm:$0xe]  ;;  %v1202_v30 = vrot.slane %v2370_v21, 5 }
 0x103   : > { %v1913_v27 = vrot.slane %v1154_v20, 9  ;;  %v1460_v59 = vor.u32 %v1459_v53, %v1456_v52 }
 0x104   : > { %v1614_v48 = vpack.c.b16 %v1608_v32, %v1607_v1  ;;  %v1428_v11 = vrot.slane %v1426_v44, 4  ;;  %v1431_v56 = vrot.slane %v1429_v63, 5  ;;  %v1468_v44 = vshrl.u32 %v1367_v31, 16 }
 0x105   : > { %v1203_v42 = vsel %vm2284_vm14, %v1914_v29, %v1202_v30 }
 0x106   : > { %1955 = vmatmul.msk.bf16.vlgmr.msra.gmra.mxu0 %vm637_vm10, %v1613_v54  ;;  %v1552_v54 = vld [vmem:[#allocation2 + $0x38] sm:$0xe]  ;;  %v1432_v18 = vor.u32 %v1431_v56, %v1428_v11  ;;  %v1470_v23 = vrot.slane %v1468_v44, 4  ;;  %v1213_v58 = vunpack.c.l.b16 %v1203_v42  ;;  %v1463_v56 = vshll.u32 %v1366_v34, 16 }
 0x107   : > { %v1951_v60 = vrot.slane %v1552_v54, 9  ;;  %v1473_v54 = vrot.slane %v1471_v45, 5 }
 0x108   : > { %v1433_v17 = vrot.slane %v1432_v18, 4  ;;  %v1461_v18 = vrot.slane %v1460_v59, 4  ;;  %v1465_v19 = vrot.slane %v1463_v56, 5 }
 0x109   : > { %v1594_v8 = vsel %vm2284_vm14, %v1951_v60, %v1593_v61  ;;  %v1474_v60 = vor.u32 %v1473_v54, %v1470_v23  ;;  %v1477_v61 = vshll.u32 %v1368_v38, 16 }
 0x10a   : > { %v1610_v15 = vunpack.c.l.b16 %v1594_v8  ;;  %v1438_v32 = vsel %vm2239_vm11, %v1433_v17, %v1437_v25 }
 0x10b   : > { %v1479_v7 = vrot.slane %v1477_v61, 5 }
 0x10c   : > { %v1615_v1 = vpack.c.b16 %v1610_v15, %v1609_v13 }
 0x10d   : > { %1942 = vmatmul.msk.bf16.vlgmr.msra.gmra.mxu3 %vm637_vm10, %v1491_v12  ;;  %v1216_v12 = vpack.c.b16 %v1211_v62, %v1210_v55  ;;  %v1475_v55 = vrot.slane %v1474_v60, 4 }
 0x111   : > { %1917 = vmatmul.msk.bf16.gmra.mxu1 %vm637_vm10, %v1215_v35  ;;  %v1451_v35 = vrot.slane %v1449_v9, 5  ;;  %v1466_v9 = vsel %vm2239_vm11, %v1461_v18, %v1465_v19 }
 0x112   : > { %1938 = vmatmul.msk.bf16.gmra.mxu2 %vm637_vm10, %v1928_v24  ;;  %v1198_v24 = vrot.slane %v2366_v14, 5  ;;  %v1487_v14 = vunpack.c.l.b16 %v1438_v32  ;;  %v1489_v13 = vunpack.c.l.b16 %v1466_v9 }
 0x113   : > { %v1452_v33 = vsel %vm2239_vm11, %v1447_v6, %v1451_v35 }
 0x114   : > { %v1488_v63 = vunpack.c.l.b16 %v1452_v33  ;;  %v1199_v21 = vsel %vm2284_vm14, %v1913_v27, %v1198_v24 }
 0x115   : > { %v1212_v57 = vunpack.c.l.b16 %v1199_v21 }
 0x116   : > { %1956 = vmatmul.msk.bf16.gmra.mxu0 %vm637_vm10, %v1614_v48  ;;  %v1597_v48 = vrot.slane %v1366_v34, 5  ;;  %v1493_v36 = vpack.c.b16 %v1488_v63, %v1487_v14 }
 0x117   : > { %v1217_v62 = vpack.c.b16 %v1213_v58, %v1212_v57 }
 0x118   : > { %v1598_v11 = vsel %vm2284_vm14, %v1952_v46, %v1597_v48 }
 0x119   : > { %v1611_v4 = vunpack.c.l.b16 %v1598_v11 }
 0x11b   : > { %v1616_v10 = vpack.c.b16 %v1612_v5, %v1611_v4 }
 0x11d   : > { %1943 = vmatmul.msk.bf16.gmra.mxu3 %vm637_vm10, %v1492_v0  ;;  %v1936_v0 = vor.u32 %v1974_v16, %v1935_v47 }
 0x121   : > { %1918 = vmatmul.msk.bf16.gmra.mxu1 %vm637_vm10, %v1216_v12  ;;  %v1480_v12 = vsel %vm2239_vm11, %v1475_v55, %v1479_v7 }
 0x122   : > { %1939 = vmatmul.msk.bf16.gmra.mxu2 %vm637_vm10, %v1932_v50  ;;  %v1490_v15 = vunpack.c.l.b16 %v1480_v12 }
 0x124   : > { %v1494_v17 = vpack.c.b16 %v1490_v15, %v1489_v13 }
 0x126   : > { %1957 = vmatmul.msk.bf16.gmra.mxu0 %vm637_vm10, %v1615_v1 }
 0x12d   : > { %1944 = vmatmul.msk.bf16.gmra.mxu3 %vm637_vm10, %v1493_v36 }
 0x12e   : > { %v668_v37 = vpop.f32.mrf.mxu1 }
 0x131   : > { %1919 = vmatmul.msk.bf16.gmra.mxu1 %vm637_vm10, %v1217_v62 }
 0x132   : > { %1940 = vmatmul.msk.bf16.gmra.mxu2 %vm637_vm10, %v1936_v0 }
 0x133   : > { %v663_v41 = vpop.f32.mrf.mxu0 }
 0x135   : > { %v673_v8 = vpop.f32.mrf.mxu2 }
 0x136   : > { %v2460_v50 = vpop.f32.mrf.mxu1  ;;  %1958 = vmatmul.msk.bf16.gmra.mxu0 %vm637_vm10, %v1616_v10 }
 0x13b   : > { %v665_v6 = vpop.f32.mrf.mxu0 }
 0x13d   : > { %v2463_v20 = vpop.f32.mrf.mxu2  ;;  %1945 = vmatmul.msk.bf16.gmra.mxu3 %vm637_vm10, %v1494_v17 }
 0x13e   : > { %v727_v22 = vpop.f32.mrf.mxu1 }
 0x13f   : > { %v728_v25 = vadd.f32 %v727_v22, %v663_v41 }
 0x140   : > { %v2466_v35 = vpop.f32.mrf.mxu3 }
 0x143   : > { %v1120_v26 = vpop.f32.mrf.mxu0 }
 0x145   : > { %v844_v31 = vpop.f32.mrf.mxu2 }
 0x146   : > { %v864_v28 = vadd.f32 %v844_v31, %v728_v25  ;;  %v729_v27 = vpop.f32.mrf.mxu1 }
 0x147   : > { %v730_v19 = vadd.f32 %v729_v27, %v665_v6 }
 0x148   : > { %v2468_v24 = vpop.f32.mrf.mxu3 }
 0x14b   : > { %v1122_v29 = vpop.f32.mrf.mxu0 }
 0x14d   : > { %v846_v30 = vpop.f32.mrf.mxu2 }
 0x14e   : > { %v732_v1 = vpop.f32.mrf.mxu1  ;;  %v865_v7 = vadd.f32 %v846_v30, %v730_v19 }
 0x14f   : > { %v733_v32 = vadd.f32 %v732_v1, %v668_v37 }
 0x150   : > { %v926_v33 = vpop.f32.mrf.mxu3 }
 0x151   : > { %v946_v34 = vadd.f32 %v926_v33, %v864_v28 }
 0x153   : > { %v1125_v38 = vpop.f32.mrf.mxu0  ;;  %v1140_v46 = vadd.f32 %v1120_v26, %v946_v34 }
 0x155   : > { %v849_v39 = vpop.f32.mrf.mxu2 }
 0x156   : > { %v866_v40 = vadd.f32 %v849_v39, %v733_v32  ;;  %v734_v43 = vpop.f32.mrf.mxu1 }
 0x157   : > { %v735_v6 = vadd.f32 %v734_v43, %v2460_v50 }
 0x158   : > { %v928_v2 = vpop.f32.mrf.mxu3 }
 0x15b   : > { %v2470_v44 = vpop.f32.mrf.mxu0 }
 0x15d   : > { %v851_v45 = vpop.f32.mrf.mxu2 }
 0x15e   : > { %v737_v14 = vpop.f32.mrf.mxu1  ;;  %v867_v33 = vadd.f32 %v851_v45, %v735_v6 }
 0x15f   : > { %v738_v63 = vadd.f32 %v737_v14, %v673_v8  ;;  %v947_v8 = vadd.f32 %v928_v2, %v865_v7 }
 0x160   : > { %v931_v21 = vpop.f32.mrf.mxu3 }
 0x161   : > { %v948_v42 = vadd.f32 %v931_v21, %v866_v40  ;;  %v1141_v15 = vadd.f32 %v1122_v29, %v947_v8 }
 0x163   : > { %v1130_v48 = vpop.f32.mrf.mxu0  ;;  %v1142_v16 = vadd.f32 %v1125_v38, %v948_v42 }
 0x165   : > { %v854_v49 = vpop.f32.mrf.mxu2 }
 0x166   : > { %v868_v51 = vadd.f32 %v854_v49, %v738_v63  ;;  %v2472_v52 = vpop.f32.mrf.mxu1 }
 0x168   : > { %v933_v53 = vpop.f32.mrf.mxu3 }
 0x169   : > { %v949_v14 = vadd.f32 %v933_v53, %v867_v33  ;;  %v740_v53 = vadd.f32 %v2472_v52, %v2463_v20 }
 0x16b   : > { %v2474_v23 = vpop.f32.mrf.mxu0  ;;  %v1143_v45 = vadd.f32 %v2470_v44, %v949_v14 }
 0x16d   : > { %v2476_v54 = vpop.f32.mrf.mxu2 }
 0x16e   : > { %v2478_v57 = vpop.f32.mrf.mxu1  ;;  %v869_v19 = vadd.f32 %v2476_v54, %v740_v53 }
 0x16f   : > { %v743_v20 = vadd.f32 %v2478_v57, %v2466_v35 }
 0x170   : > { %v936_v58 = vpop.f32.mrf.mxu3 }
 0x171   : > { %v950_v36 = vadd.f32 %v936_v58, %v868_v51 }
 0x173   : > { %v2480_v11 = vpop.f32.mrf.mxu0  ;;  %v1144_v5 = vadd.f32 %v1130_v48, %v950_v36 }
 0x175   : > { %v2482_v56 = vpop.f32.mrf.mxu2 }
 0x176   : > { %v2484_v47 = vpop.f32.mrf.mxu1 }
 0x177   : > { %v745_v35 = vadd.f32 %v2484_v47, %v2468_v24 }
 0x178   : > { %v2486_v3 = vpop.f32.mrf.mxu3 }
 0x17b   : > { %v2488_v59 = vpop.f32.mrf.mxu0 }
 0x17d   : > { %v2490_v60 = vpop.f32.mrf.mxu2 }
 0x17e   : > { %v1242_v61 = vpop.f32.mrf.mxu1 }
 0x17f   : > { %v1262_v12 = vadd.f32 %v1242_v61, %v1140_v46 }
 0x180   : > { %v2492_v37 = vpop.f32.mrf.mxu3 }
 0x183   : > { %v1641_v0 = vpop.f32.mrf.mxu0 }
 0x185   : > { %v1325_v62 = vpop.f32.mrf.mxu2 }
 0x186   : > { %v1244_v4 = vpop.f32.mrf.mxu1  ;;  %v1345_v13 = vadd.f32 %v1325_v62, %v1262_v12 }
 0x187   : > { %v1263_v22 = vadd.f32 %v1244_v4, %v1141_v15 }
 0x188   : > { %v2494_v18 = vpop.f32.mrf.mxu3 }
 0x18b   : > { %v1643_v41 = vpop.f32.mrf.mxu0 }
 0x18d   : > { %v1327_v55 = vpop.f32.mrf.mxu2 }
 0x18e   : > { %v1247_v9 = vpop.f32.mrf.mxu1  ;;  %v1346_v26 = vadd.f32 %v1327_v55, %v1263_v22 }
 0x18f   : > { %v1264_v34 = vadd.f32 %v1247_v9, %v1142_v16  ;;  %v951_v9 = vadd.f32 %v2486_v3, %v869_v19 }
 0x190   : > { %v1519_v10 = vpop.f32.mrf.mxu3 }
 0x191   : > { %v1539_v25 = vadd.f32 %v1519_v10, %v1345_v13  ;;  %v1145_v52 = vadd.f32 %v2474_v23, %v951_v9 }
 0x193   : > { %v1646_v28 = vpop.f32.mrf.mxu0  ;;  %v1661_v1 = vadd.f32 %v1641_v0, %v1539_v25 }
 0x195   : > { %v1330_v17 = vpop.f32.mrf.mxu2  ;;  %v1699_v38 = vmul.f32 %v1661_v1, %v1661_v1 }
 0x196   : > { %v1249_v27 = vpop.f32.mrf.mxu1  ;;  %v1347_v63 = vadd.f32 %v1330_v17, %v1264_v34 }
 0x197   : > { %v1265_v49 = vadd.f32 %v1249_v27, %v1143_v45 }
 0x198   : > { %v1521_v31 = vpop.f32.mrf.mxu3 }
 0x199   : > { %v1540_v32 = vadd.f32 %v1521_v31, %v1346_v26 }
 0x19b   : > { %v1662_v30 = vadd.f32 %v1643_v41, %v1540_v32  ;;  %v1648_v42 = vpop.f32.mrf.mxu0 }
 0x19d   : > { %v1332_v29 = vpop.f32.mrf.mxu2  ;;  %v1978_v39 = vpack.c.bf16 %v1662_v30, %v1661_v1  ;;  %v1685_v40 = vadd.f32 %v1662_v30, %v1661_v1  ;;  %v1700_v2 = vmul.f32 %v1662_v30, %v1662_v30 }
 0x19e   : > { %v1252_v48 = vpop.f32.mrf.mxu1  ;;  %v1348_v16 = vadd.f32 %v1332_v29, %v1265_v49 }
 0x19f   : > { %1979 = vst [vmem:[%s2501_s19] sm:$0xff] %v1978_v39   ;;  %v1707_v21 = vadd.f32 %v1700_v2, %v1699_v38  ;;  %v1266_v7 = vadd.f32 %v1252_v48, %v1144_v5  ;;  %v870_v5 = vadd.f32 %v2482_v56, %v743_v20  ;;  %v871_v56 = vadd.f32 %v2490_v60, %v745_v35 }
 0x1a0   : > { %v1524_v50 = vpop.f32.mrf.mxu3 }
 0x1a1   : > { %v1541_v43 = vadd.f32 %v1524_v50, %v1347_v63  ;;  %v952_v3 = vadd.f32 %v2492_v37, %v870_v5  ;;  %v953_v37 = vadd.f32 %v2494_v18, %v871_v56 }
 0x1a3   : > { %v1663_v46 = vadd.f32 %v1646_v28, %v1541_v43  ;;  %v1651_v55 = vpop.f32.mrf.mxu0  ;;  %v1146_v23 = vadd.f32 %v2480_v11, %v952_v3  ;;  %v1147_v24 = vadd.f32 %v2488_v59, %v953_v37 }
 0x1a5   : > { %v1686_v51 = vadd.f32 %v1685_v40, %v1663_v46  ;;  %v1701_v58 = vmul.f32 %v1663_v46, %v1663_v46  ;;  %v1335_v36 = vpop.f32.mrf.mxu2 }
 0x1a6   : > { %v1254_v10 = vpop.f32.mrf.mxu1  ;;  %v1349_v12 = vadd.f32 %v1335_v36, %v1266_v7 }
 0x1a7   : > { %v1708_v61 = vadd.f32 %v1707_v21, %v1701_v58  ;;  %v1267_v25 = vadd.f32 %v1254_v10, %v1145_v52 }
 0x1a8   : > { %v1526_v62 = vpop.f32.mrf.mxu3 }
 0x1a9   : > { %v1542_v0 = vadd.f32 %v1526_v62, %v1348_v16 }
 0x1ab   : > { %v1664_v4 = vadd.f32 %v1648_v42, %v1542_v0  ;;  %v1653_v28 = vpop.f32.mrf.mxu0 }
 0x1ad   : > { %v1983_v44 = vpack.c.bf16 %v1664_v4, %v1663_v46  ;;  %v1687_v41 = vadd.f32 %v1686_v51, %v1664_v4  ;;  %v1702_v8 = vmul.f32 %v1664_v4, %v1664_v4  ;;  %v1337_v15 = vpop.f32.mrf.mxu2 }
 0x1ae   : > { %v1350_v1 = vadd.f32 %v1337_v15, %v1267_v25  ;;  %v1257_v6 = vpop.f32.mrf.mxu1 }
 0x1af   : > { %1995 = vst [vmem:[%s2501_s19 + $0x8] sm:$0xff] %v1983_v44   ;;  %v1709_v13 = vadd.f32 %v1708_v61, %v1702_v8  ;;  %v1268_v34 = vadd.f32 %v1257_v6, %v1146_v23 }
 0x1b0   : > { %v1529_v17 = vpop.f32.mrf.mxu3 }
 0x1b1   : > { %v1543_v22 = vadd.f32 %v1529_v17, %v1349_v12 }
 0x1b3   : > { %v1665_v54 = vadd.f32 %v1651_v55, %v1543_v22  ;;  %v1656_v14 = vpop.f32.mrf.mxu0 }
 0x1b5   : > { %v1688_v26 = vadd.f32 %v1687_v41, %v1665_v54  ;;  %v1703_v31 = vmul.f32 %v1665_v54, %v1665_v54  ;;  %v1340_v57 = vpop.f32.mrf.mxu2 }
 0x1b6   : > { %v1351_v40 = vadd.f32 %v1340_v57, %v1268_v34  ;;  %v1259_v50 = vpop.f32.mrf.mxu1 }
 0x1b7   : > { %v1710_v32 = vadd.f32 %v1709_v13, %v1703_v31  ;;  %v1269_v43 = vadd.f32 %v1259_v50, %v1147_v24 }
 0x1b8   : > { %v1531_v27 = vpop.f32.mrf.mxu3 }
 0x1b9   : > { %v1544_v30 = vadd.f32 %v1531_v27, %v1350_v1 }
 0x1bb   : > { %v1666_v33 = vadd.f32 %v1653_v28, %v1544_v30  ;;  %v1658_v18 = vpop.f32.mrf.mxu0 }
 0x1bd   : > { %v1988_v29 = vpack.c.bf16 %v1666_v33, %v1665_v54  ;;  %v1689_v38 = vadd.f32 %v1688_v26, %v1666_v33  ;;  %v1704_v39 = vmul.f32 %v1666_v33, %v1666_v33  ;;  %v1342_v47 = vpop.f32.mrf.mxu2 }
 0x1be   : > { %v1352_v45 = vadd.f32 %v1342_v47, %v1269_v43 }
 0x1bf   : > { %1996 = vst [vmem:[%s2501_s19 + $0x10] sm:$0xff] %v1988_v29   ;;  %v1711_v2 = vadd.f32 %v1710_v32, %v1704_v39 }
 0x1c0   : > { %v1534_v63 = vpop.f32.mrf.mxu3 }
 0x1c1   : > { %v1545_v21 = vadd.f32 %v1534_v63, %v1351_v40 }
 0x1c3   : > { %v1667_v11 = vadd.f32 %v1656_v14, %v1545_v21 }
 0x1c5   : > { %v1690_v60 = vadd.f32 %v1689_v38, %v1667_v11  ;;  %v1705_v42 = vmul.f32 %v1667_v11, %v1667_v11 }
 0x1c7   : > { %v1712_v46 = vadd.f32 %v1711_v2, %v1705_v42 }
 0x1c8   : > { %v1536_v48 = vpop.f32.mrf.mxu3 }
 0x1c9   : > { %v1546_v49 = vadd.f32 %v1536_v48, %v1352_v45 }
 0x1cb   : > { %v1668_v51 = vadd.f32 %v1658_v18, %v1546_v49 }
 0x1cd   : > { %v1993_v58 = vpack.c.bf16 %v1668_v51, %v1667_v11  ;;  %v1691_v36 = vadd.f32 %v1690_v60, %v1668_v51  ;;  %v1706_v16 = vmul.f32 %v1668_v51, %v1668_v51 }
 0x1cf   : > { %1997 = vst [vmem:[%s2501_s19 + $0x18] sm:$0xff] %v1993_v58   ;;  %v1692_v61 = vrot.slane %v1691_v36, 4  ;;  %v1713_v62 = vadd.f32 %v1712_v46, %v1706_v16 }
 0x1d1   : > { %v1693_v59 = vadd.f32 %v1692_v61, %v1691_v36  ;;  %v1714_v0 = vrot.slane %v1713_v62, 4 }
 0x1d3   : > { %v1694_v53 = vrot.slane %v1693_v59, 2  ;;  %v1715_v4 = vadd.f32 %v1714_v0, %v1713_v62 }
 0x1d5   : > { %v1695_v19 = vadd.f32 %v1694_v53, %v1693_v59  ;;  %v1716_v55 = vrot.slane %v1715_v4, 2 }
 0x1d7   : > { %v1696_v7 = vrot.slane %v1695_v19, 1  ;;  %v1717_v44 = vadd.f32 %v1716_v55, %v1715_v4 }
 0x1d9   : > { %v1697_v41 = vadd.f32 %v1696_v7, %v1695_v19  ;;  %v1718_v8 = vrot.slane %v1717_v44, 1 }
 0x1db   : > { %1698 = vst [vmem:[%s211_s22] sm:$0x1] %v1697_v41  ;;  %v1719_v10 = vadd.f32 %v1718_v8, %v1717_v44 }
 0x1dd   : > { %1720 = vst [vmem:[%s214_s25] sm:$0x1] %v1719_v10 }
 0x1de PF: > { %s15_s15 = sadd.s32 1, %s2032_s15  }
 0x1df   : > { %p12_p4 = scmp.ge.s32.totalorder %s15_s15, 4  }
 0x1e1   :  { %14 = sbr.rel (!%p12_p4) target bundleno = 1 (0x1), region = 94 }

// kernel: down_forward.4
= control target key start
LH: loop header
LB: loop body
LE: loop exit
PB: predicated region body
PF: predicated region fallthrough
CT: control target
= control target key end

     0   :  { %s2924_s21 = smov 0   ;;  %s3689_s0 = inlined_call_operand.vmem [shape: bf16[2,64,128], index: 0, kind: input, shape index: {}]   ;;  %s3690_s1 = inlined_call_operand.vmem [shape: f32[1,128], index: 1, kind: input, shape index: {}]   ;;  %s3691_s2 = inlined_call_operand.vmem [shape: f32[1,128], index: 2, kind: input, shape index: {}]   ;;  %s3692_s3 = inlined_call_operand.vmem [shape: bf16[3,384,128], index: 3, kind: input, shape index: {}]   ;;  %s3693_s4 = inlined_call_operand.vmem [shape: bf16[2,64,128], index: 4, kind: output, shape index: {0}]   ;;  %s3694_s5 = inlined_call_operand.vmem [shape: f32[2,1,128], index: 5, kind: output, shape index: {1}]   ;;  %s3695_s6 = inlined_call_operand.vmem [shape: f32[2,1,128], index: 6, kind: output, shape index: {2}]  }
   0x1 LB: > { %s2258_s22 = sadd.s32 4294967295, %s2886_s21   ;;  %p2262_p0 = scmp.ge.s32.totalorder %s2886_s21, 1  ;;  %s2886_s21 = sphi %s2924_s21, %s17_s21  }
   0x2   : > { %p217_p1 = scmp.lt.s32.totalorder %s2886_s21, 3 }
   0x4   : > { %p218_p2 = pnand %p2262_p0, %p217_p1 }
   0x5   : > { %p253_p3 = scmp.lt.s32.totalorder (!%p218_p2), %s2258_s22, 1 }
   0x6   : > { %221 = sbr.rel (%p218_p2) target bundleno = 351 (0x15f), region = 36 }
   0xb   : > { %v2766_v0 = vld [vmem:[%s3692_s3 + $0xf8] sm:$0xff]  ;;  %v2765_v3 = vld [vmem:[%s3692_s3 + $0xf0] sm:$0xff]  ;;  %s3707_s22 = smov (!%p253_p3, %s2258_s22), 1  ;;  %v2888_v6 = vmov 0   ;;  %vm323_vm0 = vcmask 1040384   ;;  %v2764_v7 = vld [vmem:[%s3692_s3 + $0xe8] sm:$0xff] }
   0xc   : > { %v2782_v1 = vld [vmem:[%s3692_s3 + $0x178] sm:$0xff]  ;;  %1254 = vmatpush.bf16.msra.mxu0 %v2766_v0  ;;  %2853 = vmatpush.bf16.msra.mxu1 %v2766_v0  ;;  %v2781_v4 = vld [vmem:[%s3692_s3 + $0x170] sm:$0xff]  ;;  %318 = vst [vmem:[#allocation2] sm:$0xf] %v2888_v6  ;;  %s2725_s11 = sshll.u32 %s3707_s22, 5  ;;  %v2780_v8 = vld [vmem:[%s3692_s3 + $0x168] sm:$0xff]  ;;  %s265_s8 = scalar_lea.vmem %s3694_s5, %s3707_s22 }
   0xd   : > { %v2738_v2 = vld [vmem:[%s3692_s3 + $0x38] sm:$0xff]  ;;  %1312 = vmatpush.bf16.msra.mxu2 %v2782_v1  ;;  %v2737_v5 = vld [vmem:[%s3692_s3 + $0x30] sm:$0xff]  ;;  %319 = vst [vmem:[#allocation2 + $0x4] sm:$0xf] %v2888_v6  ;;  %s2958_s14 = scalar_lea.vmem %s3689_s0, %s2725_s11  ;;  %vm324_vm1 = vsmask.f32 256  ;;  %s3661_s30 = scalar_lea.vmem %s3693_s4, %s2725_s11 }
   0xe   : > { %1485 = vmatpush.bf16.msra.mxu3 %v2738_v2  ;;  %322 = vst [vmem:[#allocation2 + $0x4c] sm:$0xf] %v2888_v6  ;;  %vm356_vm2 = vsmask.f32 7938  ;;  %v2736_v9 = vld [vmem:[%s3692_s3 + $0x28] sm:$0xff]  ;;  %v2812_v10 = vld [vmem:[%s2958_s14] sm:$0xff]   ;;  %vm2984_vm3 = vmand %vm323_vm0, %vm324_vm1  ;;  %s268_s10 = scalar_lea.vmem %s3695_s6, %s3707_s22 }
   0xf   : > { %321 = vst [vmem:[#allocation2 + $0x48] sm:$0xf] %v2888_v6  ;;  %v2763_v11 = vld [vmem:[%s3692_s3 + $0xe0] sm:$0xff]  ;;  %v2813_v12 = vunpack.c.l.bf16 %v2812_v10  ;;  %v2814_v13 = vunpack.c.h.bf16 %v2812_v10  ;;  %v329_v17 = vld [vmem:[#allocation2 + $0x8] sm:$0x1]  ;;  %v2848_v24 = vld [vmem:[%s2958_s14 + $0x10] sm:$0xff]  }
  0x10   : > { %1255 = vmatpush.bf16.msra.mxu0 %v2765_v3  ;;  %2854 = vmatpush.bf16.msra.mxu1 %v2765_v3  ;;  %v2976_v14 = vld [vmem:[%s3690_s1] ss:$0 sm:$0xff]  ;;  %v332_v18 = vld [vmem:[#allocation2 + $0x10] sm:$0x1]  ;;  %v330_v22 = vsel %vm2984_vm3, 0, %v329_v17  ;;  %vm3003_vm4 = vmand %vm323_vm0, %vm356_vm2  ;;  %v2821_v28 = vunpack.c.l.bf16 %v2848_v24  ;;  %v2822_v29 = vunpack.c.h.bf16 %v2848_v24  ;;  %vm477_vm5 = vcmask 1043456  }
  0x11   : > { %1313 = vmatpush.bf16.msra.mxu2 %v2781_v4  ;;  %v2981_v15 = vld [vmem:[%s3691_s2] ss:$0 sm:$0xff]  ;;  %v290_v20 = vmul.f32 %v2976_v14, %v2813_v12  ;;  %v291_v21 = vmul.f32 %v2976_v14, %v2814_v13  ;;  %v333_v23 = vsel %vm2984_vm3, 0, %v332_v18  ;;  %v341_v25 = vld [vmem:[#allocation2 + $0x28] sm:$0x1]  ;;  %v2762_v35 = vld [vmem:[%s3692_s3 + $0xd8] sm:$0xff] }
  0x12   : > { %1486 = vmatpush.bf16.msra.mxu3 %v2737_v5  ;;  %v2779_v19 = vld [vmem:[%s3692_s3 + $0x160] sm:$0xff]  ;;  %331 = vst [vmem:[#allocation2 + $0x8] sm:$0x1] %v330_v22  ;;  %v342_v30 = vsel %vm2984_vm3, 0, %v341_v25  ;;  %v344_v31 = vld [vmem:[#allocation2 + $0x30] sm:$0x1]  ;;  %v294_v37 = vmul.f32 %v2976_v14, %v2821_v28  ;;  %v295_v38 = vmul.f32 %v2976_v14, %v2822_v29  ;;  %vm3044_vm6 = vmand %vm477_vm5, %vm356_vm2 }
  0x13   : > { %v2735_v26 = vld [vmem:[%s3692_s3 + $0x20] sm:$0xff]  ;;  %v302_v32 = vadd.f32 %v2981_v15, %v290_v20  ;;  %v303_v33 = vadd.f32 %v2981_v15, %v291_v21  ;;  %334 = vst [vmem:[#allocation2 + $0x10] sm:$0x1] %v333_v23  ;;  %v345_v34 = vsel %vm2984_vm3, 0, %v344_v31  ;;  %v2778_v36 = vld [vmem:[%s3692_s3 + $0x158] sm:$0xff]  ;;  %v2761_v54 = vld [vmem:[%s3692_s3 + $0xd0] sm:$0xff] }
  0x14   : > { %1256 = vmatpush.bf16.msra.mxu0 %v2764_v7  ;;  %2855 = vmatpush.bf16.msra.mxu1 %v2764_v7  ;;  %343 = vst [vmem:[#allocation2 + $0x28] sm:$0x1] %v342_v30  ;;  %v361_v39 = vld [vmem:[#allocation2 + $0xc] sm:$0x1]  ;;  %v2734_v40 = vld [vmem:[%s3692_s3 + $0x18] sm:$0xff]  ;;  %v306_v44 = vadd.f32 %v2981_v15, %v294_v37  ;;  %v307_v45 = vadd.f32 %v2981_v15, %v295_v38  ;;  %v2777_v59 = vld [vmem:[%s3692_s3 + $0x150] sm:$0xff] }
  0x15   : > { %1314 = vmatpush.bf16.msra.mxu2 %v2780_v8  ;;  %v310_v41 = vmax.f32 %v302_v32, 0.0  ;;  %v311_v42 = vmax.f32 %v303_v33, 0.0  ;;  %346 = vst [vmem:[#allocation2 + $0x30] sm:$0x1] %v345_v34  ;;  %v362_v43 = vsel %vm3003_vm4, 0, %v361_v39  ;;  %v2733_v60 = vld [vmem:[%s3692_s3 + $0x10] sm:$0xff] }
  0x16   : > { %1487 = vmatpush.bf16.msra.mxu3 %v2736_v9  ;;  %363 = vst [vmem:[#allocation2 + $0xc] sm:$0x1] %v362_v43  ;;  %v364_v46 = vld [vmem:[#allocation2 + $0x14] sm:$0x1]  ;;  %v326_v47 = vld [vmem:[#allocation2] sm:$0x1] }
  0x17   : > { %v388_v48 = vpack.c.bf16 %v310_v41, %v310_v41  ;;  %v389_v49 = vpack.c.bf16 %v311_v42, %v311_v42  ;;  %v365_v50 = vsel %vm3003_vm4, 0, %v364_v46  ;;  %v327_v51 = vsel %vm2984_vm3, 0, %v326_v47  ;;  %v2847_v63 = vld [vmem:[%s2958_s14 + $0x8] sm:$0xff]   ;;  %v2759_v28 = vld [vmem:[%s3692_s3 + $0xc0] sm:$0xff]  ;;  %v2774_v37 = vld [vmem:[%s3692_s3 + $0x138] sm:$0xff] }
  0x18   : > { %1257 = vmatpush.bf16.msra.mxu0 %v2763_v11  ;;  %2856 = vmatpush.bf16.msra.mxu1 %v2763_v11  ;;  %v314_v52 = vmax.f32 %v306_v44, 0.0  ;;  %v315_v53 = vmax.f32 %v307_v45, 0.0  ;;  %366 = vst [vmem:[#allocation2 + $0x14] sm:$0x1] %v365_v50  ;;  %v2817_v3 = vunpack.c.l.bf16 %v2847_v63  ;;  %v2818_v4 = vunpack.c.h.bf16 %v2847_v63  ;;  %v2760_v11 = vld [vmem:[%s3692_s3 + $0xc8] sm:$0xff]  ;;  %v2746_v38 = vld [vmem:[%s3692_s3 + $0x78] sm:$0xff] }
  0x19   : > { %1315 = vmatpush.bf16.msra.mxu2 %v2779_v19  ;;  %v397_v55 = vshrl.u32 %v388_v48, 16  ;;  %v400_v56 = vshll.u32 %v388_v48, 16  ;;  %v405_v57 = vshrl.u32 %v389_v49, 16  ;;  %v408_v58 = vshll.u32 %v389_v49, 16  ;;  %328 = vst [vmem:[#allocation2] sm:$0x1] %v327_v51 }
  0x1a   : > { %1488 = vmatpush.bf16.msra.mxu3 %v2735_v26  ;;  %v392_v61 = vpack.c.bf16 %v314_v52, %v314_v52  ;;  %v393_v62 = vpack.c.bf16 %v315_v53, %v315_v53  ;;  %v479_v2 = vld [vmem:[#allocation2 + $0x8] sm:$0xf]  ;;  %v485_v6 = vld [vmem:[#allocation2 + $0x10] sm:$0xf]  ;;  %vm682_vm7 = vcmask 1042432   ;;  %vm683_vm8 = vcmask 1046532  }
  0x1b   : > { %v399_v0 = vrot.slane %v397_v55, 7  ;;  %v407_v1 = vrot.slane %v405_v57, 7  ;;  %v2776_v20 = vld [vmem:[%s3692_s3 + $0x148] sm:$0xff]  ;;  %v292_v24 = vmul.f32 %v2976_v14, %v2817_v3  ;;  %v293_v25 = vmul.f32 %v2976_v14, %v2818_v4  ;;  %v2849_v26 = vld [vmem:[%s2958_s14 + $0x18] sm:$0xff]   ;;  %v2731_v41 = vld [vmem:[%s3692_s3] sm:$0xff] }
  0x1c   : > { %1258 = vmatpush.bf16.msra.mxu0 %v2762_v35  ;;  %2857 = vmatpush.bf16.msra.mxu1 %v2762_v35  ;;  %v429_v7 = vshrl.u32 %v392_v61, 16  ;;  %v432_v8 = vshll.u32 %v392_v61, 16  ;;  %v437_v9 = vshrl.u32 %v393_v62, 16  ;;  %v440_v10 = vshll.u32 %v393_v62, 16  ;;  %v2732_v21 = vld [vmem:[%s3692_s3 + $0x8] sm:$0xff]  ;;  %v2794_v51 = vld [vmem:[%s3692_s3 + $0x1b8] sm:$0xff]  ;;  %vm3139_vm9 = vmor %vm682_vm7, %vm683_vm8 }
  0x1d   : > { %1316 = vmatpush.bf16.msra.mxu2 %v2778_v36  ;;  %v402_v12 = vor.u32 %v400_v56, %v399_v0  ;;  %v403_v13 = vrot.slane %v399_v0, 4  ;;  %v410_v17 = vor.u32 %v408_v58, %v407_v1  ;;  %v411_v18 = vrot.slane %v407_v1, 4  ;;  %v482_v19 = vld [vmem:[#allocation2 + $0xc] sm:$0x1]  ;;  %v503_v31 = vld [vmem:[#allocation2 + $0x28] sm:$0xf] }
  0x1e   : > { %1489 = vmatpush.bf16.msra.mxu3 %v2734_v40  ;;  %v3057_v22 = vrot.slane %v429_v7, 7  ;;  %v3059_v23 = vrot.slane %v437_v9, 7  ;;  %v509_v32 = vld [vmem:[#allocation2 + $0x30] sm:$0xf]  ;;  %v335_v39 = vld [vmem:[#allocation2 + $0x18] sm:$0x1]  ;;  %v304_v43 = vadd.f32 %v2981_v15, %v292_v24  ;;  %v305_v44 = vadd.f32 %v2981_v15, %v293_v25 }
  0x1f   : > { %v480_v29 = vsel %vm3044_vm6, %v402_v12, %v479_v2  ;;  %v486_v30 = vsel %vm3044_vm6, %v410_v17, %v485_v6  ;;  %v483_v33 = vsel %vm2984_vm3, %v403_v13, %v482_v19  ;;  %v488_v34 = vld [vmem:[#allocation2 + $0x14] sm:$0x1]  ;;  %v2775_v40 = vld [vmem:[%s3692_s3 + $0x140] sm:$0xff]  ;;  %v2825_v48 = vunpack.c.l.bf16 %v2849_v26  ;;  %v3095_v49 = vld [vmem:[#allocation2 + $0x38] sm:$0x1] }
  0x20   : > { %1259 = vmatpush.bf16.msra.mxu0 %v2761_v54  ;;  %2858 = vmatpush.bf16.msra.mxu1 %v2761_v54  ;;  %481 = vst [vmem:[#allocation2 + $0x8] sm:$0xf] %v480_v29  ;;  %v434_v35 = vor.u32 %v432_v8, %v3057_v22  ;;  %v442_v36 = vor.u32 %v440_v10, %v3059_v23  ;;  %v338_v45 = vld [vmem:[#allocation2 + $0x20] sm:$0x1]  ;;  %v312_v52 = vmax.f32 %v304_v43, 0.0  ;;  %v313_v53 = vmax.f32 %v305_v44, 0.0 }
  0x21   : > { %1317 = vmatpush.bf16.msra.mxu2 %v2777_v59  ;;  %487 = vst [vmem:[#allocation2 + $0x10] sm:$0xf] %v486_v30  ;;  %v489_v42 = vsel %vm2984_vm3, %v411_v18, %v488_v34  ;;  %v3097_v50 = vld [vmem:[#allocation2 + $0x40] sm:$0x1]  ;;  %v336_v54 = vsel %vm2984_vm3, 0, %v335_v39  ;;  %v2826_v55 = vunpack.c.h.bf16 %v2849_v26  ;;  %v435_v56 = vrot.slane %v3057_v22, 4 }
  0x22   : > { %1490 = vmatpush.bf16.msra.mxu3 %v2733_v60  ;;  %v504_v46 = vsel %vm3044_vm6, %v434_v35, %v503_v31  ;;  %v510_v47 = vsel %vm3044_vm6, %v442_v36, %v509_v32  ;;  %484 = vst [vmem:[#allocation2 + $0xc] sm:$0x1] %v483_v33  ;;  %v443_v57 = vrot.slane %v3059_v23, 4  ;;  %v2773_v58 = vld [vmem:[%s3692_s3 + $0x130] sm:$0xff]  ;;  %v296_v59 = vmul.f32 %v2976_v14, %v2825_v48  ;;  %v3110_v60 = vld [vmem:[#allocation2 + $0x1c] sm:$0x1] }
  0x23   : > { %505 = vst [vmem:[#allocation2 + $0x28] sm:$0xf] %v504_v46  ;;  %v2277_v61 = vld [vmem:[#allocation2] sm:$0xf]  ;;  %v390_v62 = vpack.c.bf16 %v312_v52, %v312_v52  ;;  %v297_v63 = vmul.f32 %v2976_v14, %v2826_v55  ;;  %v3113_v0 = vld [vmem:[#allocation2 + $0x24] sm:$0x1]  ;;  %v3120_v3 = vpack.c.bf16 %v313_v53, %v313_v53 }
  0x24   : > { %1260 = vmatpush.bf16.msra.mxu0 %v2760_v11  ;;  %2859 = vmatpush.bf16.msra.mxu1 %v2760_v11  ;;  %511 = vst [vmem:[#allocation2 + $0x30] sm:$0xf] %v510_v47  ;;  %v2745_v1 = vld [vmem:[%s3692_s3 + $0x70] sm:$0xff]  ;;  %v339_v2 = vsel %vm2984_vm3, 0, %v338_v45  ;;  %v348_v4 = vsel %vm2984_vm3, 0, %v3095_v49  ;;  %v351_v14 = vsel %vm2984_vm3, 0, %v3097_v50  ;;  %v308_v9 = vadd.f32 %v2981_v15, %v296_v59 }
  0x25   : > { %1318 = vmatpush.bf16.msra.mxu2 %v2776_v20  ;;  %490 = vst [vmem:[#allocation2 + $0x14] sm:$0x1] %v489_v42  ;;  %v309_v10 = vadd.f32 %v2981_v15, %v297_v63  ;;  %v2793_v11 = vld [vmem:[%s3692_s3 + $0x1b0] sm:$0xff]  ;;  %v3133_v12 = vld [vmem:[#allocation2 + $0x4] sm:$0x1]  ;;  %v413_v20 = vshrl.u32 %v390_v62, 16 }
  0x26   : > { %1491 = vmatpush.bf16.msra.mxu3 %v2732_v21  ;;  %337 = vst [vmem:[#allocation2 + $0x18] sm:$0x1] %v336_v54  ;;  %v3135_v21 = vld [vmem:[#allocation2 + $0x2c] sm:$0x1]  ;;  %v368_v29 = vsel %vm3003_vm4, 0, %v3110_v60  ;;  %v421_v33 = vshrl.u32 %v3120_v3, 16 }
  0x27   : > { %v2301_v6 = vld [vmem:[#allocation2 + $0x8] sm:$0xf]  ;;  %340 = vst [vmem:[#allocation2 + $0x20] sm:$0x1] %v339_v2  ;;  %v3152_v32 = vrot.slane %v413_v20, 7  ;;  %v371_v34 = vsel %vm3003_vm4, 0, %v3113_v0 }
  0x28   : > { %1261 = vmatpush.bf16.msra.mxu0 %v2759_v28  ;;  %2860 = vmatpush.bf16.msra.mxu1 %v2759_v28  ;;  %v949_v7 = vld [vmem:[#allocation2 + $0x8] sm:$0xe]  ;;  %v2755_v13 = vld [vmem:[#allocation2 + $0xc] sm:$0xf0]  ;;  %v416_v28 = vshll.u32 %v390_v62, 16  ;;  %v317_v39 = vmax.f32 %v309_v10, 0.0 }
  0x29   : > { %1319 = vmatpush.bf16.msra.mxu2 %v2775_v40  ;;  %v2727_v8 = vld [vmem:[#allocation2 + $0x4] sm:$0xf0]  ;;  %v950_v17 = vld [vmem:[#allocation2 + $0x10] sm:$0xe]  ;;  %v2291_v18 = vrot.slane %v949_v7, 9  ;;  %v2302_v24 = vor.u32 %v2755_v13, %v2301_v6  ;;  %v359_v45 = vsel %vm3003_vm4, 0, %v3133_v12 }
  0x2a   : > { %1492 = vmatpush.bf16.msra.mxu3 %v2731_v41  ;;  %v2278_v19 = vor.u32 %v2727_v8, %v2277_v61  ;;  %v3143_v15 = vld [vmem:[#allocation2 + $0xc] sm:$0x1]  ;;  %v2309_v30 = vld [vmem:[#allocation2 + $0x28] sm:$0xf]  ;;  %v2292_v36 = vrot.slane %v950_v17, 9  ;;  %v418_v44 = vor.u32 %v416_v28, %v3152_v32  ;;  %v3168_v47 = vrot.slane %v421_v33, 7 }
  0x2b   : > { %v2772_v26 = vld [vmem:[%s3692_s3 + $0x128] sm:$0xff]  ;;  %v975_v31 = vrot.slane %v3143_v15, 5  ;;  %1262 = vmatmul.bf16.vlgmr.msra.gmra.mxu0 %v2302_v24  ;;  %v2757_v35 = vld [vmem:[#allocation2 + $0x2c] sm:$0xf0]  ;;  %349 = vst [vmem:[#allocation2 + $0x38] sm:$0x1] %v348_v4  ;;  %v395_v54 = vpack.c.bf16 %v317_v39, %v317_v39 }
  0x2c   : > { %1283 = vmatpush.bf16.msrb.mxu1 %v2774_v37  ;;  %1514 = vmatpush.bf16.msrb.mxu0 %v2746_v38  ;;  %v424_v37 = vshll.u32 %v3120_v3, 16  ;;  %v316_v38 = vmax.f32 %v308_v9, 0.0  ;;  %v2310_v40 = vor.u32 %v2757_v35, %v2309_v30  ;;  %v830_v41 = vld [vmem:[#allocation2 + $0x14] sm:$0x1]  ;;  %v2744_v43 = vld [vmem:[%s3692_s3 + $0x68] sm:$0xff]  ;;  %v2802_v49 = vld [vmem:[%s3692_s3 + $0x1f8] sm:$0xff] }
  0x2d   : > { %2006 = vmatpush.bf16.msrb.mxu2 %v2794_v51  ;;  %1493 = vmatmul.bf16.vlgmr.msra.gmra.mxu3 %v2278_v19  ;;  %v976_v42 = vsel %vm3139_vm9, %v2291_v18, %v975_v31  ;;  %v979_v46 = vrot.slane %v830_v41, 5  ;;  %v491_v48 = vld [vmem:[#allocation2 + $0x18] sm:$0xf]  ;;  %v374_v50 = vsel %vm3003_vm4, 0, %v3135_v21  ;;  %352 = vst [vmem:[#allocation2 + $0x40] sm:$0x1] %v351_v14 }
  0x2e   : > { %1272 = vmatmul.bf16.vlgmr.msra.gmra.mxu1 %v2310_v40  ;;  %v1045_v51 = vunpack.c.l.b16 %v976_v42  ;;  %v492_v52 = vsel %vm3044_vm6, %v418_v44, %v491_v48  ;;  %v394_v53 = vpack.c.bf16 %v316_v38, %v316_v38  ;;  %v2792_v55 = vld [vmem:[%s3692_s3 + $0x1a8] sm:$0xff]  ;;  %v861_v59 = vshll.u32 %v830_v41, 16  ;;  %v2771_v61 = vld [vmem:[%s3692_s3 + $0x120] sm:$0xff]  ;;  %2035 = vmatpush.bf16.msrb.mxu3 %v2802_v49  ;;  %v2770_v9 = vld [vmem:[%s3692_s3 + $0x118] sm:$0xff]  ;;  %369 = vst [vmem:[#allocation2 + $0x1c] sm:$0x1] %v368_v29 }
  0x2f   : > { %v980_v60 = vsel %vm3139_vm9, %v2292_v36, %v979_v46  ;;  %v426_v62 = vor.u32 %v424_v37, %v3168_v47  ;;  %493 = vst [vmem:[#allocation2 + $0x18] sm:$0xf] %v492_v52  ;;  %v2743_v0 = vld [vmem:[%s3692_s3 + $0x60] sm:$0xff]  ;;  %v453_v4 = vshrl.u32 %v395_v54, 16  ;;  %v419_v14 = vrot.slane %v3152_v32, 4  ;;  %v2742_v13 = vld [vmem:[%s3692_s3 + $0x58] sm:$0xff] }
  0x30   : > { %1284 = vmatpush.bf16.msrb.mxu1 %v2773_v58  ;;  %1515 = vmatpush.bf16.msrb.mxu0 %v2745_v1  ;;  %v847_v58 = vshll.u32 %v3143_v15, 16  ;;  %v1046_v63 = vunpack.c.l.b16 %v980_v60  ;;  %v497_v1 = vld [vmem:[#allocation2 + $0x20] sm:$0xf]  ;;  %v445_v2 = vshrl.u32 %v394_v53, 16  ;;  %v448_v3 = vshll.u32 %v394_v53, 16  ;;  %v2769_v37 = vld [vmem:[%s3692_s3 + $0x110] sm:$0xff] }
  0x31   : > { %2007 = vmatpush.bf16.msrb.mxu2 %v2793_v11  ;;  %v427_v6 = vrot.slane %v3168_v47, 4  ;;  %v498_v7 = vsel %vm3044_vm6, %v426_v62, %v497_v1  ;;  %v456_v8 = vshll.u32 %v395_v54, 16  ;;  %v3200_v12 = vrot.slane %v453_v4, 7  ;;  %v2281_v17 = vld [vmem:[#allocation2 + $0x10] sm:$0xf]  ;;  %v2740_v62 = vld [vmem:[%s3692_s3 + $0x48] sm:$0xff] }
  0x32   : > { %v1053_v10 = vpack.c.b16 %v1046_v63, %v1045_v51  ;;  %499 = vst [vmem:[#allocation2 + $0x20] sm:$0xf] %v498_v7  ;;  %v3198_v11 = vrot.slane %v445_v2, 7  ;;  %vm543_vm10 = vsmask.f32 3328  ;;  %v3209_v28 = vrot.slane %v861_v59, 5 }
  0x33   : > { %v515_v18 = vld [vmem:[#allocation2 + $0x38] sm:$0xf]  ;;  %372 = vst [vmem:[#allocation2 + $0x24] sm:$0x1] %v371_v34  ;;  %v821_v19 = vld [vmem:[#allocation2 + $0x8] sm:$0xf]  ;;  %v458_v24 = vor.u32 %v456_v8, %v3200_v12 }
  0x34   : > { %1285 = vmatpush.bf16.msrb.mxu1 %v2772_v26  ;;  %1516 = vmatpush.bf16.msrb.mxu0 %v2744_v43  ;;  %v450_v20 = vor.u32 %v448_v3, %v3198_v11  ;;  %v822_v15 = vld [vmem:[#allocation2 + $0x10] sm:$0xf]  ;;  %v3207_v26 = vrot.slane %v847_v58, 5  ;;  %360 = vst [vmem:[#allocation2 + $0x4] sm:$0x1] %v359_v45  ;;  %v838_v30 = vshrl.u32 %v821_v19, 16 }
  0x35   : > { %2008 = vmatpush.bf16.msrb.mxu2 %v2792_v55  ;;  %v521_v29 = vld [vmem:[#allocation2 + $0x40] sm:$0xf]  ;;  %v841_v31 = vshll.u32 %v821_v19, 16  ;;  %v852_v32 = vshrl.u32 %v822_v15, 16  ;;  %v855_v33 = vshll.u32 %v822_v15, 16  ;;  %v451_v34 = vrot.slane %v3198_v11, 4 }
  0x36   : > { %1320 = vmatmul.bf16.vlgmr.msra.gmra.mxu2 %v1053_v10  ;;  %v516_v35 = vsel %vm3044_vm6, %v450_v20, %v515_v18  ;;  %v522_v36 = vsel %vm3044_vm6, %v458_v24, %v521_v29  ;;  %v2728_v38 = vld [vmem:[#allocation2 + $0x14] sm:$0xf0]  ;;  %vm544_vm11 = vsmask.f32 7440  ;;  %v2741_v41 = vld [vmem:[%s3692_s3 + $0x50] sm:$0xff]  ;;  %v840_v42 = vrot.slane %v838_v30, 4 }
  0x37   : > { %v2305_v39 = vld [vmem:[#allocation2 + $0x18] sm:$0xf]  ;;  %517 = vst [vmem:[#allocation2 + $0x38] sm:$0xf] %v516_v35  ;;  %v2282_v40 = vor.u32 %v2728_v38, %v2281_v17  ;;  %v843_v43 = vrot.slane %v841_v31, 5  ;;  %v854_v44 = vrot.slane %v852_v32, 4  ;;  %vm3249_vm12 = vmor %vm543_vm10, %vm544_vm11 }
  0x38   : > { %1286 = vmatpush.bf16.msrb.mxu1 %v2771_v61  ;;  %1517 = vmatpush.bf16.msrb.mxu0 %v2743_v0  ;;  %523 = vst [vmem:[#allocation2 + $0x40] sm:$0xf] %v522_v36  ;;  %v494_v5 = vld [vmem:[#allocation2 + $0x1c] sm:$0x1]  ;;  %v857_v45 = vrot.slane %v855_v33, 5  ;;  %v2768_v51 = vld [vmem:[%s3692_s3 + $0x108] sm:$0xff] }
  0x39   : > { %v2756_v46 = vld [vmem:[#allocation2 + $0x1c] sm:$0xf0]  ;;  %v495_v48 = vsel %vm2984_vm3, %v419_v14, %v494_v5  ;;  %v3224_v49 = vld [vmem:[#allocation2 + $0x18] sm:$0xe]  ;;  %v844_v52 = vor.u32 %v843_v43, %v840_v42  ;;  %v459_v55 = vrot.slane %v3200_v12, 4  ;;  %v2801_v18 = vld [vmem:[%s3692_s3 + $0x1f0] sm:$0xff] }
  0x3a   : > { %v527_v53 = vld [vmem:[#allocation2] sm:$0xf]  ;;  %v2306_v54 = vor.u32 %v2756_v46, %v2305_v39  ;;  %496 = vst [vmem:[#allocation2 + $0x1c] sm:$0x1] %v495_v48  ;;  %v500_v58 = vld [vmem:[#allocation2 + $0x24] sm:$0x1]  ;;  %v858_v59 = vor.u32 %v857_v45, %v854_v44  ;;  %2036 = vmatpush.bf16.msrb.mxu3 %v2801_v18 }
  0x3b   : > { %v547_v60 = vshrl.u32 %v527_v53, 16  ;;  %v501_v61 = vsel %vm2984_vm3, %v427_v6, %v500_v58  ;;  %v845_v63 = vrot.slane %v844_v52, 4  ;;  %v528_v0 = vld [vmem:[#allocation2 + $0x8] sm:$0xf]  ;;  %v3237_v1 = vld [vmem:[#allocation2 + $0x4] sm:$0x1] }
  0x3c   : > { %1287 = vmatpush.bf16.msrb.mxu1 %v2770_v9  ;;  %1518 = vmatpush.bf16.msrb.mxu0 %v2742_v13  ;;  %v550_v2 = vshll.u32 %v527_v53, 16  ;;  %502 = vst [vmem:[#allocation2 + $0x24] sm:$0x1] %v501_v61  ;;  %v3239_v3 = vld [vmem:[#allocation2 + $0x20] sm:$0xe]  ;;  %v859_v4 = vrot.slane %v858_v59, 4 }
  0x3d   : > { %1498 = vmatmul.bf16.gmra.mxu3 %v2282_v40  ;;  %1267 = vmatmul.bf16.gmra.mxu0 %v2306_v54  ;;  %v3241_v14 = vld [vmem:[#allocation2 + $0xc] sm:$0x1]  ;;  %v549_v47 = vrot.slane %v547_v60, 4  ;;  %v376_v7 = vld [vmem:[#allocation2 + $0x34] sm:$0x1]  ;;  %v2293_v6 = vrot.slane %v3224_v49, 9 }
  0x3e   : > { %v2767_v8 = vld [vmem:[%s3692_s3 + $0x100] sm:$0xff]  ;;  %v552_v10 = vrot.slane %v550_v2, 5  ;;  %v556_v13 = vshll.u32 %v3237_v1, 16  ;;  %v561_v17 = vshrl.u32 %v528_v0, 16  ;;  %v2313_v20 = vld [vmem:[#allocation2 + $0x38] sm:$0xf]  ;;  %v864_v21 = vsel %vm3249_vm12, %v859_v4, %v3209_v28 }
  0x3f   : > { %v2791_v19 = vld [vmem:[%s3692_s3 + $0x1a0] sm:$0xff]  ;;  %v564_v24 = vshll.u32 %v528_v0, 16  ;;  %v570_v15 = vshll.u32 %v3241_v14, 16  ;;  %375 = vst [vmem:[#allocation2 + $0x2c] sm:$0x1] %v374_v50  ;;  %v2754_v38 = vld [vmem:[%s3692_s3 + $0xb8] sm:$0xff] }
  0x40   : > { %1288 = vmatpush.bf16.msrb.mxu1 %v2769_v37  ;;  %1519 = vmatpush.bf16.msrb.mxu0 %v2741_v41  ;;  %v2758_v29 = vld [vmem:[#allocation2 + $0x3c] sm:$0xf0]  ;;  %v553_v30 = vor.u32 %v552_v10, %v549_v47  ;;  %v558_v31 = vrot.slane %v556_v13, 5  ;;  %v563_v32 = vrot.slane %v561_v17, 4  ;;  %v3265_v33 = vld [vmem:[#allocation2 + $0x28] sm:$0xe]  ;;  %v850_v37 = vsel %vm3249_vm12, %v845_v63, %v3207_v26 }
  0x41   : > { %v2314_v35 = vor.u32 %v2758_v29, %v2313_v20  ;;  %v2739_v36 = vld [vmem:[%s3692_s3 + $0x40] sm:$0xff]  ;;  %v566_v50 = vrot.slane %v564_v24, 5  ;;  %2009 = vmatpush.bf16.msrb.mxu2 %v2791_v19  ;;  %v2800_v39 = vld [vmem:[%s3692_s3 + $0x1e8] sm:$0xff]  ;;  %v831_v40 = vld [vmem:[#allocation2 + $0x1c] sm:$0x1]  ;;  %v2294_v41 = vrot.slane %v3239_v3, 9  ;;  %v3294_v49 = vunpack.c.l.b16 %v850_v37 }
  0x42   : > { %v554_v42 = vrot.slane %v553_v30, 4  ;;  %v377_v26 = vsel %vm3003_vm4, 0, %v376_v7  ;;  %v2790_v28 = vld [vmem:[%s3692_s3 + $0x198] sm:$0xff]  ;;  %v983_v43 = vrot.slane %v831_v40, 5  ;;  %v572_v44 = vrot.slane %v570_v15, 5  ;;  %2037 = vmatpush.bf16.msrb.mxu3 %v2800_v39  ;;  %v2752_v19 = vld [vmem:[%s3692_s3 + $0xa8] sm:$0xff] }
  0x43   : > { %1277 = vmatmul.bf16.gmra.mxu1 %v2314_v35  ;;  %v567_v5 = vor.u32 %v566_v50, %v563_v32  ;;  %378 = vst [vmem:[#allocation2 + $0x34] sm:$0x1] %v377_v26  ;;  %v2295_v45 = vrot.slane %v3265_v33, 9  ;;  %v3292_v46 = vld [vmem:[%s3692_s3 + $0x238] sm:$0xff]  ;;  %v832_v48 = vld [vmem:[#allocation2 + $0x24] sm:$0x1] }
  0x44   : > { %1289 = vmatpush.bf16.msrb.mxu1 %v2768_v51  ;;  %1520 = vmatpush.bf16.msrb.mxu0 %v2740_v62  ;;  %v3296_v51 = vunpack.c.l.b16 %v864_v21  ;;  %v559_v52 = vsel %vm3249_vm12, %v554_v42, %v558_v31  ;;  %v2285_v53 = vld [vmem:[#allocation2 + $0x20] sm:$0xf]  ;;  %v2729_v54 = vld [vmem:[#allocation2 + $0x24] sm:$0xf0]  ;;  %v984_v58 = vsel %vm3139_vm9, %v2293_v6, %v983_v43  ;;  %v987_v59 = vrot.slane %v832_v48, 5  ;;  %v2753_v62 = vld [vmem:[%s3692_s3 + $0xb0] sm:$0xff] }
  0x45   : > { %v568_v60 = vrot.slane %v567_v5, 4  ;;  %v741_v61 = vunpack.c.l.b16 %v559_v52  ;;  %2010 = vmatpush.bf16.msrb.mxu2 %v2790_v28  ;;  %v823_v63 = vld [vmem:[#allocation2 + $0x18] sm:$0xf]  ;;  %v1047_v0 = vunpack.c.l.b16 %v984_v58  ;;  %v2286_v3 = vor.u32 %v2729_v54, %v2285_v53  ;;  %v824_v4 = vld [vmem:[#allocation2 + $0x20] sm:$0xf]  ;;  %v2789_v37 = vld [vmem:[%s3692_s3 + $0x190] sm:$0xff] }
  0x46   : > { %v506_v2 = vld [vmem:[#allocation2 + $0x2c] sm:$0x1]  ;;  %v866_v47 = vshrl.u32 %v823_v63, 16  ;;  %v869_v7 = vshll.u32 %v823_v63, 16  ;;  %v988_v6 = vsel %vm3139_vm9, %v2294_v41, %v987_v59  ;;  %v875_v13 = vshll.u32 %v831_v40, 16  ;;  %v3332_v41 = vld [vmem:[%s3692_s3 + $0x230] sm:$0xff] }
  0x47   : > { %v507_v10 = vsel %vm2984_vm3, %v435_v56, %v506_v2  ;;  %v529_v17 = vld [vmem:[#allocation2 + $0x10] sm:$0xf]  ;;  %v3314_v18 = vld [vmem:[#allocation2 + $0x14] sm:$0x1]  ;;  %v1048_v20 = vunpack.c.l.b16 %v988_v6  ;;  %v530_v30 = vld [vmem:[#allocation2 + $0x18] sm:$0xf]  ;;  %v1037_v63 = vpack.c.b16 %v3296_v51, %v3294_v49 }
  0x48   : > { %1290 = vmatpush.bf16.msrb.mxu1 %v2767_v8  ;;  %1521 = vmatpush.bf16.msrb.mxu0 %v2739_v36  ;;  %v573_v8 = vsel %vm3249_vm12, %v568_v60, %v572_v44  ;;  %508 = vst [vmem:[#allocation2 + $0x2c] sm:$0x1] %v507_v10  ;;  %v868_v15 = vrot.slane %v866_v47, 4  ;;  %v871_v29 = vrot.slane %v869_v7, 5  ;;  %v3319_v22 = vld [vmem:[#allocation2 + $0x1c] sm:$0x1] }
  0x49   : > { %v742_v24 = vunpack.c.l.b16 %v573_v8  ;;  %v3321_v56 = vrot.slane %v875_v13, 5  ;;  %v880_v31 = vshrl.u32 %v824_v4, 16  ;;  %v883_v32 = vshll.u32 %v824_v4, 16  ;;  %v2799_v36 = vld [vmem:[%s3692_s3 + $0x1e0] sm:$0xff]  ;;  %v379_v42 = vld [vmem:[#allocation2 + $0x3c] sm:$0x1]  ;;  %2011 = vmatpush.bf16.msrb.mxu2 %v2789_v37 }
  0x4a   : > { %v889_v35 = vshll.u32 %v832_v48, 16  ;;  %v1054_v21 = vpack.c.b16 %v1048_v20, %v1047_v0  ;;  %v872_v39 = vor.u32 %v871_v29, %v868_v15  ;;  %v575_v40 = vshrl.u32 %v529_v17, 16  ;;  %v382_v44 = vld [vmem:[#allocation2 + $0x44] sm:$0x1]  ;;  %v3340_v48 = vld [vmem:[#allocation2 + $0x30] sm:$0xe]  ;;  %2038 = vmatpush.bf16.msrb.mxu3 %v2799_v36 }
  0x4b   : > { %v749_v50 = vpack.c.b16 %v742_v24, %v741_v61  ;;  %v882_v28 = vrot.slane %v880_v31, 4  ;;  %v885_v43 = vrot.slane %v883_v32, 5  ;;  %v578_v53 = vshll.u32 %v529_v17, 16  ;;  %v2798_v23 = vld [vmem:[%s3692_s3 + $0x1d8] sm:$0xff]  ;;  %v3357_v4 = vld [vmem:[#allocation2 + $0x40] sm:$0xe] }
  0x4c   : > { %1543 = vmatpush.bf16.msra.mxu1 %v2754_v38  ;;  %2064 = vmatpush.bf16.msra.mxu0 %v3292_v46  ;;  %v512_v38 = vld [vmem:[#allocation2 + $0x34] sm:$0x1]  ;;  %v3338_v5 = vrot.slane %v889_v35, 5  ;;  %v577_v52 = vrot.slane %v575_v40, 4  ;;  %v584_v54 = vshll.u32 %v3314_v18, 16  ;;  %v589_v58 = vshrl.u32 %v530_v30, 16 }
  0x4d   : > { %v513_v26 = vsel %vm2984_vm3, %v443_v57, %v512_v38  ;;  %1503 = vmatmul.bf16.gmra.mxu3 %v2286_v3  ;;  %1325 = vmatmul.bf16.gmra.mxu2 %v1054_v21  ;;  %v886_v57 = vor.u32 %v885_v43, %v882_v28  ;;  %v592_v59 = vshll.u32 %v530_v30, 16  ;;  %v598_v60 = vshll.u32 %v3319_v22, 16  ;;  %v3347_v61 = vld [vmem:[#allocation2 + $0x38] sm:$0xe]  ;;  %v2788_v47 = vld [vmem:[%s3692_s3 + $0x188] sm:$0xff] }
  0x4e   : > { %514 = vst [vmem:[#allocation2 + $0x34] sm:$0x1] %v513_v26  ;;  %1522 = vmatmul.bf16.vlgmr.msrb.gmra.mxu0 %v749_v50  ;;  %v873_v0 = vrot.slane %v872_v39, 4  ;;  %v580_v2 = vrot.slane %v578_v53, 5  ;;  %v380_v3 = vsel %vm3003_vm4, 0, %v379_v42  ;;  %v586_v8 = vrot.slane %v584_v54, 5  ;;  %2039 = vmatpush.bf16.msrb.mxu3 %v2798_v23 }
  0x4f   : > { %v3362_v7 = vld [vmem:[#allocation2 + $0x2c] sm:$0x1]  ;;  %v887_v6 = vrot.slane %v886_v57, 4  ;;  %v591_v10 = vrot.slane %v589_v58, 4  ;;  %v594_v13 = vrot.slane %v592_v59, 5  ;;  %v383_v17 = vsel %vm3003_vm4, 0, %v382_v44  ;;  %2012 = vmatpush.bf16.msrb.mxu2 %v2788_v47 }
  0x50   : > { %1544 = vmatpush.bf16.msra.mxu1 %v2753_v62  ;;  %v2751_v62 = vld [vmem:[%s3692_s3 + $0xa0] sm:$0xff]  ;;  %2065 = vmatpush.bf16.msra.mxu0 %v3332_v41  ;;  %v991_v49 = vrot.slane %v3362_v7, 5  ;;  %v581_v51 = vor.u32 %v580_v2, %v577_v52  ;;  %381 = vst [vmem:[#allocation2 + $0x3c] sm:$0x1] %v380_v3  ;;  %v3373_v20 = vld [vmem:[%s3692_s3 + $0x228] sm:$0xff]  ;;  %v2296_v24 = vrot.slane %v3340_v48, 9  ;;  %v878_v50 = vsel %vm3249_vm12, %v873_v0, %v3321_v56 }
  0x51   : > { %v595_v15 = vor.u32 %v594_v13, %v591_v10  ;;  %v600_v29 = vrot.slane %v598_v60, 5  ;;  %384 = vst [vmem:[#allocation2 + $0x44] sm:$0x1] %v383_v17  ;;  %v2297_v30 = vrot.slane %v3347_v61, 9  ;;  %v2298_v35 = vrot.slane %v3357_v4, 9  ;;  %v2796_v43 = vld [vmem:[%s3692_s3 + $0x1c8] sm:$0xff] }
  0x52   : > { %v992_v31 = vsel %vm3139_vm9, %v2295_v45, %v991_v49  ;;  %v582_v32 = vrot.slane %v581_v51, 4  ;;  %v2289_v36 = vld [vmem:[#allocation2 + $0x30] sm:$0xf]  ;;  %v825_v37 = vld [vmem:[#allocation2 + $0x28] sm:$0xf]  ;;  %v892_v33 = vsel %vm3249_vm12, %v887_v6, %v3338_v5  ;;  %v903_v52 = vshll.u32 %v3362_v7, 16 }
  0x53   : > { %1291 = vmatmul.bf16.vlgmr.msrb.gmra.mxu1 %v1037_v63  ;;  %v596_v38 = vrot.slane %v595_v15, 4  ;;  %v826_v45 = vld [vmem:[#allocation2 + $0x30] sm:$0xf]  ;;  %v894_v39 = vshrl.u32 %v825_v37, 16  ;;  %v1049_v42 = vunpack.c.l.b16 %v992_v31  ;;  %v2730_v28 = vld [vmem:[#allocation2 + $0x34] sm:$0xf0]  ;;  %v3408_v0 = vunpack.c.l.b16 %v878_v50 }
  0x54   : > { %1545 = vmatpush.bf16.msra.mxu1 %v2752_v19  ;;  %v2797_v19 = vld [vmem:[%s3692_s3 + $0x1d0] sm:$0xff]  ;;  %2066 = vmatpush.bf16.msra.mxu0 %v3373_v20  ;;  %v587_v26 = vsel %vm3249_vm12, %v582_v32, %v586_v8  ;;  %v897_v56 = vshll.u32 %v825_v37, 16  ;;  %v531_v53 = vld [vmem:[#allocation2 + $0x20] sm:$0xf]  ;;  %v908_v58 = vshrl.u32 %v826_v45, 16  ;;  %v2750_v60 = vld [vmem:[%s3692_s3 + $0x98] sm:$0xff]  ;;  %v2290_v3 = vor.u32 %v2730_v28, %v2289_v36 }
  0x55   : > { %v3383_v21 = vld [vmem:[#allocation2 + $0x34] sm:$0x1]  ;;  %2040 = vmatpush.bf16.msrb.mxu3 %v2797_v19  ;;  %v601_v44 = vsel %vm3249_vm12, %v596_v38, %v600_v29  ;;  %v743_v5 = vunpack.c.l.b16 %v587_v26  ;;  %v896_v48 = vrot.slane %v894_v39, 4  ;;  %v532_v59 = vld [vmem:[#allocation2 + $0x28] sm:$0xf]  ;;  %v911_v47 = vshll.u32 %v826_v45, 16 }
  0x56   : > { %v995_v40 = vrot.slane %v3383_v21, 5  ;;  %v744_v23 = vunpack.c.l.b16 %v601_v44  ;;  %v899_v57 = vrot.slane %v897_v56, 5  ;;  %v3410_v7 = vld [vmem:[#allocation2 + $0x24] sm:$0x1]  ;;  %v3417_v8 = vunpack.c.l.b16 %v892_v33  ;;  %v3423_v17 = vld [vmem:[#allocation2 + $0x2c] sm:$0x1] }
  0x57   : > { %v518_v2 = vld [vmem:[#allocation2 + $0x3c] sm:$0x1]  ;;  %v3415_v6 = vld [vmem:[%s3692_s3 + $0x220] sm:$0xff]  ;;  %v910_v15 = vrot.slane %v908_v58, 4  ;;  %v913_v29 = vrot.slane %v911_v47, 5  ;;  %v603_v31 = vshrl.u32 %v531_v53, 16 }
  0x58   : > { %1546 = vmatpush.bf16.msra.mxu1 %v2751_v62  ;;  %v996_v54 = vsel %vm3139_vm9, %v2296_v24, %v995_v40  ;;  %v2787_v62 = vld [vmem:[%s3692_s3 + $0x180] sm:$0xff]  ;;  %v750_v10 = vpack.c.b16 %v744_v23, %v743_v5  ;;  %v519_v13 = vsel %vm2984_vm3, %v451_v34, %v518_v2  ;;  %v900_v51 = vor.u32 %v899_v57, %v896_v48  ;;  %v1573_v33 = vld [vmem:[#allocation2 + $0x10] sm:$0xf]  ;;  %v3449_v56 = vld [vmem:[%s3692_s3 + $0x218] sm:$0xff] }
  0x59   : > { %v1050_v63 = vunpack.c.l.b16 %v996_v54  ;;  %v524_v49 = vld [vmem:[#allocation2 + $0x44] sm:$0x1]  ;;  %2041 = vmatpush.bf16.msrb.mxu3 %v2796_v43  ;;  %520 = vst [vmem:[#allocation2 + $0x3c] sm:$0x1] %v519_v13  ;;  %2013 = vmatpush.bf16.msrb.mxu2 %v2787_v62  ;;  %v917_v34 = vshll.u32 %v3383_v21, 16  ;;  %v606_v32 = vshll.u32 %v531_v53, 16 }
  0x5a   : > { %v2795_v19 = vld [vmem:[%s3692_s3 + $0x1c0] sm:$0xff]  ;;  %v525_v11 = vsel %vm2984_vm3, %v459_v55, %v524_v49  ;;  %2067 = vmatpush.bf16.msra.mxu0 %v3415_v6  ;;  %v612_v36 = vshll.u32 %v3410_v7, 16  ;;  %v3436_v37 = vrot.slane %v903_v52, 5  ;;  %v617_v12 = vshrl.u32 %v532_v59, 16  ;;  %v1574_v21 = vld [vmem:[#allocation2 + $0x18] sm:$0xf] }
  0x5b   : > { %v1055_v24 = vpack.c.b16 %v1050_v63, %v1049_v42  ;;  %526 = vst [vmem:[#allocation2 + $0x44] sm:$0x1] %v525_v11  ;;  %v620_v50 = vshll.u32 %v532_v59, 16  ;;  %v626_v55 = vshll.u32 %v3423_v17, 16  ;;  %v901_v38 = vrot.slane %v900_v51, 4  ;;  %v2749_v40 = vld [vmem:[%s3692_s3 + $0x90] sm:$0xff] }
  0x5c   : > { %1547 = vmatpush.bf16.msra.mxu1 %v2750_v60  ;;  %v605_v45 = vrot.slane %v603_v31, 4  ;;  %v608_v39 = vrot.slane %v606_v32, 5  ;;  %v914_v42 = vor.u32 %v913_v29, %v910_v15  ;;  %v619_v26 = vrot.slane %v617_v12, 4  ;;  %v3444_v43 = vld [vmem:[#allocation2 + $0x14] sm:$0x1] }
  0x5d   : > { %2861 = vmatpush.bf16.msra.mxu2 %v3292_v46  ;;  %1508 = vmatmul.bf16.gmra.mxu3 %v2290_v3  ;;  %v1038_v46 = vpack.c.b16 %v3417_v8, %v3408_v0  ;;  %v622_v28 = vrot.slane %v620_v50, 5  ;;  %v3451_v44 = vrot.slane %v917_v34, 5  ;;  %v614_v48 = vrot.slane %v612_v36, 5  ;;  %v3467_v13 = vld [vmem:[#allocation2 + $0x1c] sm:$0x1]  ;;  %v2748_v34 = vld [vmem:[%s3692_s3 + $0x88] sm:$0xff] }
  0x5e   : > { %1330 = vmatmul.bf16.gmra.mxu2 %v1055_v24  ;;  %2042 = vmatpush.bf16.msrb.mxu3 %v2795_v19  ;;  %v609_v5 = vor.u32 %v608_v39, %v605_v45  ;;  %v1590_v52 = vshrl.u32 %v1573_v33, 16  ;;  %v628_v54 = vrot.slane %v626_v55, 5  ;;  %v1593_v23 = vshll.u32 %v1573_v33, 16  ;;  %v827_v29 = vld [vmem:[#allocation2 + $0x38] sm:$0xf] }
  0x5f   : > { %1527 = vmatmul.bf16.gmra.mxu0 %v750_v10  ;;  %v623_v53 = vor.u32 %v622_v28, %v619_v26  ;;  %v1599_v57 = vshll.u32 %v3444_v43, 16  ;;  %v906_v59 = vsel %vm3249_vm12, %v901_v38, %v3436_v37  ;;  %v1604_v63 = vshrl.u32 %v1574_v21, 16  ;;  %v3488_v32 = vld [vmem:[#allocation2 + $0x10] sm:$0xf]  ;;  %v3490_v36 = vld [vmem:[#allocation2 + $0x14] sm:$0xf0] }
  0x60   : > { %1548 = vmatpush.bf16.msra.mxu1 %v2749_v40  ;;  %2068 = vmatpush.bf16.msra.mxu0 %v3449_v56  ;;  %v3456_v58 = vld [vmem:[#allocation2 + $0x3c] sm:$0x1]  ;;  %v610_v60 = vrot.slane %v609_v5, 4  ;;  %v1592_v62 = vrot.slane %v1590_v52, 4  ;;  %v915_v2 = vrot.slane %v914_v42, 4  ;;  %v1595_v47 = vrot.slane %v1593_v23, 5 }
  0x61   : > { %2862 = vmatpush.bf16.msra.mxu2 %v3332_v41  ;;  %v999_v41 = vrot.slane %v3456_v58, 5  ;;  %v624_v3 = vrot.slane %v623_v53, 4  ;;  %v1601_v49 = vrot.slane %v1599_v57, 5  ;;  %v1606_v51 = vrot.slane %v1604_v63, 4  ;;  %v828_v45 = vld [vmem:[#allocation2 + $0x40] sm:$0xf] }
  0x62   : > { %v3461_v0 = vld [vmem:[#allocation2 + $0x44] sm:$0x1]  ;;  %v615_v10 = vsel %vm3249_vm12, %v610_v60, %v614_v48  ;;  %v1596_v15 = vor.u32 %v1595_v47, %v1592_v62  ;;  %v1607_v37 = vshll.u32 %v1574_v21, 16  ;;  %v687_v12 = vrot.slane %v3237_v1, 5  ;;  %v533_v26 = vld [vmem:[#allocation2 + $0x30] sm:$0xf] }
  0x63   : > { %v1003_v8 = vrot.slane %v3461_v0, 5  ;;  %1296 = vmatmul.bf16.gmra.mxu1 %v1038_v46  ;;  %v1000_v19 = vsel %vm3139_vm9, %v2297_v30, %v999_v41  ;;  %v629_v24 = vsel %vm3249_vm12, %v624_v3, %v628_v54  ;;  %v745_v11 = vunpack.c.l.b16 %v615_v10  ;;  %v3506_v57 = vld [vmem:[#allocation2 + $0x34] sm:$0x1]  ;;  %v534_v60 = vld [vmem:[#allocation2 + $0x38] sm:$0xf] }
  0x64   : > { %v1051_v30 = vunpack.c.l.b16 %v1000_v19  ;;  %v746_v31 = vunpack.c.l.b16 %v629_v24  ;;  %v1597_v55 = vrot.slane %v1596_v15, 4  ;;  %v1613_v33 = vshll.u32 %v3467_v13, 16  ;;  %1549 = vmatpush.bf16.msra.mxu1 %v2748_v34  ;;  %v2747_v24 = vld [vmem:[%s3692_s3 + $0x80] sm:$0xff]  ;;  %v1578_v1 = vld [vmem:[#allocation2 + $0x38] sm:$0xf] }
  0x65   : > { %2863 = vmatpush.bf16.msra.mxu2 %v3373_v20  ;;  %v3482_v20 = vld [vmem:[%s3692_s3 + $0x210] sm:$0xff]  ;;  %v1004_v61 = vsel %vm3139_vm9, %v2298_v35, %v1003_v8  ;;  %v691_v4 = vrot.slane %v3241_v14, 5  ;;  %v3496_v38 = vunpack.c.l.b16 %v906_v59  ;;  %v1609_v35 = vrot.slane %v1607_v37, 5  ;;  %v3510_v8 = vld [vmem:[#allocation2 + $0x3c] sm:$0x1] }
  0x66   : > { %v1052_v50 = vunpack.c.l.b16 %v1004_v61  ;;  %2069 = vmatpush.bf16.msra.mxu0 %v3482_v20  ;;  %v922_v39 = vshrl.u32 %v827_v29, 16  ;;  %v920_v21 = vsel %vm3249_vm12, %v915_v2, %v3451_v44  ;;  %v751_v40 = vpack.c.b16 %v746_v31, %v745_v11  ;;  %v1575_v37 = vld [vmem:[#allocation2 + $0x20] sm:$0xf] }
  0x67   : > { %v2566_v46 = vor.u32 %v3490_v36, %v3488_v32  ;;  %v925_v42 = vshll.u32 %v827_v29, 16  ;;  %v1602_v5 = vsel %vm3249_vm12, %v1597_v55, %v1601_v49  ;;  %v1610_v48 = vor.u32 %v1609_v35, %v1606_v51 }
  0x68   : > { %v1056_v28 = vpack.c.b16 %v1052_v50, %v1051_v30  ;;  %v1615_v52 = vrot.slane %v1613_v33, 5  ;;  %v924_v53 = vrot.slane %v922_v39, 4  ;;  %v936_v23 = vshrl.u32 %v828_v45, 16  ;;  %1550 = vmatpush.bf16.msra.mxu1 %v2747_v24  ;;  %v2803_v50 = vld [vmem:[%s3692_s3 + $0x200] sm:$0xff] }
  0x69   : > { %2864 = vmatpush.bf16.msra.mxu2 %v3415_v6  ;;  %v927_v54 = vrot.slane %v925_v42, 5  ;;  %v939_v6 = vshll.u32 %v828_v45, 16  ;;  %v1034_v59 = vunpack.c.l.b16 %v920_v21  ;;  %v1611_v44 = vrot.slane %v1610_v48, 4  ;;  %v3527_v39 = vld [vmem:[#allocation2 + $0x24] sm:$0x1] }
  0x6a   : > { %v631_v62 = vshrl.u32 %v533_v26, 16  ;;  %v634_v63 = vshll.u32 %v533_v26, 16  ;;  %v1781_v41 = vunpack.c.l.b16 %v1602_v5  ;;  %v931_v2 = vshll.u32 %v3456_v58, 16  ;;  %v1576_v26 = vld [vmem:[#allocation2 + $0x28] sm:$0xf] }
  0x6b   : > { %v938_v3 = vrot.slane %v936_v23, 4  ;;  %v941_v47 = vrot.slane %v939_v6, 5  ;;  %v1616_v10 = vsel %vm3249_vm12, %v1611_v44, %v1615_v52  ;;  %v640_v19 = vshll.u32 %v3506_v57, 16  ;;  %v3533_v23 = vld [vmem:[#allocation2 + $0x2c] sm:$0x1] }
  0x6c   : > { %v633_v49 = vrot.slane %v631_v62, 4  ;;  %v636_v51 = vrot.slane %v634_v63, 5  ;;  %v1782_v58 = vunpack.c.l.b16 %v1616_v10  ;;  %v928_v11 = vor.u32 %v927_v54, %v924_v53  ;;  %v658_v6 = vld [vmem:[#allocation2] sm:$0xe]  ;;  %v659_v63 = vld [vmem:[#allocation2 + $0x8] sm:$0xe] }
  0x6d   : > { %2865 = vmatpush.bf16.msra.mxu2 %v3449_v56  ;;  %v2804_v56 = vld [vmem:[%s3692_s3 + $0x208] sm:$0xff]  ;;  %v945_v15 = vshll.u32 %v3461_v0, 16  ;;  %v645_v29 = vshrl.u32 %v534_v60, 16  ;;  %v642_v61 = vrot.slane %v640_v19, 5  ;;  %v648_v30 = vshll.u32 %v534_v60, 16 }
  0x6e   : > { %1335 = vmatmul.bf16.gmra.mxu2 %v1056_v28  ;;  %v637_v34 = vor.u32 %v636_v51, %v633_v49  ;;  %v654_v31 = vshll.u32 %v3510_v8, 16  ;;  %2070 = vmatpush.bf16.msra.mxu0 %v2804_v56  ;;  %v1039_v55 = vpack.c.b16 %v1034_v59, %v3496_v38  ;;  %v1789_v33 = vpack.c.b16 %v1782_v58, %v1781_v41 }
  0x6f   : > { %1532 = vmatmul.bf16.gmra.mxu0 %v751_v40  ;;  %v942_v35 = vor.u32 %v941_v47, %v938_v3  ;;  %v647_v45 = vrot.slane %v645_v29, 4  ;;  %v1727_v0 = vrot.slane %v3444_v43, 5  ;;  %v933_v21 = vrot.slane %v931_v2, 5 }
  0x70   : > { %v638_v40 = vrot.slane %v637_v34, 4  ;;  %v650_v42 = vrot.slane %v648_v30, 5  ;;  %2043 = vmatmul.bf16.vlgmr.msrb.gmra.mxu3 %v1789_v33  ;;  %v929_v28 = vrot.slane %v928_v11, 4  ;;  %v947_v5 = vrot.slane %v945_v15, 5  ;;  %v1577_v33 = vld [vmem:[#allocation2 + $0x30] sm:$0xf] }
  0x71   : > { %2866 = vmatpush.bf16.msra.mxu2 %v3482_v20  ;;  %v1618_v48 = vshrl.u32 %v1575_v37, 16  ;;  %v1621_v52 = vshll.u32 %v1575_v37, 16  ;;  %v656_v54 = vrot.slane %v654_v31, 5  ;;  %v1627_v20 = vshll.u32 %v3527_v39, 16 }
  0x72   : > { %v643_v38 = vsel %vm3249_vm12, %v638_v40, %v642_v61  ;;  %v651_v53 = vor.u32 %v650_v42, %v647_v45  ;;  %2071 = vmatpush.bf16.msra.mxu0 %v2803_v50  ;;  %v943_v59 = vrot.slane %v942_v35, 4  ;;  %v1632_v62 = vshrl.u32 %v1576_v26, 16  ;;  %v1701_v40 = vld [vmem:[#allocation2 + $0x10] sm:$0xe]  ;;  %v3553_v42 = vld [vmem:[#allocation2 + $0x34] sm:$0x1] }
  0x73   : > { %1301 = vmatmul.bf16.gmra.mxu1 %v1039_v55  ;;  %v1620_v44 = vrot.slane %v1618_v48, 4  ;;  %v1623_v60 = vrot.slane %v1621_v52, 5  ;;  %v747_v2 = vunpack.c.l.b16 %v643_v38  ;;  %v1629_v3 = vrot.slane %v1627_v20, 5  ;;  %v3558_v48 = vld [vmem:[#allocation2 + $0x3c] sm:$0x1] }
  0x74   : > { %v652_v41 = vrot.slane %v651_v53, 4  ;;  %v1635_v47 = vshll.u32 %v1576_v26, 16  ;;  %v1634_v49 = vrot.slane %v1632_v62, 4  ;;  %v1641_v51 = vshll.u32 %v3533_v23, 16 }
  0x75   : > { %2867 = vmatpush.bf16.msra.mxu2 %v2804_v56  ;;  %v1624_v10 = vor.u32 %v1623_v60, %v1620_v44  ;;  %v2267_v19 = vrot.slane %v658_v6, 9  ;;  %v934_v24 = vsel %vm3249_vm12, %v929_v28, %v933_v21  ;;  %v2268_v15 = vrot.slane %v659_v63, 9  ;;  %v660_v6 = vld [vmem:[#allocation2 + $0x10] sm:$0xe]  ;;  %v661_v63 = vld [vmem:[#allocation2 + $0x18] sm:$0xe] }
  0x76   : > { %v657_v58 = vsel %vm3249_vm12, %v652_v41, %v656_v54  ;;  %v1637_v11 = vrot.slane %v1635_v47, 5  ;;  %v948_v56 = vsel %vm3249_vm12, %v943_v59, %v947_v5  ;;  %v1643_v31 = vrot.slane %v1641_v51, 5 }
  0x77   : > { %v748_v29 = vunpack.c.l.b16 %v657_v58  ;;  %v1625_v34 = vrot.slane %v1624_v10, 4  ;;  %v688_v61 = vsel %vm3139_vm9, %v2267_v19, %v687_v12  ;;  %v692_v37 = vsel %vm3139_vm9, %v2268_v15, %v691_v4  ;;  %v1702_v4 = vld [vmem:[#allocation2 + $0x18] sm:$0xe] }
  0x78   : > { %v1638_v30 = vor.u32 %v1637_v11, %v1634_v49  ;;  %v757_v55 = vunpack.c.l.b16 %v688_v61  ;;  %v758_v21 = vunpack.c.l.b16 %v692_v37  ;;  %v1731_v12 = vrot.slane %v3467_v13, 5 }
  0x79   : > { %2868 = vmatpush.bf16.msra.mxu2 %v2803_v50  ;;  %v752_v35 = vpack.c.b16 %v748_v29, %v747_v2  ;;  %v1630_v45 = vsel %vm3249_vm12, %v1625_v34, %v1629_v3  ;;  %v1035_v50 = vunpack.c.l.b16 %v934_v24  ;;  %v1036_v26 = vunpack.c.l.b16 %v948_v56  ;;  %v353_v56 = vld [vmem:[#allocation2 + $0x48] sm:$0x1] }
  0x7a   : > { %v1639_v28 = vrot.slane %v1638_v30, 4  ;;  %v1783_v14 = vunpack.c.l.b16 %v1630_v45  ;;  %v3556_v5 = vpack.c.b16 %v758_v21, %v757_v55  ;;  %v1646_v52 = vshrl.u32 %v1577_v33, 16  ;;  %v2569_v55 = vld [vmem:[#allocation2 + $0x20] sm:$0xf] }
  0x7b   : > { %v1649_v38 = vshll.u32 %v1577_v33, 16  ;;  %v2555_v54 = vrot.slane %v1701_v40, 9  ;;  %v1655_v13 = vshll.u32 %v3553_v42, 16  ;;  %v1660_v20 = vshrl.u32 %v1578_v1, 16  ;;  %v2784_v33 = vld [vmem:[#allocation2 + $0x24] sm:$0xf0] }
  0x7c   : > { %v1644_v53 = vsel %vm3249_vm12, %v1639_v28, %v1643_v31  ;;  %v1648_v44 = vrot.slane %v1646_v52, 4  ;;  %v1663_v62 = vshll.u32 %v1578_v1, 16  ;;  %v1040_v41 = vpack.c.b16 %v1036_v26, %v1035_v50  ;;  %v385_v31 = vld [vmem:[#allocation2 + $0x4c] sm:$0x1]  ;;  %v1703_v28 = vld [vmem:[#allocation2 + $0x20] sm:$0xe] }
  0x7d   : > { %v1784_v59 = vunpack.c.l.b16 %v1644_v53  ;;  %v1651_v60 = vrot.slane %v1649_v38, 5  ;;  %v2556_v2 = vrot.slane %v1702_v4, 9  ;;  %v1662_v3 = vrot.slane %v1660_v20, 4  ;;  %v1704_v38 = vld [vmem:[#allocation2 + $0x28] sm:$0xe] }
  0x7e   : > { %2014 = vmatmul.bf16.vlgmr.msrb.gmra.mxu2 %v2566_v46  ;;  %v1669_v32 = vshll.u32 %v3558_v48, 16  ;;  %v1665_v47 = vrot.slane %v1663_v62, 5  ;;  %v2269_v10 = vrot.slane %v660_v6, 9  ;;  %v695_v49 = vrot.slane %v3314_v18, 5  ;;  %v3589_v53 = vld [vmem:[#allocation2 + $0x44] sm:$0x1] }
  0x7f   : > { %1537 = vmatmul.bf16.gmra.mxu0 %v752_v35  ;;  %v1790_v36 = vpack.c.b16 %v1784_v59, %v1783_v14  ;;  %v1652_v46 = vor.u32 %v1651_v60, %v1648_v44  ;;  %v2270_v51 = vrot.slane %v661_v63, 9  ;;  %v699_v19 = vrot.slane %v3319_v22, 5 }
  0x80   : > { %v1728_v24 = vsel %vm3139_vm9, %v2555_v54, %v1727_v0  ;;  %v1657_v11 = vrot.slane %v1655_v13, 5  ;;  %v1666_v15 = vor.u32 %v1665_v47, %v1662_v3  ;;  %v1732_v29 = vsel %vm3139_vm9, %v2556_v2, %v1731_v12  ;;  %v1579_v0 = vld [vmem:[#allocation2 + $0x40] sm:$0xf]  ;;  %v663_v3 = vld [vmem:[#allocation2 + $0x28] sm:$0xe] }
  0x81   : > { %2048 = vmatmul.bf16.gmra.mxu3 %v1790_v36  ;;  %v1653_v58 = vrot.slane %v1652_v46, 4  ;;  %v1671_v34 = vrot.slane %v1669_v32, 5  ;;  %v696_v18 = vsel %vm3139_vm9, %v2269_v10, %v695_v49  ;;  %v700_v22 = vsel %vm3139_vm9, %v2270_v51, %v699_v19  ;;  %v662_v2 = vld [vmem:[#allocation2 + $0x20] sm:$0xe] }
  0x82   : > { %v1667_v61 = vrot.slane %v1666_v15, 4  ;;  %v759_v43 = vunpack.c.l.b16 %v696_v18  ;;  %v760_v30 = vunpack.c.l.b16 %v700_v22  ;;  %v354_v37 = vsel %vm2984_vm3, 0, %v353_v56 }
  0x83   : > { %1306 = vmatmul.bf16.gmra.mxu1 %v1040_v41  ;;  %v1797_v35 = vunpack.c.l.b16 %v1728_v24  ;;  %v1798_v45 = vunpack.c.l.b16 %v1732_v29  ;;  %v1658_v21 = vsel %vm3249_vm12, %v1653_v58, %v1657_v11  ;;  %355 = vst [vmem:[#allocation2 + $0x48] sm:$0x1] %v354_v37  ;;  %v386_v12 = vsel %vm3003_vm4, 0, %v385_v31 }
  0x84   : > { %v3583_v40 = vpack.c.b16 %v760_v30, %v759_v43  ;;  %v1672_v1 = vsel %vm3249_vm12, %v1667_v61, %v1671_v34  ;;  %v1674_v50 = vshrl.u32 %v1579_v0, 16  ;;  %v1677_v26 = vshll.u32 %v1579_v0, 16  ;;  %387 = vst [vmem:[#allocation2 + $0x4c] sm:$0x1] %v386_v12  ;;  %v2785_v61 = vld [vmem:[#allocation2 + $0x34] sm:$0xf0] }
  0x85   : > { %v2570_v16 = vor.u32 %v2784_v33, %v2569_v55  ;;  %v1805_v14 = vpack.c.b16 %v1798_v45, %v1797_v35  ;;  %v1785_v4 = vunpack.c.l.b16 %v1658_v21  ;;  %v1786_v52 = vunpack.c.l.b16 %v1672_v1  ;;  %v1705_v21 = vld [vmem:[#allocation2 + $0x30] sm:$0xe]  ;;  %v1706_v1 = vld [vmem:[#allocation2 + $0x38] sm:$0xe] }
  0x86   : > { %v1676_v54 = vrot.slane %v1674_v50, 4  ;;  %v1679_v13 = vrot.slane %v1677_v26, 5  ;;  %v2557_v20 = vrot.slane %v1703_v28, 9  ;;  %v1735_v6 = vrot.slane %v3527_v39, 5  ;;  %v664_v28 = vld [vmem:[#allocation2 + $0x30] sm:$0xe] }
  0x87   : > { %v2558_v59 = vrot.slane %v1704_v38, 9  ;;  %v1739_v27 = vrot.slane %v3533_v23, 5  ;;  %v1683_v60 = vshll.u32 %v3589_v53, 16  ;;  %v1791_v62 = vpack.c.b16 %v1786_v52, %v1785_v4 }
  0x88   : > { %v1680_v36 = vor.u32 %v1679_v13, %v1676_v54  ;;  %v2271_v46 = vrot.slane %v662_v2, 9  ;;  %v703_v47 = vrot.slane %v3410_v7, 5  ;;  %v2272_v10 = vrot.slane %v663_v3, 9  ;;  %v1708_v2 = vld [vmem:[#allocation2 + $0x48] sm:$0xe] }
  0x89   : > { %v707_v19 = vrot.slane %v3423_v17, 5  ;;  %v1736_v24 = vsel %vm3139_vm9, %v2557_v20, %v1735_v6  ;;  %v1740_v58 = vsel %vm3139_vm9, %v2558_v59, %v1739_v27  ;;  %v1685_v56 = vrot.slane %v1683_v60, 5  ;;  %v2573_v17 = vld [vmem:[#allocation2 + $0x30] sm:$0xf]  ;;  %v2577_v6 = vld [vmem:[#allocation2 + $0x40] sm:$0xf] }
  0x8a   : > { %v1580_v44 = vld [vmem:[#allocation2 + $0x48] sm:$0xf]  ;;  %v704_v51 = vsel %vm3139_vm9, %v2271_v46, %v703_v47  ;;  %v1681_v7 = vrot.slane %v1680_v36, 4  ;;  %v1799_v43 = vunpack.c.l.b16 %v1736_v24  ;;  %v1800_v30 = vunpack.c.l.b16 %v1740_v58 }
  0x8b   : > { %v1688_v63 = vshrl.u32 %v1580_v44, 16  ;;  %v1691_v41 = vshll.u32 %v1580_v44, 16  ;;  %v3594_v32 = vld [vmem:[#allocation2 + $0x4c] sm:$0x1]  ;;  %v761_v15 = vunpack.c.l.b16 %v704_v51  ;;  %v708_v34 = vsel %vm3139_vm9, %v2272_v10, %v707_v19  ;;  %v2786_v59 = vld [vmem:[#allocation2 + $0x44] sm:$0xf0] }
  0x8c   : > { %v1697_v23 = vshll.u32 %v3594_v32, 16  ;;  %v762_v22 = vunpack.c.l.b16 %v708_v34  ;;  %v1686_v0 = vsel %vm3249_vm12, %v1681_v7, %v1685_v56  ;;  %v2574_v55 = vor.u32 %v2785_v61, %v2573_v17 }
  0x8d   : > { %v1690_v39 = vrot.slane %v1688_v63, 4  ;;  %v1693_v49 = vrot.slane %v1691_v41, 5  ;;  %v1806_v33 = vpack.c.b16 %v1800_v30, %v1799_v43  ;;  %v1787_v35 = vunpack.c.l.b16 %v1686_v0  ;;  %v1707_v41 = vld [vmem:[#allocation2 + $0x40] sm:$0xe] }
  0x8e   : > { %2019 = vmatmul.bf16.gmra.mxu2 %v2570_v16  ;;  %v1699_v29 = vrot.slane %v1697_v23, 5  ;;  %v767_v31 = vpack.c.b16 %v762_v22, %v761_v15  ;;  %v2559_v12 = vrot.slane %v1705_v21, 9  ;;  %v1743_v50 = vrot.slane %v3553_v42, 5 }
  0x8f   : > { %2072 = vmatmul.bf16.vlgmr.msra.gmra.mxu0 %v1805_v14  ;;  %v1694_v11 = vor.u32 %v1693_v49, %v1690_v39  ;;  %v2560_v26 = vrot.slane %v1706_v1, 9  ;;  %v1747_v16 = vrot.slane %v3558_v48, 5  ;;  %v665_v14 = vld [vmem:[#allocation2 + $0x38] sm:$0xe]  ;;  %v2273_v4 = vrot.slane %v664_v28, 9 }
  0x90   : > { %v711_v9 = vrot.slane %v3506_v57, 5  ;;  %v2274_v52 = vrot.slane %v665_v14, 9  ;;  %v715_v38 = vrot.slane %v3510_v8, 5  ;;  %v1744_v54 = vsel %vm3139_vm9, %v2559_v12, %v1743_v50 }
  0x91   : > { %2053 = vmatmul.bf16.gmra.mxu3 %v1791_v62  ;;  %v1695_v18 = vrot.slane %v1694_v11, 4  ;;  %v1748_v13 = vsel %vm3139_vm9, %v2560_v26, %v1747_v16  ;;  %v1801_v8 = vunpack.c.l.b16 %v1744_v54  ;;  %v2578_v60 = vor.u32 %v2786_v59, %v2577_v6 }
  0x92   : > { %v712_v42 = vsel %vm3139_vm9, %v2273_v4, %v711_v9  ;;  %v716_v48 = vsel %vm3139_vm9, %v2274_v52, %v715_v38  ;;  %v1802_v27 = vunpack.c.l.b16 %v1748_v13  ;;  %v1751_v36 = vrot.slane %v3589_v53, 5 }
  0x93   : > { %1551 = vmatmul.bf16.vlgmr.msra.gmra.mxu1 %v3556_v5  ;;  %v1700_v37 = vsel %vm3249_vm12, %v1695_v18, %v1699_v29  ;;  %v763_v20 = vunpack.c.l.b16 %v712_v42  ;;  %v764_v57 = vunpack.c.l.b16 %v716_v48  ;;  %v1755_v46 = vrot.slane %v3594_v32, 5 }
  0x94   : > { %v1788_v45 = vunpack.c.l.b16 %v1700_v37  ;;  %v1807_v63 = vpack.c.b16 %v1802_v27, %v1801_v8  ;;  %v2562_v47 = vrot.slane %v1708_v2, 9 }
  0x95   : > { %v768_v44 = vpack.c.b16 %v764_v57, %v763_v20 }
  0x96   : > { %v1792_v5 = vpack.c.b16 %v1788_v45, %v1787_v35  ;;  %v1756_v23 = vsel %vm3139_vm9, %v2562_v47, %v1755_v46 }
  0x97   : > { %v1804_v19 = vunpack.c.l.b16 %v1756_v23 }
  0x9e   : > { %2024 = vmatmul.bf16.gmra.mxu2 %v2574_v55 }
  0x9f   : > { %2077 = vmatmul.bf16.gmra.mxu0 %v1806_v33 }
  0xa1   : > { %2058 = vmatmul.bf16.gmra.mxu3 %v1792_v5 }
  0xa3   : > { %1556 = vmatmul.bf16.gmra.mxu1 %v3583_v40  ;;  %v2561_v40 = vrot.slane %v1707_v41, 9 }
  0xa5   : > { %v1752_v49 = vsel %vm3139_vm9, %v2561_v40, %v1751_v36 }
  0xa6   : > { %v1803_v51 = vunpack.c.l.b16 %v1752_v49 }
  0xa8   : > { %v1263_v62 = vpop.f32.mrf.mxu0  ;;  %v1808_v58 = vpack.c.b16 %v1804_v19, %v1803_v51 }
  0xab   : > { %v1273_v3 = vpop.f32.mrf.mxu1 }
  0xae   : > { %2029 = vmatmul.bf16.gmra.mxu2 %v2578_v60 }
  0xaf   : > { %2082 = vmatmul.bf16.gmra.mxu0 %v1807_v63 }
  0xb0   : > { %v1494_v10 = vpop.f32.mrf.mxu3  ;;  %v1265_v39 = vpop.f32.mrf.mxu0 }
  0xb3   : > { %1561 = vmatmul.bf16.gmra.mxu1 %v767_v31  ;;  %v1275_v24 = vpop.f32.mrf.mxu1 }
  0xb8   : > { %v3631_v11 = vpop.f32.mrf.mxu3 }
  0xb9   : > { %v1321_v32 = vpop.f32.mrf.mxu2 }
  0xba   : > { %v1268_v53 = vpop.f32.mrf.mxu0 }
  0xbe   : > { %2087 = vmatmul.bf16.vlgmr.msra.gmra.mxu2 %v1808_v58 }
  0xc0   : > { %v1278_v15 = vpop.f32.mrf.mxu1  ;;  %v1499_v56 = vpop.f32.mrf.mxu3 }
  0xc1   : > { %v1323_v29 = vpop.f32.mrf.mxu2 }
  0xc2   : > { %v1270_v7 = vpop.f32.mrf.mxu0 }
  0xc3   : > { %1566 = vmatmul.bf16.gmra.mxu1 %v768_v44 }
  0xc8   : > { %v1280_v34 = vpop.f32.mrf.mxu1  ;;  %v3633_v22 = vpop.f32.mrf.mxu3 }
  0xcb   : > { %v1523_v18 = vpop.f32.mrf.mxu0 }
  0xd0   : > { %v1326_v25 = vpop.f32.mrf.mxu2  ;;  %v1292_v17 = vpop.f32.mrf.mxu1 }
  0xd1   : > { %v1293_v61 = vadd.f32 %v1292_v17, %v1263_v62  ;;  %v1504_v0 = vpop.f32.mrf.mxu3 }
  0xd3   : > { %v1525_v43 = vpop.f32.mrf.mxu0  ;;  %v1322_v30 = vadd.f32 %v1321_v32, %v1293_v61 }
  0xd5   : > { %v1495_v31 = vadd.f32 %v1494_v10, %v1322_v30 }
  0xd7   : > { %v1524_v37 = vadd.f32 %v1523_v18, %v1495_v31 }
  0xd8   : > { %v1328_v55 = vpop.f32.mrf.mxu2  ;;  %v1294_v33 = vpop.f32.mrf.mxu1 }
  0xd9   : > { %v1295_v35 = vadd.f32 %v1294_v33, %v1265_v39  ;;  %v3635_v12 = vpop.f32.mrf.mxu3 }
  0xdb   : > { %v1324_v21 = vadd.f32 %v1323_v29, %v1295_v35 }
  0xdc   : > { %v1528_v45 = vpop.f32.mrf.mxu0 }
  0xe0   : > { %v1297_v5 = vpop.f32.mrf.mxu1 }
  0xe1   : > { %v1331_v1 = vpop.f32.mrf.mxu2  ;;  %v1298_v50 = vadd.f32 %v1297_v5, %v1268_v53  ;;  %v1509_v38 = vpop.f32.mrf.mxu3 }
  0xe3   : > { %v1327_v16 = vadd.f32 %v1326_v25, %v1298_v50 }
  0xe4   : > { %v3637_v26 = vpop.f32.mrf.mxu0 }
  0xe5   : > { %v1500_v28 = vadd.f32 %v1499_v56, %v1327_v16 }
  0xe7   : > { %v3639_v14 = vadd.f32 %v1528_v45, %v1500_v28 }
  0xe8   : > { %v1299_v9 = vpop.f32.mrf.mxu1 }
  0xe9   : > { %v1333_v4 = vpop.f32.mrf.mxu2  ;;  %v1300_v52 = vadd.f32 %v1299_v9, %v1270_v7  ;;  %v3643_v59 = vpop.f32.mrf.mxu3 }
  0xeb   : > { %v1329_v13 = vadd.f32 %v1328_v55, %v1300_v52 }
  0xec   : > { %v1533_v54 = vpop.f32.mrf.mxu0 }
  0xed   : > { %v1502_v52 = vadd.f32 %v3633_v22, %v1329_v13 }
  0xf0   : > { %v1302_v48 = vpop.f32.mrf.mxu1 }
  0xf1   : > { %v1336_v42 = vpop.f32.mrf.mxu2  ;;  %v1303_v20 = vadd.f32 %v1302_v48, %v1273_v3 }
  0xf3   : > { %v1332_v6 = vadd.f32 %v1331_v1, %v1303_v20  ;;  %v2044_v2 = vpop.f32.mrf.mxu3 }
  0xf4   : > { %v3641_v57 = vpop.f32.mrf.mxu0 }
  0xf5   : > { %v1505_v8 = vadd.f32 %v1504_v0, %v1332_v6  ;;  %v1531_v6 = vadd.f32 %v3637_v26, %v1502_v52 }
  0xf7   : > { %v3645_v27 = vadd.f32 %v1533_v54, %v1505_v8 }
  0xf8   : > { %v1304_v60 = vpop.f32.mrf.mxu1 }
  0xf9   : > { %v1338_v44 = vpop.f32.mrf.mxu2  ;;  %v1305_v62 = vadd.f32 %v1304_v60, %v1275_v24 }
  0xfb   : > { %v3647_v41 = vadd.f32 %v1333_v4, %v1305_v62  ;;  %v2046_v23 = vpop.f32.mrf.mxu3 }
  0xfc   : > { %v1538_v63 = vpop.f32.mrf.mxu0 }
  0xfd   : > { %v1507_v26 = vadd.f32 %v3635_v12, %v3647_v41 }
 0x100   : > { %v1307_v46 = vpop.f32.mrf.mxu1 }
 0x101   : > { %v2015_v36 = vpop.f32.mrf.mxu2  ;;  %v1308_v40 = vadd.f32 %v1307_v46, %v1278_v15  ;;  %v1497_v15 = vadd.f32 %v3631_v11, %v1324_v21 }
 0x102   : > { %v2045_v29 = vadd.f32 %v2044_v2, %v2015_v36 }
 0x103   : > { %v1337_v3 = vadd.f32 %v1336_v42, %v1308_v40  ;;  %v1526_v61 = vadd.f32 %v1525_v43, %v1497_v15 }
 0x104   : > { %v3649_v47 = vpop.f32.mrf.mxu0  ;;  %v2049_v7 = vpop.f32.mrf.mxu3 }
 0x105   : > { %v1510_v10 = vadd.f32 %v1509_v38, %v1337_v3 }
 0x107   : > { %v3651_v39 = vadd.f32 %v1538_v63, %v1510_v10 }
 0x108   : > { %v1309_v51 = vpop.f32.mrf.mxu1 }
 0x109   : > { %v2017_v49 = vpop.f32.mrf.mxu2  ;;  %v1310_v19 = vadd.f32 %v1309_v51, %v1280_v34 }
 0x10a   : > { %v2047_v18 = vadd.f32 %v2046_v23, %v2017_v49 }
 0x10b   : > { %v3653_v53 = vadd.f32 %v1338_v44, %v1310_v19 }
 0x10c   : > { %v2073_v58 = vpop.f32.mrf.mxu0  ;;  %v2051_v1 = vpop.f32.mrf.mxu3 }
 0x10d   : > { %v2074_v17 = vadd.f32 %v2073_v58, %v2045_v29 }
 0x110   : > { %v1552_v32 = vpop.f32.mrf.mxu1 }
 0x111   : > { %v2020_v24 = vpop.f32.mrf.mxu2  ;;  %v1553_v25 = vadd.f32 %v1552_v32, %v1524_v37 }
 0x112   : > { %v2050_v45 = vadd.f32 %v2049_v7, %v2020_v24 }
 0x113   : > { %v2093_v55 = vadd.f32 %v2074_v17, %v1553_v25 }
 0x114   : > { %v2075_v56 = vpop.f32.mrf.mxu0  ;;  %v2054_v20 = vpop.f32.mrf.mxu3 }
 0x115   : > { %v2076_v31 = vadd.f32 %v2075_v56, %v2047_v18  ;;  %v2131_v11 = vmul.f32 %v2093_v55, %v2093_v55  ;;  %v1536_v56 = vadd.f32 %v3641_v57, %v1507_v26  ;;  %v1512_v57 = vadd.f32 %v3643_v59, %v3653_v53 }
 0x118   : > { %v1554_v0 = vpop.f32.mrf.mxu1 }
 0x119   : > { %v2022_v30 = vpop.f32.mrf.mxu2  ;;  %v1555_v34 = vadd.f32 %v1554_v0, %v1526_v61 }
 0x11a   : > { %v2052_v54 = vadd.f32 %v2051_v1, %v2022_v30 }
 0x11b   : > { %v2094_v35 = vadd.f32 %v2076_v31, %v1555_v34 }
 0x11c   : > { %v2078_v33 = vpop.f32.mrf.mxu0  ;;  %v2056_v49 = vpop.f32.mrf.mxu3 }
 0x11d   : > { %v2830_v37 = vpack.c.bf16 %v2094_v35, %v2093_v55  ;;  %v2117_v21 = vadd.f32 %v2094_v35, %v2093_v55  ;;  %v2132_v43 = vmul.f32 %v2094_v35, %v2094_v35  ;;  %v2079_v16 = vadd.f32 %v2078_v33, %v2050_v45 }
 0x11f   : > { %2831 = vst [vmem:[%s3661_s30] sm:$0xff] %v2830_v37   ;;  %v2139_v5 = vadd.f32 %v2132_v43, %v2131_v11 }
 0x120   : > { %v1557_v28 = vpop.f32.mrf.mxu1 }
 0x121   : > { %v2025_v50 = vpop.f32.mrf.mxu2  ;;  %v1558_v4 = vadd.f32 %v1557_v28, %v3639_v14 }
 0x122   : > { %v2055_v46 = vadd.f32 %v2054_v20, %v2025_v50 }
 0x123   : > { %v2095_v38 = vadd.f32 %v2079_v16, %v1558_v4 }
 0x124   : > { %v2080_v9 = vpop.f32.mrf.mxu0  ;;  %v2059_v61 = vpop.f32.mrf.mxu3 }
 0x125   : > { %v2118_v42 = vadd.f32 %v2117_v21, %v2095_v38  ;;  %v2133_v48 = vmul.f32 %v2095_v38, %v2095_v38  ;;  %v2081_v60 = vadd.f32 %v2080_v9, %v2052_v54  ;;  %v1541_v21 = vadd.f32 %v3649_v47, %v1512_v57 }
 0x127   : > { %v2140_v8 = vadd.f32 %v2139_v5, %v2133_v48 }
 0x128   : > { %v1559_v62 = vpop.f32.mrf.mxu1 }
 0x129   : > { %v2027_v44 = vpop.f32.mrf.mxu2  ;;  %v1560_v63 = vadd.f32 %v1559_v62, %v1531_v6 }
 0x12a   : > { %v2057_v24 = vadd.f32 %v2056_v49, %v2027_v44 }
 0x12b   : > { %v2096_v36 = vadd.f32 %v2081_v60, %v1560_v63 }
 0x12c   : > { %v2083_v2 = vpop.f32.mrf.mxu0  ;;  %v2061_v1 = vpop.f32.mrf.mxu3 }
 0x12d   : > { %v2835_v14 = vpack.c.bf16 %v2096_v36, %v2095_v38  ;;  %v2119_v40 = vadd.f32 %v2118_v42, %v2096_v36  ;;  %v2134_v3 = vmul.f32 %v2096_v36, %v2096_v36  ;;  %v2084_v10 = vadd.f32 %v2083_v2, %v2055_v46 }
 0x12f   : > { %2850 = vst [vmem:[%s3661_s30 + $0x8] sm:$0xff] %v2835_v14   ;;  %v2141_v22 = vadd.f32 %v2140_v8, %v2134_v3 }
 0x130   : > { %v1562_v23 = vpop.f32.mrf.mxu1 }
 0x131   : > { %v2030_v13 = vpop.f32.mrf.mxu2  ;;  %v1563_v51 = vadd.f32 %v1562_v23, %v3645_v27 }
 0x132   : > { %v2060_v55 = vadd.f32 %v2059_v61, %v2030_v13 }
 0x133   : > { %v2097_v19 = vadd.f32 %v2084_v10, %v1563_v51 }
 0x134   : > { %v2085_v58 = vpop.f32.mrf.mxu0 }
 0x135   : > { %v2120_v32 = vadd.f32 %v2119_v40, %v2097_v19  ;;  %v2135_v7 = vmul.f32 %v2097_v19, %v2097_v19  ;;  %v2086_v18 = vadd.f32 %v2085_v58, %v2057_v24 }
 0x137   : > { %v2142_v15 = vadd.f32 %v2141_v22, %v2135_v7 }
 0x138   : > { %v1564_v25 = vpop.f32.mrf.mxu1 }
 0x139   : > { %v2032_v29 = vpop.f32.mrf.mxu2  ;;  %v1565_v17 = vadd.f32 %v1564_v25, %v1536_v56 }
 0x13a   : > { %v2062_v43 = vadd.f32 %v2061_v1, %v2032_v29 }
 0x13b   : > { %v2098_v30 = vadd.f32 %v2086_v18, %v1565_v17 }
 0x13d   : > { %v2840_v31 = vpack.c.bf16 %v2098_v30, %v2097_v19  ;;  %v2121_v27 = vadd.f32 %v2120_v32, %v2098_v30  ;;  %v2136_v0 = vmul.f32 %v2098_v30, %v2098_v30 }
 0x13f   : > { %2851 = vst [vmem:[%s3661_s30 + $0x10] sm:$0xff] %v2840_v31   ;;  %v2143_v12 = vadd.f32 %v2142_v15, %v2136_v0 }
 0x140   : > { %v1567_v34 = vpop.f32.mrf.mxu1 }
 0x141   : > { %v2088_v41 = vpop.f32.mrf.mxu2  ;;  %v1568_v35 = vadd.f32 %v1567_v34, %v3651_v39 }
 0x142   : > { %v2089_v33 = vadd.f32 %v2088_v41, %v2060_v55 }
 0x144   : > { %v2099_v45 = vadd.f32 %v2089_v33, %v1568_v35 }
 0x146   : > { %v2122_v11 = vadd.f32 %v2121_v27, %v2099_v45  ;;  %v2137_v37 = vmul.f32 %v2099_v45, %v2099_v45 }
 0x148   : > { %v2144_v5 = vadd.f32 %v2143_v12, %v2137_v37  ;;  %v1569_v16 = vpop.f32.mrf.mxu1 }
 0x149   : > { %v2090_v50 = vpop.f32.mrf.mxu2  ;;  %v1570_v4 = vadd.f32 %v1569_v16, %v1541_v21 }
 0x14a   : > { %v2091_v28 = vadd.f32 %v2090_v50, %v2062_v43 }
 0x14c   : > { %v2100_v9 = vadd.f32 %v2091_v28, %v1570_v4 }
 0x14e   : > { %v2845_v52 = vpack.c.bf16 %v2100_v9, %v2099_v45  ;;  %v2123_v39 = vadd.f32 %v2122_v11, %v2100_v9  ;;  %v2138_v38 = vmul.f32 %v2100_v9, %v2100_v9 }
 0x150   : > { %2852 = vst [vmem:[%s3661_s30 + $0x18] sm:$0xff] %v2845_v52   ;;  %v2124_v59 = vrot.slane %v2123_v39, 4  ;;  %v2145_v53 = vadd.f32 %v2144_v5, %v2138_v38 }
 0x152   : > { %v2125_v54 = vadd.f32 %v2124_v59, %v2123_v39  ;;  %v2146_v42 = vrot.slane %v2145_v53, 4 }
 0x154   : > { %v2126_v48 = vrot.slane %v2125_v54, 2  ;;  %v2147_v20 = vadd.f32 %v2146_v42, %v2145_v53 }
 0x156   : > { %v2127_v47 = vadd.f32 %v2126_v48, %v2125_v54  ;;  %v2148_v6 = vrot.slane %v2147_v20, 2 }
 0x158   : > { %v2128_v8 = vrot.slane %v2127_v47, 1  ;;  %v2149_v44 = vadd.f32 %v2148_v6, %v2147_v20 }
 0x15a   : > { %v2129_v60 = vadd.f32 %v2128_v8, %v2127_v47  ;;  %v2150_v62 = vrot.slane %v2149_v44, 1 }
 0x15c   : > { %2130 = vst [vmem:[%s265_s8] sm:$0x1] %v2129_v60  ;;  %v2151_v63 = vadd.f32 %v2150_v62, %v2149_v44 }
 0x15e   : > { %2152 = vst [vmem:[%s268_s10] sm:$0x1] %v2151_v63 }
 0x15f PF: > { %s17_s21 = sadd.s32 1, %s2886_s21  }
 0x160   : > { %p14_p4 = scmp.ge.s32.totalorder %s17_s21, 4  }
 0x162   :  { %16 = sbr.rel (!%p14_p4) target bundleno = 1 (0x1), region = 95 }

</bundles_post_ra>
